<compile_context>
chip_gen: v6e
topology: v6e:2x2x1
jax: 0.10.0
libtpu: 0.0.40
codegen_flags: <defaults>
</compile_context>

<pallas_src>
import functools

import jax
import jax.numpy as jnp
from jax.experimental import pallas as pl
from jax.experimental.pallas import tpu as pltpu


# ----------------------------------------------------------------------------
# Tiling helpers (all static Python on shapes).
# ----------------------------------------------------------------------------
def _pick_spatial_grouping(H, W):
    """Smallest divisor g of H such that g*W >= 128 lanes (else g = H)."""
    g = 1
    for cand in range(1, H + 1):
        if H % cand == 0:
            g = cand
            if cand * W >= 128:
                break
    return g


def _pick_row_tile(Hg, per_row_bytes, budget_bytes=8 << 20):
    """Largest divisor t of Hg with (t % 8 == 0 or t == Hg) fitting the VMEM budget."""
    cands = [t for t in range(1, Hg + 1)
             if Hg % t == 0 and (t % 8 == 0 or t == Hg)]
    fitting = [t for t in cands if t * per_row_bytes <= budget_bytes]
    return max(fitting) if fitting else min(cands)


def _make_upsample_matrix(W, g):
    """(g*W, 4*g*W) 0/1 matrix E so that  row_block @ E == nearest-2x upsample.

    Input lane   a = r*W + j                      (r: image row in group, j: col)
    Output lane  b = r*4W + dh*2W + 2j + dj        (dh, dj in {0, 1})
    E[a, b] = 1 iff (a, b) refer to the same source pixel.
    """
    Wg = g * W
    a = jnp.arange(Wg)
    b = jnp.arange(4 * Wg)
    same_row = (a[:, None] // W) == (b[None, :] // (4 * W))
    same_col = (a[:, None] % W) == ((b[None, :] % (2 * W)) // 2)
    return (same_row & same_col).astype(jnp.float32)


# ----------------------------------------------------------------------------
# Kernel: fused 1x1-conv (VPU FMA) + BN bias + LeakyReLU + nearest-2x upsample.
# ----------------------------------------------------------------------------
def _upsample_conv_kernel(w_ref, b_ref, x_ref, e_ref, o_ref, *, cin, cout, slope):
    # w_ref: (Cout, Cin) f32 SMEM  -- conv weight with BN scale folded in
    # b_ref: (Cout,)     f32 SMEM  -- folded BN shift
    # x_ref: (1, Cin, T, Wg)       VMEM input tile        (Wg = g*W lanes)
    # e_ref: (Wg, 4*Wg)  f32       VMEM expansion matrix
    # o_ref: (1, Cout, T, 4*Wg)    VMEM output tile (final NCHW-2x layout)
    e = e_ref[...]
    xs = [x_ref[0, c].astype(jnp.float32) for c in range(cin)]
    for o in range(cout):
        # 1x1 conv as unrolled scalar-broadcast FMAs on the VPU.
        acc = xs[0] * w_ref[o, 0]
        for c in range(1, cin):
            acc = acc + xs[c] * w_ref[o, c]
        acc = acc + b_ref[o]
        acc = jnp.where(acc > 0, acc, slope * acc)            # LeakyReLU(0.1)
        # Fused nearest-neighbour 2x upsample: every value is copied into its 4
        # output slots by a 0/1 matmul (exact; the MXU has full slack here).
        up = jnp.dot(acc, e, preferred_element_type=jnp.float32,
                     precision=jax.lax.Precision.HIGHEST)
        o_ref[0, o] = up.astype(o_ref.dtype)


# ----------------------------------------------------------------------------
# Full module forward (NCHW in / NCHW out, matching PyTorch).
# ----------------------------------------------------------------------------
def upsample_modules_forward(x_nchw, conv_w, gamma, beta, run_mean, run_var,
                             *, eps=1e-5, slope=0.1):
    N, Cin, H, W = x_nchw.shape
    Cout = conv_w.shape[0]
    assert conv_w.shape == (Cout, Cin, 1, 1)

    # Fold eval-mode BatchNorm into the 1x1 conv (f32 scalars -> SMEM).
    scale = (gamma / jnp.sqrt(run_var + eps)).astype(jnp.float32)      # (Cout,)
    w_fused = conv_w.reshape(Cout, Cin).astype(jnp.float32) * scale[:, None]
    b_fused = (beta - run_mean * scale).astype(jnp.float32)            # (Cout,)

    # Pack g image rows per lane-row so the lane axis is >= 128 wide.
    g = _pick_spatial_grouping(H, W)
    Hg, Wg = H // g, g * W

    itemsize = jnp.dtype(x_nchw.dtype).itemsize
    per_row_bytes = 2 * (Cin + 4 * Cout) * Wg * itemsize   # double-buffered in+out
    T = _pick_row_tile(Hg, per_row_bytes)

    E = _make_upsample_matrix(W, g)                        # (Wg, 4*Wg) f32
    x_g = x_nchw.reshape(N, Cin, Hg, Wg)                   # bitcast-free reshape

    kernel = functools.partial(_upsample_conv_kernel,
                               cin=Cin, cout=Cout, slope=slope)
    out_g = pl.pallas_call(
        kernel,
        out_shape=jax.ShapeDtypeStruct((N, Cout, Hg, 4 * Wg), x_nchw.dtype),
        grid_spec=pltpu.PrefetchScalarGridSpec(
            num_scalar_prefetch=0,
            grid=(N, Hg // T),
            in_specs=[
                pl.BlockSpec(memory_space=pltpu.MemorySpace.SMEM),   # w_fused
                pl.BlockSpec(memory_space=pltpu.MemorySpace.SMEM),   # b_fused
                pl.BlockSpec((1, Cin, T, Wg), lambda n, h: (n, 0, h, 0)),
                pl.BlockSpec((Wg, 4 * Wg), lambda n, h: (0, 0)),
            ],
            out_specs=pl.BlockSpec((1, Cout, T, 4 * Wg),
                                   lambda n, h: (n, 0, h, 0)),
        ),
        compiler_params=pltpu.CompilerParams(
            dimension_semantics=("parallel", "parallel"),
            vmem_limit_bytes=32 * 1024 * 1024,   # explicit budget (v7x: 64 MiB phys)
        ),
    )(w_fused, b_fused, x_g, E)

    # (N, Cout, H/g, g*4W) == (N, Cout, H/g, g, 2, W, 2) -> (N, Cout, 2H, 2W).
    # Pure adjacent-dim merges: bitcast-free, no extra HBM pass.
    return out_g.reshape(N, Cout, 2 * H, 2 * W)


# ----------------------------------------------------------------------------
# Pure-JAX reference for verification.
# ----------------------------------------------------------------------------
def _reference(x_nchw, conv_w, gamma, beta, run_mean, run_var,
               *, eps=1e-5, slope=0.1):
    N, Cin, H, W = x_nchw.shape
    Cout = conv_w.shape[0]
    w2d = conv_w.reshape(Cout, Cin)
    y = jnp.einsum('nchw,oc->nohw', x_nchw, w2d)
    y = (y - run_mean[None, :, None, None]) / jnp.sqrt(
        run_var[None, :, None, None] + eps)
    y = y * gamma[None, :, None, None] + beta[None, :, None, None]
    y = jnp.where(y > 0, y, slope * y)
    y = jnp.repeat(jnp.repeat(y, 2, axis=2), 2, axis=3)
    return y


if __name__ == "__main__":
    key = jax.random.PRNGKey(0)
    k1, k2, k3, k4, k5, k6 = jax.random.split(key, 6)

    N, Cin, H, W = 2, 8, 16, 16
    Cout = Cin // 2

    x = jax.random.normal(k1, (N, Cin, H, W), dtype=jnp.float32)

    # Deterministic synthetic parameters (shapes from the module __init__).
    conv_w = jax.random.normal(k2, (Cout, Cin, 1, 1), dtype=jnp.float32) * 0.1
    gamma = 1.0 + 0.1 * jax.random.normal(k3, (Cout,), dtype=jnp.float32)
    beta = 0.1 * jax.random.normal(k4, (Cout,), dtype=jnp.float32)
    run_mean = 0.05 * jax.random.normal(k5, (Cout,), dtype=jnp.float32)
    run_var = jnp.abs(1.0 + 0.1 * jax.random.normal(k6, (Cout,), dtype=jnp.float32))

    fwd = jax.jit(upsample_modules_forward)
    out = fwd(x, conv_w, gamma, beta, run_mean, run_var)
    out = jax.block_until_ready(out)

    ref = _reference(x, conv_w, gamma, beta, run_mean, run_var)
    assert out.shape == (N, Cout, 2 * H, 2 * W), out.shape
    max_err = float(jnp.max(jnp.abs(out - ref)))
    assert jnp.allclose(out, ref, atol=1e-4, rtol=1e-4), max_err

    print("KERNEL_OK")
</pallas_src>

<mosaic_0001>
module attributes {stable_mosaic.version = 11 : i64} {
  func.func @_upsample_conv_kernel(%arg0: i32, %arg1: i32, %arg2: memref<4x8xf32, #tpu.memory_space<smem>>, %arg3: memref<4xf32, #tpu.memory_space<smem>>, %arg4: memref<1x8x2x128xf32, #tpu.memory_space<vmem>>, %arg5: memref<128x512xf32, #tpu.memory_space<vmem>>, %arg6: memref<1x4x2x512xf32, #tpu.memory_space<vmem>>) attributes {dimension_semantics = [#tpu.dimension_semantics<parallel>, #tpu.dimension_semantics<parallel>], iteration_bounds = array<i64: 2, 1>, scalar_prefetch = 0 : i64, scratch_operands = 0 : i64, tpu.core_type = #tpu.core_type<tc>, window_params = [{transform_indices = @transform_0, window_bounds = array<i64: 4, 8>}, {transform_indices = @transform_1, window_bounds = array<i64: 4>}, {transform_indices = @transform_2, window_bounds = array<i64: 1, 8, 2, 128>}, {pipeline_mode = #tpu.pipeline_mode<synchronous>, transform_indices = @transform_3, window_bounds = array<i64: 128, 512>}, {transform_indices = @transform_4, window_bounds = array<i64: 1, 4, 2, 512>}]} {
    %c0 = arith.constant 0 : index
    %c0_0 = arith.constant 0 : index
    %0 = vector.load %arg5[%c0, %c0_0] : memref<128x512xf32, #tpu.memory_space<vmem>>, vector<128x512xf32>
    %c0_1 = arith.constant 0 : index
    %c0_2 = arith.constant 0 : index
    %c0_3 = arith.constant 0 : index
    %c0_4 = arith.constant 0 : index
    %1 = vector.load %arg4[%c0_1, %c0_2, %c0_3, %c0_4] : memref<1x8x2x128xf32, #tpu.memory_space<vmem>>, vector<1x1x2x128xf32>
    %2 = vector.shape_cast %1 : vector<1x1x2x128xf32> to vector<2x128xf32>
    %c0_5 = arith.constant 0 : index
    %c1 = arith.constant 1 : index
    %c0_6 = arith.constant 0 : index
    %c0_7 = arith.constant 0 : index
    %3 = vector.load %arg4[%c0_5, %c1, %c0_6, %c0_7] : memref<1x8x2x128xf32, #tpu.memory_space<vmem>>, vector<1x1x2x128xf32>
    %4 = vector.shape_cast %3 : vector<1x1x2x128xf32> to vector<2x128xf32>
    %c0_8 = arith.constant 0 : index
    %c2 = arith.constant 2 : index
    %c0_9 = arith.constant 0 : index
    %c0_10 = arith.constant 0 : index
    %5 = vector.load %arg4[%c0_8, %c2, %c0_9, %c0_10] : memref<1x8x2x128xf32, #tpu.memory_space<vmem>>, vector<1x1x2x128xf32>
    %6 = vector.shape_cast %5 : vector<1x1x2x128xf32> to vector<2x128xf32>
    %c0_11 = arith.constant 0 : index
    %c3 = arith.constant 3 : index
    %c0_12 = arith.constant 0 : index
    %c0_13 = arith.constant 0 : index
    %7 = vector.load %arg4[%c0_11, %c3, %c0_12, %c0_13] : memref<1x8x2x128xf32, #tpu.memory_space<vmem>>, vector<1x1x2x128xf32>
    %8 = vector.shape_cast %7 : vector<1x1x2x128xf32> to vector<2x128xf32>
    %c0_14 = arith.constant 0 : index
    %c4 = arith.constant 4 : index
    %c0_15 = arith.constant 0 : index
    %c0_16 = arith.constant 0 : index
    %9 = vector.load %arg4[%c0_14, %c4, %c0_15, %c0_16] : memref<1x8x2x128xf32, #tpu.memory_space<vmem>>, vector<1x1x2x128xf32>
    %10 = vector.shape_cast %9 : vector<1x1x2x128xf32> to vector<2x128xf32>
    %c0_17 = arith.constant 0 : index
    %c5 = arith.constant 5 : index
    %c0_18 = arith.constant 0 : index
    %c0_19 = arith.constant 0 : index
    %11 = vector.load %arg4[%c0_17, %c5, %c0_18, %c0_19] : memref<1x8x2x128xf32, #tpu.memory_space<vmem>>, vector<1x1x2x128xf32>
    %12 = vector.shape_cast %11 : vector<1x1x2x128xf32> to vector<2x128xf32>
    %c0_20 = arith.constant 0 : index
    %c6 = arith.constant 6 : index
    %c0_21 = arith.constant 0 : index
    %c0_22 = arith.constant 0 : index
    %13 = vector.load %arg4[%c0_20, %c6, %c0_21, %c0_22] : memref<1x8x2x128xf32, #tpu.memory_space<vmem>>, vector<1x1x2x128xf32>
    %14 = vector.shape_cast %13 : vector<1x1x2x128xf32> to vector<2x128xf32>
    %c0_23 = arith.constant 0 : index
    %c7 = arith.constant 7 : index
    %c0_24 = arith.constant 0 : index
    %c0_25 = arith.constant 0 : index
    %15 = vector.load %arg4[%c0_23, %c7, %c0_24, %c0_25] : memref<1x8x2x128xf32, #tpu.memory_space<vmem>>, vector<1x1x2x128xf32>
    %16 = vector.shape_cast %15 : vector<1x1x2x128xf32> to vector<2x128xf32>
    %c0_26 = arith.constant 0 : index
    %c0_27 = arith.constant 0 : index
    %17 = memref.load %arg2[%c0_26, %c0_27] : memref<4x8xf32, #tpu.memory_space<smem>>
    %18 = vector.broadcast %17 : f32 to vector<2x128xf32>
    %19 = arith.mulf %2, %18 : vector<2x128xf32>
    %c0_28 = arith.constant 0 : index
    %c1_29 = arith.constant 1 : index
    %20 = memref.load %arg2[%c0_28, %c1_29] : memref<4x8xf32, #tpu.memory_space<smem>>
    %21 = vector.broadcast %20 : f32 to vector<2x128xf32>
    %22 = arith.mulf %4, %21 : vector<2x128xf32>
    %23 = arith.addf %19, %22 : vector<2x128xf32>
    %c0_30 = arith.constant 0 : index
    %c2_31 = arith.constant 2 : index
    %24 = memref.load %arg2[%c0_30, %c2_31] : memref<4x8xf32, #tpu.memory_space<smem>>
    %25 = vector.broadcast %24 : f32 to vector<2x128xf32>
    %26 = arith.mulf %6, %25 : vector<2x128xf32>
    %27 = arith.addf %23, %26 : vector<2x128xf32>
    %c0_32 = arith.constant 0 : index
    %c3_33 = arith.constant 3 : index
    %28 = memref.load %arg2[%c0_32, %c3_33] : memref<4x8xf32, #tpu.memory_space<smem>>
    %29 = vector.broadcast %28 : f32 to vector<2x128xf32>
    %30 = arith.mulf %8, %29 : vector<2x128xf32>
    %31 = arith.addf %27, %30 : vector<2x128xf32>
    %c0_34 = arith.constant 0 : index
    %c4_35 = arith.constant 4 : index
    %32 = memref.load %arg2[%c0_34, %c4_35] : memref<4x8xf32, #tpu.memory_space<smem>>
    %33 = vector.broadcast %32 : f32 to vector<2x128xf32>
    %34 = arith.mulf %10, %33 : vector<2x128xf32>
    %35 = arith.addf %31, %34 : vector<2x128xf32>
    %c0_36 = arith.constant 0 : index
    %c5_37 = arith.constant 5 : index
    %36 = memref.load %arg2[%c0_36, %c5_37] : memref<4x8xf32, #tpu.memory_space<smem>>
    %37 = vector.broadcast %36 : f32 to vector<2x128xf32>
    %38 = arith.mulf %12, %37 : vector<2x128xf32>
    %39 = arith.addf %35, %38 : vector<2x128xf32>
    %c0_38 = arith.constant 0 : index
    %c6_39 = arith.constant 6 : index
    %40 = memref.load %arg2[%c0_38, %c6_39] : memref<4x8xf32, #tpu.memory_space<smem>>
    %41 = vector.broadcast %40 : f32 to vector<2x128xf32>
    %42 = arith.mulf %14, %41 : vector<2x128xf32>
    %43 = arith.addf %39, %42 : vector<2x128xf32>
    %c0_40 = arith.constant 0 : index
    %c7_41 = arith.constant 7 : index
    %44 = memref.load %arg2[%c0_40, %c7_41] : memref<4x8xf32, #tpu.memory_space<smem>>
    %45 = vector.broadcast %44 : f32 to vector<2x128xf32>
    %46 = arith.mulf %16, %45 : vector<2x128xf32>
    %47 = arith.addf %43, %46 : vector<2x128xf32>
    %c0_42 = arith.constant 0 : index
    %48 = memref.load %arg3[%c0_42] : memref<4xf32, #tpu.memory_space<smem>>
    %49 = vector.broadcast %48 : f32 to vector<2x128xf32>
    %50 = arith.addf %47, %49 : vector<2x128xf32>
    %cst = arith.constant 0.000000e+00 : f32
    %51 = vector.broadcast %cst : f32 to vector<2x128xf32>
    %52 = arith.cmpf ogt, %50, %51 : vector<2x128xf32>
    %cst_43 = arith.constant 1.000000e-01 : f32
    %53 = vector.broadcast %cst_43 : f32 to vector<2x128xf32>
    %54 = arith.mulf %53, %50 : vector<2x128xf32>
    %55 = arith.select %52, %50, %54 : vector<2x128xi1>, vector<2x128xf32>
    %cst_44 = arith.constant dense<0.000000e+00> : vector<2x512xf32>
    %56 = tpu.matmul %55, %0, %cst_44 {dimension_numbers = #tpu.dot_dimension_numbers<[1], [0], [0], [1], [0, 0, 1, 1], [], []>, precision = #tpu.contract_precision<fp32>} : vector<2x128xf32>, vector<128x512xf32>, vector<2x512xf32> -> vector<2x512xf32>
    %c0_45 = arith.constant 0 : index
    %c0_46 = arith.constant 0 : index
    %c0_47 = arith.constant 0 : index
    %c0_48 = arith.constant 0 : index
    %57 = vector.load %arg6[%c0_45, %c0_46, %c0_47, %c0_48] : memref<1x4x2x512xf32, #tpu.memory_space<vmem>>, vector<1x1x2x512xf32>
    %58 = vector.shape_cast %57 : vector<1x1x2x512xf32> to vector<2x512xf32>
    %59 = vector.shape_cast %56 : vector<2x512xf32> to vector<1x1x2x512xf32>
    tpu.vector_store %arg6[%c0_45, %c0_46, %c0_47, %c0_48], %59 {strides = array<i32>} : memref<1x4x2x512xf32, #tpu.memory_space<vmem>>, vector<1x1x2x512xf32>,
    %c1_49 = arith.constant 1 : index
    %c0_50 = arith.constant 0 : index
    %60 = memref.load %arg2[%c1_49, %c0_50] : memref<4x8xf32, #tpu.memory_space<smem>>
    %61 = vector.broadcast %60 : f32 to vector<2x128xf32>
    %62 = arith.mulf %2, %61 : vector<2x128xf32>
    %c1_51 = arith.constant 1 : index
    %c1_52 = arith.constant 1 : index
    %63 = memref.load %arg2[%c1_51, %c1_52] : memref<4x8xf32, #tpu.memory_space<smem>>
    %64 = vector.broadcast %63 : f32 to vector<2x128xf32>
    %65 = arith.mulf %4, %64 : vector<2x128xf32>
    %66 = arith.addf %62, %65 : vector<2x128xf32>
    %c1_53 = arith.constant 1 : index
    %c2_54 = arith.constant 2 : index
    %67 = memref.load %arg2[%c1_53, %c2_54] : memref<4x8xf32, #tpu.memory_space<smem>>
    %68 = vector.broadcast %67 : f32 to vector<2x128xf32>
    %69 = arith.mulf %6, %68 : vector<2x128xf32>
    %70 = arith.addf %66, %69 : vector<2x128xf32>
    %c1_55 = arith.constant 1 : index
    %c3_56 = arith.constant 3 : index
    %71 = memref.load %arg2[%c1_55, %c3_56] : memref<4x8xf32, #tpu.memory_space<smem>>
    %72 = vector.broadcast %71 : f32 to vector<2x128xf32>
    %73 = arith.mulf %8, %72 : vector<2x128xf32>
    %74 = arith.addf %70, %73 : vector<2x128xf32>
    %c1_57 = arith.constant 1 : index
    %c4_58 = arith.constant 4 : index
    %75 = memref.load %arg2[%c1_57, %c4_58] : memref<4x8xf32, #tpu.memory_space<smem>>
    %76 = vector.broadcast %75 : f32 to vector<2x128xf32>
    %77 = arith.mulf %10, %76 : vector<2x128xf32>
    %78 = arith.addf %74, %77 : vector<2x128xf32>
    %c1_59 = arith.constant 1 : index
    %c5_60 = arith.constant 5 : index
    %79 = memref.load %arg2[%c1_59, %c5_60] : memref<4x8xf32, #tpu.memory_space<smem>>
    %80 = vector.broadcast %79 : f32 to vector<2x128xf32>
    %81 = arith.mulf %12, %80 : vector<2x128xf32>
    %82 = arith.addf %78, %81 : vector<2x128xf32>
    %c1_61 = arith.constant 1 : index
    %c6_62 = arith.constant 6 : index
    %83 = memref.load %arg2[%c1_61, %c6_62] : memref<4x8xf32, #tpu.memory_space<smem>>
    %84 = vector.broadcast %83 : f32 to vector<2x128xf32>
    %85 = arith.mulf %14, %84 : vector<2x128xf32>
    %86 = arith.addf %82, %85 : vector<2x128xf32>
    %c1_63 = arith.constant 1 : index
    %c7_64 = arith.constant 7 : index
    %87 = memref.load %arg2[%c1_63, %c7_64] : memref<4x8xf32, #tpu.memory_space<smem>>
    %88 = vector.broadcast %87 : f32 to vector<2x128xf32>
    %89 = arith.mulf %16, %88 : vector<2x128xf32>
    %90 = arith.addf %86, %89 : vector<2x128xf32>
    %c1_65 = arith.constant 1 : index
    %91 = memref.load %arg3[%c1_65] : memref<4xf32, #tpu.memory_space<smem>>
    %92 = vector.broadcast %91 : f32 to vector<2x128xf32>
    %93 = arith.addf %90, %92 : vector<2x128xf32>
    %cst_66 = arith.constant 0.000000e+00 : f32
    %94 = vector.broadcast %cst_66 : f32 to vector<2x128xf32>
    %95 = arith.cmpf ogt, %93, %94 : vector<2x128xf32>
    %cst_67 = arith.constant 1.000000e-01 : f32
    %96 = vector.broadcast %cst_67 : f32 to vector<2x128xf32>
    %97 = arith.mulf %96, %93 : vector<2x128xf32>
    %98 = arith.select %95, %93, %97 : vector<2x128xi1>, vector<2x128xf32>
    %cst_68 = arith.constant dense<0.000000e+00> : vector<2x512xf32>
    %99 = tpu.matmul %98, %0, %cst_68 {dimension_numbers = #tpu.dot_dimension_numbers<[1], [0], [0], [1], [0, 0, 1, 1], [], []>, precision = #tpu.contract_precision<fp32>} : vector<2x128xf32>, vector<128x512xf32>, vector<2x512xf32> -> vector<2x512xf32>
    %c0_69 = arith.constant 0 : index
    %c1_70 = arith.constant 1 : index
    %c0_71 = arith.constant 0 : index
    %c0_72 = arith.constant 0 : index
    %100 = vector.load %arg6[%c0_69, %c1_70, %c0_71, %c0_72] : memref<1x4x2x512xf32, #tpu.memory_space<vmem>>, vector<1x1x2x512xf32>
    %101 = vector.shape_cast %100 : vector<1x1x2x512xf32> to vector<2x512xf32>
    %102 = vector.shape_cast %99 : vector<2x512xf32> to vector<1x1x2x512xf32>
    tpu.vector_store %arg6[%c0_69, %c1_70, %c0_71, %c0_72], %102 {strides = array<i32>} : memref<1x4x2x512xf32, #tpu.memory_space<vmem>>, vector<1x1x2x512xf32>,
    %c2_73 = arith.constant 2 : index
    %c0_74 = arith.constant 0 : index
    %103 = memref.load %arg2[%c2_73, %c0_74] : memref<4x8xf32, #tpu.memory_space<smem>>
    %104 = vector.broadcast %103 : f32 to vector<2x128xf32>
    %105 = arith.mulf %2, %104 : vector<2x128xf32>
    %c2_75 = arith.constant 2 : index
    %c1_76 = arith.constant 1 : index
    %106 = memref.load %arg2[%c2_75, %c1_76] : memref<4x8xf32, #tpu.memory_space<smem>>
    %107 = vector.broadcast %106 : f32 to vector<2x128xf32>
    %108 = arith.mulf %4, %107 : vector<2x128xf32>
    %109 = arith.addf %105, %108 : vector<2x128xf32>
    %c2_77 = arith.constant 2 : index
    %c2_78 = arith.constant 2 : index
    %110 = memref.load %arg2[%c2_77, %c2_78] : memref<4x8xf32, #tpu.memory_space<smem>>
    %111 = vector.broadcast %110 : f32 to vector<2x128xf32>
    %112 = arith.mulf %6, %111 : vector<2x128xf32>
    %113 = arith.addf %109, %112 : vector<2x128xf32>
    %c2_79 = arith.constant 2 : index
    %c3_80 = arith.constant 3 : index
    %114 = memref.load %arg2[%c2_79, %c3_80] : memref<4x8xf32, #tpu.memory_space<smem>>
    %115 = vector.broadcast %114 : f32 to vector<2x128xf32>
    %116 = arith.mulf %8, %115 : vector<2x128xf32>
    %117 = arith.addf %113, %116 : vector<2x128xf32>
    %c2_81 = arith.constant 2 : index
    %c4_82 = arith.constant 4 : index
    %118 = memref.load %arg2[%c2_81, %c4_82] : memref<4x8xf32, #tpu.memory_space<smem>>
    %119 = vector.broadcast %118 : f32 to vector<2x128xf32>
    %120 = arith.mulf %10, %119 : vector<2x128xf32>
    %121 = arith.addf %117, %120 : vector<2x128xf32>
    %c2_83 = arith.constant 2 : index
    %c5_84 = arith.constant 5 : index
    %122 = memref.load %arg2[%c2_83, %c5_84] : memref<4x8xf32, #tpu.memory_space<smem>>
    %123 = vector.broadcast %122 : f32 to vector<2x128xf32>
    %124 = arith.mulf %12, %123 : vector<2x128xf32>
    %125 = arith.addf %121, %124 : vector<2x128xf32>
    %c2_85 = arith.constant 2 : index
    %c6_86 = arith.constant 6 : index
    %126 = memref.load %arg2[%c2_85, %c6_86] : memref<4x8xf32, #tpu.memory_space<smem>>
    %127 = vector.broadcast %126 : f32 to vector<2x128xf32>
    %128 = arith.mulf %14, %127 : vector<2x128xf32>
    %129 = arith.addf %125, %128 : vector<2x128xf32>
    %c2_87 = arith.constant 2 : index
    %c7_88 = arith.constant 7 : index
    %130 = memref.load %arg2[%c2_87, %c7_88] : memref<4x8xf32, #tpu.memory_space<smem>>
    %131 = vector.broadcast %130 : f32 to vector<2x128xf32>
    %132 = arith.mulf %16, %131 : vector<2x128xf32>
    %133 = arith.addf %129, %132 : vector<2x128xf32>
    %c2_89 = arith.constant 2 : index
    %134 = memref.load %arg3[%c2_89] : memref<4xf32, #tpu.memory_space<smem>>
    %135 = vector.broadcast %134 : f32 to vector<2x128xf32>
    %136 = arith.addf %133, %135 : vector<2x128xf32>
    %cst_90 = arith.constant 0.000000e+00 : f32
    %137 = vector.broadcast %cst_90 : f32 to vector<2x128xf32>
    %138 = arith.cmpf ogt, %136, %137 : vector<2x128xf32>
    %cst_91 = arith.constant 1.000000e-01 : f32
    %139 = vector.broadcast %cst_91 : f32 to vector<2x128xf32>
    %140 = arith.mulf %139, %136 : vector<2x128xf32>
    %141 = arith.select %138, %136, %140 : vector<2x128xi1>, vector<2x128xf32>
    %cst_92 = arith.constant dense<0.000000e+00> : vector<2x512xf32>
    %142 = tpu.matmul %141, %0, %cst_92 {dimension_numbers = #tpu.dot_dimension_numbers<[1], [0], [0], [1], [0, 0, 1, 1], [], []>, precision = #tpu.contract_precision<fp32>} : vector<2x128xf32>, vector<128x512xf32>, vector<2x512xf32> -> vector<2x512xf32>
    %c0_93 = arith.constant 0 : index
    %c2_94 = arith.constant 2 : index
    %c0_95 = arith.constant 0 : index
    %c0_96 = arith.constant 0 : index
    %143 = vector.load %arg6[%c0_93, %c2_94, %c0_95, %c0_96] : memref<1x4x2x512xf32, #tpu.memory_space<vmem>>, vector<1x1x2x512xf32>
    %144 = vector.shape_cast %143 : vector<1x1x2x512xf32> to vector<2x512xf32>
    %145 = vector.shape_cast %142 : vector<2x512xf32> to vector<1x1x2x512xf32>
    tpu.vector_store %arg6[%c0_93, %c2_94, %c0_95, %c0_96], %145 {strides = array<i32>} : memref<1x4x2x512xf32, #tpu.memory_space<vmem>>, vector<1x1x2x512xf32>,
    %c3_97 = arith.constant 3 : index
    %c0_98 = arith.constant 0 : index
    %146 = memref.load %arg2[%c3_97, %c0_98] : memref<4x8xf32, #tpu.memory_space<smem>>
    %147 = vector.broadcast %146 : f32 to vector<2x128xf32>
    %148 = arith.mulf %2, %147 : vector<2x128xf32>
    %c3_99 = arith.constant 3 : index
    %c1_100 = arith.constant 1 : index
    %149 = memref.load %arg2[%c3_99, %c1_100] : memref<4x8xf32, #tpu.memory_space<smem>>
    %150 = vector.broadcast %149 : f32 to vector<2x128xf32>
    %151 = arith.mulf %4, %150 : vector<2x128xf32>
    %152 = arith.addf %148, %151 : vector<2x128xf32>
    %c3_101 = arith.constant 3 : index
    %c2_102 = arith.constant 2 : index
    %153 = memref.load %arg2[%c3_101, %c2_102] : memref<4x8xf32, #tpu.memory_space<smem>>
    %154 = vector.broadcast %153 : f32 to vector<2x128xf32>
    %155 = arith.mulf %6, %154 : vector<2x128xf32>
    %156 = arith.addf %152, %155 : vector<2x128xf32>
    %c3_103 = arith.constant 3 : index
    %c3_104 = arith.constant 3 : index
    %157 = memref.load %arg2[%c3_103, %c3_104] : memref<4x8xf32, #tpu.memory_space<smem>>
    %158 = vector.broadcast %157 : f32 to vector<2x128xf32>
    %159 = arith.mulf %8, %158 : vector<2x128xf32>
    %160 = arith.addf %156, %159 : vector<2x128xf32>
    %c3_105 = arith.constant 3 : index
    %c4_106 = arith.constant 4 : index
    %161 = memref.load %arg2[%c3_105, %c4_106] : memref<4x8xf32, #tpu.memory_space<smem>>
    %162 = vector.broadcast %161 : f32 to vector<2x128xf32>
    %163 = arith.mulf %10, %162 : vector<2x128xf32>
    %164 = arith.addf %160, %163 : vector<2x128xf32>
    %c3_107 = arith.constant 3 : index
    %c5_108 = arith.constant 5 : index
    %165 = memref.load %arg2[%c3_107, %c5_108] : memref<4x8xf32, #tpu.memory_space<smem>>
    %166 = vector.broadcast %165 : f32 to vector<2x128xf32>
    %167 = arith.mulf %12, %166 : vector<2x128xf32>
    %168 = arith.addf %164, %167 : vector<2x128xf32>
    %c3_109 = arith.constant 3 : index
    %c6_110 = arith.constant 6 : index
    %169 = memref.load %arg2[%c3_109, %c6_110] : memref<4x8xf32, #tpu.memory_space<smem>>
    %170 = vector.broadcast %169 : f32 to vector<2x128xf32>
    %171 = arith.mulf %14, %170 : vector<2x128xf32>
    %172 = arith.addf %168, %171 : vector<2x128xf32>
    %c3_111 = arith.constant 3 : index
    %c7_112 = arith.constant 7 : index
    %173 = memref.load %arg2[%c3_111, %c7_112] : memref<4x8xf32, #tpu.memory_space<smem>>
    %174 = vector.broadcast %173 : f32 to vector<2x128xf32>
    %175 = arith.mulf %16, %174 : vector<2x128xf32>
    %176 = arith.addf %172, %175 : vector<2x128xf32>
    %c3_113 = arith.constant 3 : index
    %177 = memref.load %arg3[%c3_113] : memref<4xf32, #tpu.memory_space<smem>>
    %178 = vector.broadcast %177 : f32 to vector<2x128xf32>
    %179 = arith.addf %176, %178 : vector<2x128xf32>
    %cst_114 = arith.constant 0.000000e+00 : f32
    %180 = vector.broadcast %cst_114 : f32 to vector<2x128xf32>
    %181 = arith.cmpf ogt, %179, %180 : vector<2x128xf32>
    %cst_115 = arith.constant 1.000000e-01 : f32
    %182 = vector.broadcast %cst_115 : f32 to vector<2x128xf32>
    %183 = arith.mulf %182, %179 : vector<2x128xf32>
    %184 = arith.select %181, %179, %183 : vector<2x128xi1>, vector<2x128xf32>
    %cst_116 = arith.constant dense<0.000000e+00> : vector<2x512xf32>
    %185 = tpu.matmul %184, %0, %cst_116 {dimension_numbers = #tpu.dot_dimension_numbers<[1], [0], [0], [1], [0, 0, 1, 1], [], []>, precision = #tpu.contract_precision<fp32>} : vector<2x128xf32>, vector<128x512xf32>, vector<2x512xf32> -> vector<2x512xf32>
    %c0_117 = arith.constant 0 : index
    %c3_118 = arith.constant 3 : index
    %c0_119 = arith.constant 0 : index
    %c0_120 = arith.constant 0 : index
    %186 = vector.load %arg6[%c0_117, %c3_118, %c0_119, %c0_120] : memref<1x4x2x512xf32, #tpu.memory_space<vmem>>, vector<1x1x2x512xf32>
    %187 = vector.shape_cast %186 : vector<1x1x2x512xf32> to vector<2x512xf32>
    %188 = vector.shape_cast %185 : vector<2x512xf32> to vector<1x1x2x512xf32>
    tpu.vector_store %arg6[%c0_117, %c3_118, %c0_119, %c0_120], %188 {strides = array<i32>} : memref<1x4x2x512xf32, #tpu.memory_space<vmem>>, vector<1x1x2x512xf32>,
    return
  }
  func.func @transform_0(%arg0: i32, %arg1: i32) -> (i32, i32) {
    %c0_i32 = arith.constant 0 : i32
    %c0_i32_0 = arith.constant 0 : i32
    %c0_i32_1 = arith.constant 0 : i32
    return %c0_i32, %c0_i32_0 : i32, i32
  }
  func.func @transform_1(%arg0: i32, %arg1: i32) -> i32 {
    %c0_i32 = arith.constant 0 : i32
    %c0_i32_0 = arith.constant 0 : i32
    return %c0_i32 : i32
  }
  func.func @transform_2(%arg0: i32, %arg1: i32) -> (i32, i32, i32, i32) {
    %c0_i32 = arith.constant 0 : i32
    %c0_i32_0 = arith.constant 0 : i32
    %c0_i32_1 = arith.constant 0 : i32
    return %arg0, %c0_i32, %arg1, %c0_i32_0 : i32, i32, i32, i32
  }
  func.func @transform_3(%arg0: i32, %arg1: i32) -> (i32, i32) {
    %c0_i32 = arith.constant 0 : i32
    %c0_i32_0 = arith.constant 0 : i32
    %c0_i32_1 = arith.constant 0 : i32
    return %c0_i32, %c0_i32_0 : i32, i32
  }
  func.func @transform_4(%arg0: i32, %arg1: i32) -> (i32, i32, i32, i32) {
    %c0_i32 = arith.constant 0 : i32
    %c0_i32_0 = arith.constant 0 : i32
    %c0_i32_1 = arith.constant 0 : i32
    return %arg0, %c0_i32, %arg1, %c0_i32_0 : i32, i32, i32, i32
  }
}

</mosaic_0001>

<bundles_post_ra>
// kernel: upsample_modules_forward.1
= control target key start
LH: loop header
LB: loop body
LE: loop exit
PB: predicated region body
PF: predicated region fallthrough
CT: control target
= control target key end

     0   :  { %9 = vsyncpa [#allocation3], 0  ;;  %s10824_s0 = inlined_call_operand.vmem [shape: f32[4,8], index: 0, kind: input, shape index: {}]   ;;  %s10825_s1 = inlined_call_operand.vmem [shape: f32[4], index: 1, kind: input, shape index: {}]   ;;  %s10826_s2 = inlined_call_operand.vmem [shape: f32[2,8,2,128], index: 2, kind: input, shape index: {}]   ;;  %s10827_s3 = inlined_call_operand.vmem [shape: f32[128,512], index: 3, kind: input, shape index: {}]   ;;  %s10828_s4 = inlined_call_operand.vmem [shape: f32[2,4,2,512], index: 4, kind: output, shape index: {}]  }
   0x1   :  { %10 = vsyncpa [#allocation5], 0  ;;  %s7747_s15 = smov 0   ;;  %s7749_s16 = smov 0  }
   0x2   :  { %s7751_s17 = smov 0  }
   0x3 LB: > { %s7532_s18 = sadd.s32 4294967295, %s7716_s17   ;;  %s28_s19 = sadd.s32 1, %s7712_s16  ;;  %s7716_s17 = sphi %s7751_s17, %s16_s17   ;;  %s7712_s16 = sphi %s7749_s16, %s12504_s16   ;;  %s7708_s15 = sphi %s7747_s15, %s12503_s15  }
   0x4   : > { %p30_p0 = scmp.ge.s32.totalorder %s28_s19, 2  ;;  %p7534_p1 = scmp.ge.s32.totalorder %s7716_s17, 1 }
   0x5   : > { %p152_p2 = scmp.lt.s32.totalorder %s7716_s17, 3  ;;  %p7772_p4 = scmp.eq.s32.totalorder %s7532_s18, 0 }
   0x6   : > { %s12506_s19 = smov (%p30_p0, %s28_s19), 0  ;;  %s165_s24 = sshll.u32 %s10824_s0, 4  ;;  %s166_s24 = int_to_ptr.vmem [resolvable:$true] %s165_s24 }
   0x7   : > { %p7768_p3 = pnand %p7534_p1, %p152_p2  ;;  %s176_s27 = sshll.u32 %s10825_s1, 4  ;;  %s177_s27 = int_to_ptr.vmem [resolvable:$true] %s176_s27 }
   0x8   : > { %s11428_s21 = scalar_select %p7772_p4, 1, 0 }
   0x9   : > { %s11427_s20 = scalar_select %p7768_p3, 1, 0 }
   0xa   : > { %p7601_p5 = pneg %p7768_p3  ;;  %s7656_s29 = scalar_lea.vmem %s166_s24, 64 }
   0xb   : > { %p7657_p7 = scmp.ne.s32.totalorder %s166_s24, %s7656_s29  ;;  %p7664_p11 = scmp.lt.s32.totalorder %s166_s24, %s166_s24 }
   0xc   : > { %p7786_p6 = pnand %p7772_p4, %p7601_p5  ;;  %p7665_p12 = scmp.lt.s32.totalorder %s7656_s29, %s7656_s29 }
   0xe   : > { %p7658_p8 = pneg %p7786_p6  ;;  %p7666_p13 = por %p7665_p12, %p7664_p11 }
  0x10   : > { %p7659_p9 = pnand %p7658_p8, %p7657_p7 }
  0x12   : > { %p7660_p10 = pneg %p7659_p9 }
  0x14   : > { %p7667_p0 = pnand %p7666_p13, %p7660_p10 }
  0x16   : > { %7670 = shalt.err (!%p7667_p0)
}
  0x17   : > { %s7718_s30 = smov [#allocation2]   ;;  %s7671_s5 = scalar_lea.vmem %s177_s27, 16 }
  0x18   : > { %7604 = dma.vmem_to_smem (!%p7786_p6), %s166_s24, 64, %s7718_s30, [#allocation3]  }
  0x19   : > { %p7672_p1 = scmp.ne.s32.totalorder %s177_s27, %s7671_s5  ;;  %p7679_p4 = scmp.lt.s32.totalorder %s177_s27, %s177_s27 }
  0x1a   : > { %p7680_p3 = scmp.lt.s32.totalorder %s7671_s5, %s7671_s5 }
  0x1b   : > { %p7674_p2 = pnand %p7672_p1, %p7658_p8 }
  0x1c   : > { %p7681_p7 = por %p7680_p3, %p7679_p4 }
  0x1d   : > { %p7675_p5 = pneg %p7674_p2 }
  0x1f   : > { %p7682_p9 = pnand %p7681_p7, %p7675_p5 }
  0x21   : > { %7685 = shalt.err (!%p7682_p9)
}
  0x22   : > { %s7719_s6 = smov [#allocation4]   ;;  %p11430_p10 = scmp.ne.s32.totalorder %s11427_s20, 0 }
  0x23   : > { %7607 = dma.vmem_to_smem (!%p7786_p6), %s177_s27, 16, %s7719_s6, [#allocation5]  }
  0x24   : > { %203 = sbr.rel (%p11430_p10) target bundleno = 1117 (0x45d), region = 36 }
  0x29   : > { %p11431_p11 = scmp.ne.s32.totalorder %s11428_s21, 0 }
  0x2b   : > { %7699 = dma.done.wait (%p11431_p11), [#allocation3], 64  }
  0x2c   : > { %7701 = vsyncadd (%p11431_p11), [#allocation3], 4294967232 }
  0x2d   : > { %7703 = dma.done.wait (%p11431_p11), [#allocation5], 16  }
  0x2e   : > { %7705 = vsyncadd (%p11431_p11), [#allocation5], 4294967280 }
  0x2f   : > { %213 = sfence }
  0x30   : > { %v319_v0 = vld [vmem:[%s10827_s3 + $0x1e8] sm:$0xff]  ;;  %v318_v1 = vld [vmem:[%s10827_s3 + $0x1e0] sm:$0xff]  ;;  %v10832_v9 = vmov 0.0   ;;  %p241_p3 = scmp.lt.s32.totalorder %s7708_s15, 1  ;;  %s8235_s26 = sld [smem:[#allocation2]] }
  0x31   : > { %v315_v2 = vld [vmem:[%s10827_s3 + $0x1c8] sm:$0xff]  ;;  %v7815_v3 = vand.u32 4294901760, %v319_v0  ;;  %v7817_v4 = vand.u32 4294901760, %v318_v1  ;;  %v314_v6 = vld [vmem:[%s10827_s3 + $0x1c0] sm:$0xff]  ;;  %470 = vmatprep.mubr.f32.mxu0 %v10832_v9  ;;  %706 = vmatprep.mubr.f32.mxu1 %v10832_v9  ;;  %s8254_s29 = sld [smem:[#allocation2 + $0x1]] }
  0x32   : > { %v7819_v5 = vand.u32 4294901760, %v315_v2  ;;  %v311_v7 = vld [vmem:[%s10827_s3 + $0x1a8] sm:$0xff]  ;;  %v310_v8 = vld [vmem:[%s10827_s3 + $0x1a0] sm:$0xff]  ;;  %v7832_v10 = vand.u32 4294901760, %v314_v6  ;;  %s12508_s15 = smov (!%p241_p3, %s7708_s15), 1  ;;  %s8274_s6 = sld [smem:[#allocation2 + $0x2]] }
  0x33   : > { %11432 = vst [vmem:[#allocation8_spill] sm:$0xff] %v7815_v3  ;;  %11433 = vst [vmem:[#allocation9_spill] sm:$0xff] %v7817_v4  ;;  %v7834_v11 = vand.u32 4294901760, %v311_v7  ;;  %v7836_v12 = vand.u32 4294901760, %v310_v8  ;;  %v307_v13 = vld [vmem:[%s10827_s3 + $0x188] sm:$0xff]  ;;  %v306_v14 = vld [vmem:[%s10827_s3 + $0x180] sm:$0xff]  ;;  %375 = vmatprep.subr.mxu0 %v7815_v3  ;;  %v7851_v17 = vsub.f32 %v319_v0, %v7815_v3  ;;  %v7856_v19 = vsub.f32 %v318_v1, %v7817_v4 }
  0x34   : > { %11434 = vst [vmem:[#allocation10_spill] sm:$0xff] %v7819_v5  ;;  %11435 = vst [vmem:[#allocation11_spill] sm:$0xff] %v7832_v10  ;;  %v303_v15 = vld [vmem:[%s10827_s3 + $0x168] sm:$0xff]  ;;  %v7848_v16 = vand.u32 4294901760, %v307_v13  ;;  %v7853_v18 = vand.u32 4294901760, %v306_v14  ;;  %v302_v20 = vld [vmem:[%s10827_s3 + $0x160] sm:$0xff]  ;;  %377 = vmatpush1.msra.mxu0 %v7817_v4  ;;  %v7873_v24 = vsub.f32 %v315_v2, %v7819_v5  ;;  %v7878_v26 = vsub.f32 %v314_v6, %v7832_v10 }
  0x35   : > { %11436 = vst [vmem:[#allocation12_spill] sm:$0xff] %v7834_v11  ;;  %11437 = vst [vmem:[#allocation13_spill] sm:$0xff] %v7836_v12  ;;  %v299_v21 = vld [vmem:[%s10827_s3 + $0x148] sm:$0xff]  ;;  %v7867_v22 = vld [vmem:[%s10827_s3 + $0x140] sm:$0xff]  ;;  %v7870_v23 = vand.u32 4294901760, %v303_v15  ;;  %v7875_v25 = vand.u32 4294901760, %v302_v20  ;;  %379 = vmatprep.subr.mxu0 %v7819_v5  ;;  %v7895_v31 = vsub.f32 %v311_v7, %v7834_v11  ;;  %v7908_v35 = vsub.f32 %v310_v8, %v7836_v12 }
  0x36   : > { %11438 = vst [vmem:[#allocation14_spill] sm:$0xff] %v7848_v16  ;;  %11439 = vst [vmem:[#allocation15_spill] sm:$0xff] %v7851_v17  ;;  %v7883_v27 = vld [vmem:[%s10827_s3 + $0x128] sm:$0xff]  ;;  %v7887_v28 = vand.u32 4294901760, %v7851_v17  ;;  %v7890_v29 = vand.u32 4294901760, %v7856_v19  ;;  %v7892_v30 = vand.u32 4294901760, %v299_v21  ;;  %381 = vmatpush1.msra.mxu0 %v7832_v10  ;;  %v7935_v44 = vsub.f32 %v307_v13, %v7848_v16 }
  0x37   : > { %11440 = vst [vmem:[#allocation16_spill] sm:$0xff] %v7853_v18  ;;  %11441 = vst [vmem:[#allocation17_spill] sm:$0xff] %v7856_v19  ;;  %v7899_v32 = vand.u32 4294901760, %v7873_v24  ;;  %v7902_v33 = vand.u32 4294901760, %v7878_v26  ;;  %v7905_v34 = vand.u32 4294901760, %v7867_v22  ;;  %v7913_v36 = vld [vmem:[%s10827_s3 + $0x120] sm:$0xff]  ;;  %383 = vmatprep.subr.mxu0 %v7834_v11  ;;  %v7977_v57 = vsub.f32 %v306_v14, %v7853_v18 }
  0x38   : > { %11442 = vst [vmem:[#allocation18_spill] sm:$0xff] %v7870_v23  ;;  %11443 = vst [vmem:[#allocation19_spill] sm:$0xff] %v7873_v24  ;;  %v485_v37 = vsub.f32 %v7851_v17, %v7887_v28  ;;  %v491_v38 = vsub.f32 %v7856_v19, %v7890_v29  ;;  %v7921_v39 = vand.u32 4294901760, %v7895_v31  ;;  %v7924_v40 = vand.u32 4294901760, %v7883_v27  ;;  %385 = vmatpush1.msra.mxu0 %v7836_v12  ;;  %v7940_v45 = vld [vmem:[%s10827_s3 + $0x108] sm:$0xff]  ;;  %v7955_v50 = vld [vmem:[%s10827_s3 + $0x100] sm:$0xff] }
  0x39   : > { %11444 = vst [vmem:[#allocation20_spill] sm:$0xff] %v7875_v25  ;;  %11445 = vst [vmem:[#allocation21_spill] sm:$0xff] %v7878_v26  ;;  %v497_v41 = vsub.f32 %v7873_v24, %v7899_v32  ;;  %v503_v42 = vsub.f32 %v7878_v26, %v7902_v33  ;;  %v7932_v43 = vand.u32 4294901760, %v7908_v35  ;;  %387 = vmatprep.subr.mxu0 %v7848_v16  ;;  %v7950_v49 = vand.u32 4294901760, %v7913_v36  ;;  %v7970_v55 = vld [vmem:[%s10827_s3 + $0xe8] sm:$0xff]  ;;  %v7988_v60 = vld [vmem:[%s10827_s3 + $0xe0] sm:$0xff] }
  0x3a   : > { %11446 = vst [vmem:[#allocation22_spill] sm:$0xff] %v7887_v28  ;;  %11447 = vst [vmem:[#allocation23_spill] sm:$0xff] %v7890_v29  ;;  %v7943_v46 = vand.u32 4294901760, %v485_v37  ;;  %v7945_v47 = vand.u32 4294901760, %v491_v38  ;;  %v509_v48 = vsub.f32 %v7895_v31, %v7921_v39  ;;  %389 = vmatpush1.msra.mxu0 %v7853_v18  ;;  %v7965_v54 = vand.u32 4294901760, %v7935_v44  ;;  %v8005_v1 = vld [vmem:[%s10827_s3 + $0xc8] sm:$0xff] }
  0x3b   : > { %11448 = vst [vmem:[#allocation24_spill] sm:$0xff] %v7892_v30  ;;  %11449 = vst [vmem:[#allocation25_spill] sm:$0xff] %v7895_v31  ;;  %v7958_v51 = vand.u32 4294901760, %v497_v41  ;;  %v7960_v52 = vand.u32 4294901760, %v503_v42  ;;  %v515_v53 = vsub.f32 %v7908_v35, %v7932_v43  ;;  %391 = vmatprep.subr.mxu0 %v7870_v23  ;;  %v7980_v58 = vand.u32 4294901760, %v7940_v45  ;;  %v8024_v13 = vld [vmem:[%s10827_s3 + $0xc0] sm:$0xff] }
  0x3c   : > { %11450 = vst [vmem:[#allocation26_spill] sm:$0xff] %v7899_v32  ;;  %11451 = vst [vmem:[#allocation27_spill] sm:$0xff] %v7902_v33  ;;  %487 = vmatprep.subr.mxu1 %v7943_v46  ;;  %v7974_v56 = vand.u32 4294901760, %v509_v48  ;;  %v7983_v59 = vsub.f32 %v303_v15, %v7870_v23  ;;  %393 = vmatpush1.msra.mxu0 %v7875_v25  ;;  %v521_v62 = vsub.f32 %v7935_v44, %v7965_v54  ;;  %s7591_s23 = sshll.u32 %s12508_s15, 4  ;;  %v8233_v28 = vld [vmem:[%s10827_s3 + $0x28] sm:$0xff]  ;;  %s8300_s12 = sld [smem:[#allocation2 + $0x3]] }
  0x3d   : > { %11452 = vst [vmem:[#allocation28_spill] sm:$0xff] %v7905_v34  ;;  %11453 = vst [vmem:[#allocation29_spill] sm:$0xff] %v7908_v35  ;;  %493 = vmatpush1.msra.mxu1 %v7945_v47  ;;  %v7992_v61 = vand.u32 4294901760, %v515_v53  ;;  %v7997_v63 = vand.u32 4294901760, %v7955_v50  ;;  %v8000_v0 = vsub.f32 %v302_v20, %v7875_v25  ;;  %395 = vmatprep.subr.mxu0 %v7892_v30  ;;  %v8010_v2 = vand.u32 4294901760, %v7977_v57  ;;  %s8298_s11 = scalar_lea.vmem %s10826_s2, %s7591_s23  ;;  %s8316_s13 = sld [smem:[#allocation2 + $0x4]] }
  0x3e   : > { %11454 = vst [vmem:[#allocation30_spill] sm:$0xff] %v7921_v39  ;;  %11455 = vst [vmem:[#allocation31_spill] sm:$0xff] %v7924_v40  ;;  %499 = vmatprep.subr.mxu1 %v7958_v51  ;;  %v8013_v6 = vand.u32 4294901760, %v7983_v59  ;;  %v8016_v7 = vand.u32 4294901760, %v7970_v55  ;;  %v8019_v8 = vsub.f32 %v299_v21, %v7892_v30  ;;  %397 = vmatpush1.msra.mxu0 %v7905_v34  ;;  %v8028_v14 = vand.u32 4294901760, %v521_v62  ;;  %v8183_v39 = vld [vmem:[%s10827_s3 + $0x48] sm:$0xff] }
  0x3f   : > { %11456 = vst [vmem:[#allocation32_spill] sm:$0xff] %v7932_v43  ;;  %11457 = vst [vmem:[#allocation33_spill] sm:$0xff] %v7935_v44  ;;  %505 = vmatpush1.msra.mxu1 %v7960_v52  ;;  %v8031_v15 = vand.u32 4294901760, %v8000_v0  ;;  %v8034_v20 = vand.u32 4294901760, %v7988_v60  ;;  %v8038_v21 = vsub.f32 %v7867_v22, %v7905_v34  ;;  %399 = vmatprep.subr.mxu0 %v7924_v40  ;;  %v8050_v42 = vand.u32 4294901760, %v8005_v1  ;;  %v8055_v22 = vld [vmem:[%s10827_s3 + $0xa8] sm:$0xff] }
  0x40   : > { %11458 = vst [vmem:[#allocation34_spill] sm:$0xff] %v7943_v46  ;;  %11459 = vst [vmem:[#allocation35_spill] sm:$0xff] %v7945_v47  ;;  %511 = vmatprep.subr.mxu1 %v7974_v56  ;;  %v527_v37 = vsub.f32 %v7977_v57, %v8010_v2  ;;  %v533_v38 = vsub.f32 %v7983_v59, %v8013_v6  ;;  %v8047_v41 = vand.u32 4294901760, %v8019_v8  ;;  %401 = vmatpush1.msra.mxu0 %v7950_v49  ;;  %v8092_v47 = vld [vmem:[%s10827_s3 + $0x88] sm:$0xff]  ;;  %v8108_v46 = vld [vmem:[%s10827_s3 + $0x80] sm:$0xff]  ;;  %s8346_s14 = sld [smem:[#allocation2 + $0x5]] }
  0x41   : > { %11460 = vst [vmem:[#allocation36_spill] sm:$0xff] %v7950_v49  ;;  %11461 = vst [vmem:[#allocation37_spill] sm:$0xff] %v7958_v51  ;;  %517 = vmatpush1.msra.mxu1 %v7992_v61  ;;  %v539_v48 = vsub.f32 %v8000_v0, %v8031_v15  ;;  %v8062_v53 = vand.u32 4294901760, %v8038_v21  ;;  %v8066_v62 = vsub.f32 %v7883_v27, %v7924_v40  ;;  %v8069_v9 = vand.u32 4294901760, %v8024_v13  ;;  %s8373_s18 = sld [smem:[#allocation2 + $0x6]] }
  0x42   : > { %11462 = vst [vmem:[#allocation38_spill] sm:$0xff] %v7960_v52  ;;  %11463 = vst [vmem:[#allocation39_spill] sm:$0xff] %v7965_v54  ;;  %523 = vmatprep.subr.mxu1 %v8028_v14  ;;  %403 = vmatprep.subr.mxu0 %v7980_v58  ;;  %v8081_v52 = vand.u32 4294901760, %v533_v38  ;;  %v545_v27 = vsub.f32 %v8019_v8, %v8047_v41  ;;  %v8087_v51 = vsub.f32 %v7913_v36, %v7950_v49  ;;  %v8164_v54 = vld [vmem:[%s10827_s3 + $0x60] sm:$0xff]  ;;  %s8395_s20 = sld [smem:[#allocation2 + $0x7]] }
  0x43   : > { %11464 = vst [vmem:[#allocation40_spill] sm:$0xff] %v7974_v56  ;;  %11465 = vst [vmem:[#allocation41_spill] sm:$0xff] %v7977_v57  ;;  %v8074_v56 = vld [vmem:[%s10827_s3 + $0xa0] sm:$0xff]  ;;  %405 = vmatpush1.msra.mxu0 %v7997_v63  ;;  %v551_v38 = vsub.f32 %v8038_v21, %v8062_v53  ;;  %v8103_v36 = vand.u32 4294901760, %v8055_v22  ;;  %v8196_v33 = vsub.f32 %v8005_v1, %v8050_v42  ;;  %v8206_v32 = vand.u32 4294901760, %v8164_v54  ;;  %s8421_s21 = sld [smem:[#allocation4]] }
  0x44   : > { %11466 = vst [vmem:[#allocation42_spill] sm:$0xff] %v7980_v58  ;;  %11467 = vst [vmem:[#allocation43_spill] sm:$0xff] %v7983_v59  ;;  %407 = vmatprep.subr.mxu0 %v8016_v7  ;;  %v8215_v1 = vld [vmem:[%s10827_s3 + $0x40] sm:$0xff]  ;;  %s9232_s23 = sld [smem:[#allocation2 + $0x80]] }
  0x45   : > { %11468 = vst [vmem:[#allocation44_spill] sm:$0xff] %v7992_v61  ;;  %11469 = vst [vmem:[#allocation45_spill] sm:$0xff] %v7997_v63  ;;  %v8078_v61 = vand.u32 4294901760, %v527_v37  ;;  %v8095_v37 = vand.u32 4294901760, %v539_v48  ;;  %v8112_v48 = vand.u32 4294901760, %v545_v27  ;;  %409 = vmatpush1.msra.mxu0 %v8034_v20  ;;  %v8131_v27 = vand.u32 4294901760, %v551_v38 }
  0x46   : > { %11470 = vst [vmem:[#allocation46_spill] sm:$0xff] %v8000_v0  ;;  %11471 = vst [vmem:[#allocation47_spill] sm:$0xff] %v8010_v2  ;;  %v8140_v2 = vand.u32 4294901760, %v8092_v47  ;;  %411 = vmatprep.subr.mxu0 %v8050_v42  ;;  %v8225_v29 = vand.u32 4294901760, %v8196_v33  ;;  %s9236_s24 = sld [smem:[#allocation2 + $0x81]] }
  0x47   : > { %11472 = vst [vmem:[#allocation48_spill] sm:$0xff] %v8013_v6  ;;  %11473 = vst [vmem:[#allocation49_spill] sm:$0xff] %v8016_v7  ;;  %529 = vmatpush1.msra.mxu1 %v8078_v61  ;;  %v8127_v6 = vld [vmem:[%s10827_s3 + $0x68] sm:$0xff]  ;;  %413 = vmatpush1.msra.mxu0 %v8069_v9  ;;  %s9246_s25 = sld [smem:[#allocation2 + $0x82]] }
  0x48   : > { %11474 = vst [vmem:[#allocation50_spill] sm:$0xff] %v8019_v8  ;;  %11475 = vst [vmem:[#allocation51_spill] sm:$0xff] %v8028_v14  ;;  %v8100_v14 = vand.u32 4294901760, %v8066_v62  ;;  %535 = vmatprep.subr.mxu1 %v8081_v52  ;;  %v8178_v43 = vand.u32 4294901760, %v8127_v6  ;;  %415 = vmatprep.subr.mxu0 %v8103_v36  ;;  %s9277_s27 = sld [smem:[#allocation2 + $0x84]] }
  0x49   : > { %11476 = vst [vmem:[#allocation52_spill] sm:$0xff] %v8031_v15  ;;  %11477 = vst [vmem:[#allocation53_spill] sm:$0xff] %v8034_v20  ;;  %v8122_v15 = vand.u32 4294901760, %v8074_v56  ;;  %541 = vmatpush1.msra.mxu1 %v8095_v37  ;;  %s9292_s28 = sld [smem:[#allocation2 + $0x85]] }
  0x4a   : > { %11478 = vst [vmem:[#allocation54_spill] sm:$0xff] %v8038_v21  ;;  %11479 = vst [vmem:[#allocation55_spill] sm:$0xff] %v8047_v41  ;;  %v8119_v41 = vsub.f32 %v7940_v45, %v7980_v58  ;;  %v8137_v45 = vsub.f32 %v7955_v50, %v7997_v63  ;;  %v8156_v50 = vsub.f32 %v7970_v55, %v8016_v7  ;;  %547 = vmatprep.subr.mxu1 %v8112_v48  ;;  %s9322_s30 = sld [smem:[#allocation2 + $0x87]] }
  0x4b   : > { %11480 = vst [vmem:[#allocation56_spill] sm:$0xff] %v8050_v42  ;;  %11481 = vst [vmem:[#allocation57_spill] sm:$0xff] %v8062_v53  ;;  %v8115_v53 = vand.u32 4294901760, %v8087_v51  ;;  %v8175_v55 = vsub.f32 %v7988_v60, %v8034_v20  ;;  %553 = vmatpush1.msra.mxu1 %v8131_v27  ;;  %417 = vmatpush1.msra.mxu0 %v8122_v15  ;;  %s7567_s5 = sld [smem:[#allocation4 + $0x1]] }
  0x4c   : > { %11482 = vst [vmem:[#allocation58_spill] sm:$0xff] %v8066_v62  ;;  %11483 = vst [vmem:[#allocation59_spill] sm:$0xff] %v8069_v9  ;;  %v8192_v60 = vand.u32 4294901760, %v8156_v50  ;;  %419 = vmatprep.subr.mxu0 %v8140_v2  ;;  %s9712_s7 = sld [smem:[#allocation2 + $0x101]] }
  0x4d   : > { %11484 = vst [vmem:[#allocation60_spill] sm:$0xff] %v8078_v61  ;;  %11485 = vst [vmem:[#allocation61_spill] sm:$0xff] %v8081_v52  ;;  %v557_v61 = vsub.f32 %v8066_v62, %v8100_v14  ;;  %v563_v38 = vsub.f32 %v8087_v51, %v8115_v53  ;;  %v8152_v52 = vand.u32 4294901760, %v8119_v41  ;;  %s9726_s8 = sld [smem:[#allocation2 + $0x102]] }
  0x4e   : > { %11486 = vst [vmem:[#allocation62_spill] sm:$0xff] %v8087_v51  ;;  %11487 = vst [vmem:[#allocation63_spill] sm:$0xff] %v8095_v37  ;;  %s9742_s9 = sld [smem:[#allocation2 + $0x103]] }
  0x4f   : > { %11488 = vst [vmem:[#allocation64_spill] sm:$0xff] %v8100_v14  ;;  %11489 = vst [vmem:[#allocation65_spill] sm:$0xff] %v8103_v36  ;;  %v8159_v14 = vand.u32 4294901760, %v8108_v46  ;;  %v8167_v37 = vand.u32 4294901760, %v557_v61  ;;  %v8186_v61 = vand.u32 4294901760, %v563_v38  ;;  %s9761_s10 = sld [smem:[#allocation2 + $0x104]] }
  0x50   : > { %11490 = vst [vmem:[#allocation66_spill] sm:$0xff] %v8112_v48  ;;  %11491 = vst [vmem:[#allocation67_spill] sm:$0xff] %v8115_v53  ;;  %v8171_v53 = vand.u32 4294901760, %v8137_v45  ;;  %v569_v48 = vsub.f32 %v8119_v41, %v8152_v52 }
  0x51   : > { %11492 = vst [vmem:[#allocation68_spill] sm:$0xff] %v8119_v41  ;;  %11493 = vst [vmem:[#allocation69_spill] sm:$0xff] %v8122_v15  ;;  %559 = vmatprep.subr.mxu1 %v8167_v37  ;;  %421 = vmatpush1.msra.mxu0 %v8159_v14  ;;  %v8272_v41 = vld [vmem:[%s10827_s3 + $0x8] sm:$0xff] }
  0x52   : > { %11494 = vst [vmem:[#allocation70_spill] sm:$0xff] %v8131_v27  ;;  %11495 = vst [vmem:[#allocation71_spill] sm:$0xff] %v8137_v45  ;;  %v575_v38 = vsub.f32 %v8137_v45, %v8171_v53  ;;  %v8203_v27 = vand.u32 4294901760, %v8175_v55  ;;  %565 = vmatpush1.msra.mxu1 %v8186_v61  ;;  %v8252_v45 = vld [vmem:[%s10827_s3 + $0x20] sm:$0xff]  ;;  %423 = vmatprep.subr.mxu0 %v8178_v43 }
  0x53   : > { %11496 = vst [vmem:[#allocation72_spill] sm:$0xff] %v8140_v2  ;;  %11497 = vst [vmem:[#allocation73_spill] sm:$0xff] %v8152_v52  ;;  %v8210_v52 = vsub.f32 %v8024_v13, %v8069_v9  ;;  %v8228_v13 = vand.u32 4294901760, %v8183_v39  ;;  %425 = vmatpush1.msra.mxu0 %v8206_v32 }
  0x54   : > { %11498 = vst [vmem:[#allocation74_spill] sm:$0xff] %v8156_v50  ;;  %11499 = vst [vmem:[#allocation75_spill] sm:$0xff] %v8159_v14 }
  0x55   : > { %11500 = vst [vmem:[#allocation76_spill] sm:$0xff] %v8167_v37  ;;  %11501 = vst [vmem:[#allocation77_spill] sm:$0xff] %v8171_v53  ;;  %v8219_v37 = vand.u32 4294901760, %v569_v48  ;;  %v581_v53 = vsub.f32 %v8156_v50, %v8192_v60  ;;  %v8237_v48 = vand.u32 4294901760, %v575_v38  ;;  %v8247_v50 = vsub.f32 %v8055_v22, %v8103_v36  ;;  %427 = vmatprep.subr.mxu0 %v8228_v13 }
  0x56   : > { %11502 = vst [vmem:[#allocation78_spill] sm:$0xff] %v8175_v55  ;;  %11503 = vst [vmem:[#allocation79_spill] sm:$0xff] %v8178_v43  ;;  %v8263_v22 = vand.u32 4294901760, %v8215_v1 }
  0x57   : > { %11504 = vst [vmem:[#allocation80_spill] sm:$0xff] %v8186_v61  ;;  %11505 = vst [vmem:[#allocation81_spill] sm:$0xff] %v8192_v60  ;;  %v587_v61 = vsub.f32 %v8175_v55, %v8203_v27  ;;  %v8243_v60 = vand.u32 4294901760, %v8210_v52  ;;  %571 = vmatprep.subr.mxu1 %v8219_v37  ;;  %v8257_v38 = vand.u32 4294901760, %v581_v53  ;;  %v8267_v55 = vsub.f32 %v8074_v56, %v8122_v15 }
  0x58   : > { %11506 = vst [vmem:[#allocation82_spill] sm:$0xff] %v8196_v33  ;;  %11507 = vst [vmem:[#allocation83_spill] sm:$0xff] %v8203_v27  ;;  %v593_v27 = vsub.f32 %v8196_v33, %v8225_v29  ;;  %577 = vmatpush1.msra.mxu1 %v8237_v48  ;;  %v8286_v56 = vand.u32 4294901760, %v8233_v28  ;;  %v8291_v33 = vld [vmem:[%s10827_s3] sm:$0xff]  ;;  %429 = vmatpush1.msra.mxu0 %v8263_v22  ;;  %v8326_v15 = vsub.f32 %v8108_v46, %v8159_v14 }
  0x59   : > { %11508 = vst [vmem:[#allocation84_spill] sm:$0xff] %v8206_v32  ;;  %11509 = vst [vmem:[#allocation85_spill] sm:$0xff] %v8210_v52  ;;  %v8277_v53 = vand.u32 4294901760, %v587_v61  ;;  %583 = vmatprep.subr.mxu1 %v8257_v38  ;;  %v8343_v46 = vand.u32 4294901760, %v8291_v33  ;;  %v345_v14 = vstv %s8274_s6  ;;  %s9708_s6 = sld [smem:[#allocation2 + $0x100]] }
  0x5a   : > { %11510 = vst [vmem:[#allocation86_spill] sm:$0xff] %v8219_v37  ;;  %11511 = vst [vmem:[#allocation87_spill] sm:$0xff] %v8225_v29  ;;  %v599_v37 = vsub.f32 %v8210_v52, %v8243_v60  ;;  %v8283_v29 = vand.u32 4294901760, %v8247_v50  ;;  %v8303_v61 = vand.u32 4294901760, %v593_v27  ;;  %v8314_v52 = vand.u32 4294901760, %v8252_v45  ;;  %431 = vmatprep.subr.mxu0 %v8286_v56 }
  0x5b   : > { %11512 = vst [vmem:[#allocation88_spill] sm:$0xff] %v8228_v13  ;;  %11513 = vst [vmem:[#allocation89_spill] sm:$0xff] %v8237_v48  ;;  %v8307_v48 = vand.u32 4294901760, %v8267_v55  ;;  %589 = vmatpush1.msra.mxu1 %v8277_v53 }
  0x5c   : > { %11514 = vst [vmem:[#allocation90_spill] sm:$0xff] %v8243_v60  ;;  %11515 = vst [vmem:[#allocation91_spill] sm:$0xff] %v8247_v50  ;;  %v8311_v60 = vsub.f32 %v8092_v47, %v8140_v2  ;;  %v605_v27 = vsub.f32 %v8247_v50, %v8283_v29  ;;  %v8329_v47 = vand.u32 4294901760, %v8272_v41  ;;  %595 = vmatprep.subr.mxu1 %v8303_v61  ;;  %433 = vmatpush1.msra.mxu0 %v8314_v52 }
  0x5d   : > { %11516 = vst [vmem:[#allocation92_spill] sm:$0xff] %v8257_v38  ;;  %11517 = vst [vmem:[#allocation93_spill] sm:$0xff] %v8263_v22  ;;  %v8319_v38 = vand.u32 4294901760, %v599_v37  ;;  %v611_v2 = vsub.f32 %v8267_v55, %v8307_v48 }
  0x5e   : > { %11518 = vst [vmem:[#allocation94_spill] sm:$0xff] %v8267_v55  ;;  %11519 = vst [vmem:[#allocation95_spill] sm:$0xff] %v8277_v53  ;;  %v8336_v37 = vand.u32 4294901760, %v8311_v60  ;;  %v8340_v53 = vsub.f32 %v8127_v6, %v8178_v43  ;;  %v8357_v6 = vsub.f32 %v8164_v54, %v8206_v32  ;;  %v8361_v55 = vsub.f32 %v8183_v39, %v8228_v13  ;;  %v7545_v43 = vld [vmem:[%s8298_s11 + $0x2] sm:$0x3] }
  0x5f   : > { %11520 = vst [vmem:[#allocation96_spill] sm:$0xff] %v8283_v29  ;;  %11521 = vst [vmem:[#allocation97_spill] sm:$0xff] %v8286_v56  ;;  %v322_v29 = vld [vmem:[%s8298_s11] sm:$0x3]  ;;  %601 = vmatpush1.msra.mxu1 %v8319_v38  ;;  %v8363_v50 = vand.u32 4294901760, %v611_v2  ;;  %435 = vmatprep.subr.mxu0 %v8329_v47  ;;  %v338_v54 = vstv %s8235_s26  ;;  %s9258_s26 = sld [smem:[#allocation2 + $0x83]] }
  0x60   : > { %11522 = vst [vmem:[#allocation98_spill] sm:$0xff] %v8303_v61  ;;  %11523 = vst [vmem:[#allocation99_spill] sm:$0xff] %v8307_v48  ;;  %v8349_v61 = vand.u32 4294901760, %v605_v27  ;;  %v8353_v48 = vand.u32 4294901760, %v8326_v15  ;;  %v617_v27 = vsub.f32 %v8311_v60, %v8336_v37  ;;  %437 = vmatpush1.msra.mxu0 %v8343_v46  ;;  %v8380_v2 = vand.u32 4294901760, %v8357_v6 }
  0x61   : > { %11524 = vst [vmem:[#allocation100_spill] sm:$0xff] %v8311_v60  ;;  %11525 = vst [vmem:[#allocation101_spill] sm:$0xff] %v8314_v52  ;;  %v7546_v60 = vld [vmem:[%s8298_s11 + $0x4] sm:$0x3]  ;;  %v339_v13 = vmul.f32 %v338_v54, %v322_v29  ;;  %716 = vmatprep.subr.mxu0 %v7851_v17  ;;  %v7548_v17 = vld [vmem:[%s8298_s11 + $0x8] sm:$0x3] }
  0x62   : > { %11526 = vst [vmem:[#allocation102_spill] sm:$0xff] %v8319_v38  ;;  %11527 = vst [vmem:[#allocation103_spill] sm:$0xff] %v8326_v15  ;;  %v8369_v38 = vand.u32 4294901760, %v8340_v53  ;;  %607 = vmatprep.subr.mxu1 %v8349_v61  ;;  %v623_v39 = vsub.f32 %v8326_v15, %v8353_v48  ;;  %v8387_v32 = vand.u32 4294901760, %v617_v27  ;;  %v341_v15 = vstv %s8254_s29  ;;  %s9307_s29 = sld [smem:[#allocation2 + $0x86]] }
  0x63   : > { %11528 = vst [vmem:[#allocation104_spill] sm:$0xff] %v8329_v47  ;;  %11529 = vst [vmem:[#allocation105_spill] sm:$0xff] %v8336_v37  ;;  %v8383_v37 = vand.u32 4294901760, %v8361_v55  ;;  %613 = vmatpush1.msra.mxu1 %v8363_v50  ;;  %v635_v29 = vsub.f32 %v8357_v6, %v8380_v2  ;;  %v342_v54 = vmul.f32 %v7545_v43, %v341_v15  ;;  %v7549_v43 = vld [vmem:[%s8298_s11 + $0xa] sm:$0x3]  ;;  %v357_v15 = vstv %s8346_s14  ;;  %s9805_s14 = sld [smem:[#allocation2 + $0x107]] }
  0x64   : > { %11530 = vst [vmem:[#allocation106_spill] sm:$0xff] %v8340_v53  ;;  %11531 = vst [vmem:[#allocation107_spill] sm:$0xff] %v8343_v46  ;;  %v8397_v51 = vand.u32 4294901760, %v623_v39  ;;  %619 = vmatprep.subr.mxu1 %v8387_v32  ;;  %v353_v39 = vstv %s8316_s13  ;;  %s9793_s13 = sld [smem:[#allocation2 + $0x106]] }
  0x65   : > { %11532 = vst [vmem:[#allocation108_spill] sm:$0xff] %v8349_v61  ;;  %11533 = vst [vmem:[#allocation109_spill] sm:$0xff] %v8353_v48  ;;  %v629_v61 = vsub.f32 %v8340_v53, %v8369_v38  ;;  %v7547_v48 = vld [vmem:[%s8298_s11 + $0x6] sm:$0x3]  ;;  %v641_v27 = vsub.f32 %v8361_v55, %v8383_v37  ;;  %v349_v53 = vstv %s8300_s12  ;;  %v8410_v36 = vand.u32 4294901760, %v635_v29  ;;  %s9779_s12 = sld [smem:[#allocation2 + $0x105]] }
  0x66   : > { %11534 = vst [vmem:[#allocation110_spill] sm:$0xff] %v8357_v6  ;;  %11535 = vst [vmem:[#allocation111_spill] sm:$0xff] %v8361_v55  ;;  %625 = vmatpush1.msra.mxu1 %v8397_v51  ;;  %v343_v6 = vadd.f32 %v342_v54, %v339_v13  ;;  %v350_v62 = vmul.f32 %v7547_v48, %v349_v53  ;;  %v8425_v13 = vsub.f32 %v8215_v1, %v8263_v22  ;;  %v7551_v1 = vld [vmem:[%s8298_s11 + $0xe] sm:$0x3] }
  0x67   : > { %11536 = vst [vmem:[#allocation112_spill] sm:$0xff] %v8363_v50  ;;  %11537 = vst [vmem:[#allocation113_spill] sm:$0xff] %v8369_v38  ;;  %v8404_v50 = vand.u32 4294901760, %v629_v61  ;;  %v346_v38 = vmul.f32 %v7546_v60, %v345_v14  ;;  %v354_v60 = vmul.f32 %v7548_v17, %v353_v39  ;;  %v7550_v61 = vld [vmem:[%s8298_s11 + $0xc] sm:$0x3]  ;;  %v8429_v48 = vsub.f32 %v8233_v28, %v8286_v56 }
  0x68   : > { %11538 = vst [vmem:[#allocation114_spill] sm:$0xff] %v8380_v2  ;;  %11539 = vst [vmem:[#allocation115_spill] sm:$0xff] %v8383_v37  ;;  %v8412_v2 = vand.u32 4294901760, %v641_v27  ;;  %v8433_v53 = vsub.f32 %v8252_v45, %v8314_v52  ;;  %v358_v17 = vmul.f32 %v7549_v43, %v357_v15  ;;  %v8441_v29 = vsub.f32 %v8291_v33, %v8343_v46 }
  0x69   : > { %11540 = vst [vmem:[#allocation116_spill] sm:$0xff] %v8387_v32  ;;  %11541 = vst [vmem:[#allocation117_spill] sm:$0xff] %v8397_v51  ;;  %631 = vmatprep.subr.mxu1 %v8404_v50  ;;  %v347_v14 = vadd.f32 %v346_v38, %v343_v6  ;;  %v361_v51 = vstv %s8373_s18  ;;  %v8437_v6 = vsub.f32 %v8272_v41, %v8329_v47  ;;  %v365_v27 = vstv %s8395_s20  ;;  %s9839_s18 = sld [smem:[#allocation4 + $0x2]]  ;;  %s7592_s20 = sshll.u32 %s12508_s15, 5 }
  0x6a   : > { %11542 = vst [vmem:[#allocation118_spill] sm:$0xff] %v8404_v50  ;;  %11543 = vst [vmem:[#allocation119_spill] sm:$0xff] %v8410_v36  ;;  %637 = vmatpush1.msra.mxu1 %v8410_v36  ;;  %v8446_v54 = vand.u32 4294901760, %v8425_v13  ;;  %v8449_v28 = vand.u32 4294901760, %v8429_v48  ;;  %v8452_v45 = vand.u32 4294901760, %v8433_v53  ;;  %v362_v39 = vmul.f32 %v7550_v61, %v361_v51  ;;  %s9873_s22 = scalar_lea.vmem %s10828_s4, %s7592_s20 }
  0x6b   : > { %11544 = vst [vmem:[#allocation120_spill] sm:$0xff] %v8412_v2  ;;  %643 = vmatprep.subr.mxu1 %v8412_v2  ;;  %11545 = vst [vmem:[#allocation121_spill] sm:$0xff] %v8425_v13  ;;  %v351_v38 = vadd.f32 %v350_v62, %v347_v14  ;;  %v8455_v41 = vand.u32 4294901760, %v8437_v6  ;;  %v8458_v33 = vand.u32 4294901760, %v8441_v29  ;;  %v366_v36 = vmul.f32 %v7551_v1, %v365_v27 }
  0x6c   : > { %11546 = vst [vmem:[#allocation122_spill] sm:$0xff] %v8429_v48  ;;  %11547 = vst [vmem:[#allocation123_spill] sm:$0xff] %v8433_v53  ;;  %v647_v43 = vsub.f32 %v8425_v13, %v8446_v54  ;;  %v653_v15 = vsub.f32 %v8429_v48, %v8449_v28  ;;  %v659_v14 = vsub.f32 %v8433_v53, %v8452_v45 }
  0x6d   : > { %11548 = vst [vmem:[#allocation124_spill] sm:$0xff] %v8437_v6  ;;  %11549 = vst [vmem:[#allocation125_spill] sm:$0xff] %v8441_v29  ;;  %v355_v62 = vadd.f32 %v354_v60, %v351_v38  ;;  %v665_v51 = vsub.f32 %v8437_v6, %v8455_v41  ;;  %v671_v60 = vsub.f32 %v8441_v29, %v8458_v33 }
  0x6e   : > { %11550 = vst [vmem:[#allocation126_spill] sm:$0xff] %v8446_v54  ;;  %11551 = vst [vmem:[#allocation127_spill] sm:$0xff] %v8449_v28  ;;  %v8470_v61 = vand.u32 4294901760, %v647_v43  ;;  %v8472_v38 = vand.u32 4294901760, %v653_v15  ;;  %v8474_v50 = vand.u32 4294901760, %v659_v14  ;;  %v369_v28 = vstv %s8421_s21  ;;  %v11563_v14 = vld [vmem:[#allocation58_spill] sm:$0xff] }
  0x6f   : > { %11552 = vst [vmem:[#allocation128_spill] sm:$0xff] %v8452_v45  ;;  %11553 = vst [vmem:[#allocation129_spill] sm:$0xff] %v8455_v41  ;;  %v359_v2 = vadd.f32 %v358_v17, %v355_v62  ;;  %v8476_v54 = vand.u32 4294901760, %v665_v51  ;;  %v8480_v17 = vand.u32 4294901760, %v671_v60  ;;  %v11564_v51 = vld [vmem:[#allocation65_spill] sm:$0xff]  ;;  %v11565_v60 = vld [vmem:[#allocation62_spill] sm:$0xff] }
  0x70   : > { %11554 = vst [vmem:[#allocation130_spill] sm:$0xff] %v8458_v33  ;;  %11555 = vst [vmem:[#allocation131_spill] sm:$0xff] %v8470_v61  ;;  %649 = vmatpush1.msra.mxu1 %v8470_v61  ;;  %v11612_v61 = vld [vmem:[#allocation77_spill] sm:$0xff] }
  0x71   : > { %11556 = vst [vmem:[#allocation132_spill] sm:$0xff] %v8472_v38  ;;  %11557 = vst [vmem:[#allocation133_spill] sm:$0xff] %v8474_v50  ;;  %v363_v32 = vadd.f32 %v362_v39, %v359_v2  ;;  %655 = vmatprep.subr.mxu1 %v8472_v38  ;;  %v11609_v38 = vld [vmem:[#allocation73_spill] sm:$0xff] }
  0x72   : > { %11558 = vst [vmem:[#allocation134_spill] sm:$0xff] %v8476_v54  ;;  %11559 = vst [vmem:[#allocation135_spill] sm:$0xff] %v8480_v17  ;;  %661 = vmatpush1.msra.mxu1 %v8474_v50 }
  0x73   : > { %v367_v1 = vadd.f32 %v366_v36, %v363_v32  ;;  %667 = vmatprep.subr.mxu1 %v8476_v54  ;;  %v11561_v32 = vmov 0.0  }
  0x74   : > { %673 = vmatpush1.msra.mxu1 %v8480_v17 }
  0x75   : > { %v370_v27 = vadd.f32 %v369_v28, %v367_v1  ;;  %852 = vmatprep.subr.mxu1 %v7815_v3  ;;  %v11566_v1 = vld [vmem:[#allocation69_spill] sm:$0xff] }
  0x77   : > { %vm371_vm0 = vcmp.gt.f32.partialorder %v370_v27, 0.0  ;;  %v372_v62 = vmul.f32 0.1, %v370_v27 }
  0x79   : > { %v373_v2 = vsel %vm371_vm0, %v370_v27, %v372_v62  ;;  %v11567_v27 = vld [vmem:[#allocation68_spill] sm:$0xff] }
  0x7a   : > { %v8487_v39 = vand.u32 4294901760, %v373_v2  ;;  %v11568_v62 = vld [vmem:[#allocation72_spill] sm:$0xff] }
  0x7c   : > { %v8490_v43 = vsub.f32 %v373_v2, %v8487_v39  ;;  %708 = vmatmul.mubr.f32.vlgmr.msra.gmra.mxu1 %v8487_v39  ;;  %v11569_v2 = vld [vmem:[#allocation71_spill] sm:$0xff] }
  0x7d   : > { %854 = vmatpush1.msra.mxu1 %v7817_v4  ;;  %947 = vmatprep.mubr.f32.mxu1 %v11561_v32 }
  0x7e   : > { %11560 = vst [vmem:[#allocation136_spill] sm:$0xff] %v8490_v43  ;;  %v8496_v36 = vand.u32 4294901760, %v8490_v43  ;;  %856 = vmatprep.subr.mxu1 %v7819_v5 }
  0x7f   : > { %858 = vmatpush1.msra.mxu1 %v7832_v10 }
  0x80   : > { %11562 = vst [vmem:[#allocation137_spill] sm:$0xff] %v8496_v36  ;;  %v474_v28 = vsub.f32 %v8490_v43, %v8496_v36  ;;  %860 = vmatprep.subr.mxu1 %v7834_v11 }
  0x81   : > { %862 = vmatpush1.msra.mxu1 %v7836_v12 }
  0x82   : > { %v8504_v15 = vand.u32 4294901760, %v474_v28  ;;  %864 = vmatprep.subr.mxu1 %v7848_v16  ;;  %v11570_v28 = vld [vmem:[#allocation75_spill] sm:$0xff] }
  0x83   : > { %866 = vmatpush1.msra.mxu1 %v7853_v18 }
  0x84   : > { %476 = vmatmul.mubr.f32.vlgmr.msra.gmra.mxu0 %v8504_v15  ;;  %868 = vmatprep.subr.mxu1 %v7870_v23 }
  0x85   : > { %719 = vmatpush1.msra.mxu0 %v7856_v19  ;;  %870 = vmatpush1.msra.mxu1 %v7875_v25 }
  0x86   : > { %722 = vmatprep.subr.mxu0 %v7873_v24  ;;  %872 = vmatprep.subr.mxu1 %v7892_v30 }
  0x87   : > { %725 = vmatpush1.msra.mxu0 %v7878_v26  ;;  %874 = vmatpush1.msra.mxu1 %v7905_v34 }
  0x88   : > { %728 = vmatprep.subr.mxu0 %v7895_v31  ;;  %876 = vmatprep.subr.mxu1 %v7924_v40  ;;  %v308_v31 = vld [vmem:[%s10827_s3 + $0x190] sm:$0xff] }
  0x89   : > { %731 = vmatpush1.msra.mxu0 %v7908_v35  ;;  %878 = vmatpush1.msra.mxu1 %v7950_v49  ;;  %v11600_v35 = vld [vmem:[#allocation57_spill] sm:$0xff]  ;;  %v8661_v19 = vand.u32 4294901760, %v308_v31 }
  0x8a   : > { %734 = vmatprep.subr.mxu0 %v7935_v44  ;;  %880 = vmatprep.subr.mxu1 %v7980_v58  ;;  %v309_v44 = vld [vmem:[%s10827_s3 + $0x198] sm:$0xff] }
  0x8b   : > { %737 = vmatpush1.msra.mxu0 %v7977_v57  ;;  %882 = vmatpush1.msra.mxu1 %v7997_v63  ;;  %v11578_v57 = vld [vmem:[#allocation91_spill] sm:$0xff]  ;;  %v8645_v50 = vand.u32 4294901760, %v309_v44  ;;  %11611 = vst [vmem:[#allocation150_spill] sm:$0xff] %v8661_v19 }
  0x8c   : > { %740 = vmatprep.subr.mxu0 %v7983_v59  ;;  %884 = vmatprep.subr.mxu1 %v8016_v7  ;;  %v11576_v59 = vld [vmem:[#allocation85_spill] sm:$0xff] }
  0x8d   : > { %743 = vmatpush1.msra.mxu0 %v8000_v0  ;;  %886 = vmatpush1.msra.mxu1 %v8034_v20  ;;  %v11573_v0 = vld [vmem:[#allocation78_spill] sm:$0xff]  ;;  %11606 = vst [vmem:[#allocation146_spill] sm:$0xff] %v8645_v50 }
  0x8e   : > { %746 = vmatprep.subr.mxu0 %v8019_v8  ;;  %888 = vmatprep.subr.mxu1 %v8050_v42  ;;  %v11571_v8 = vld [vmem:[#allocation74_spill] sm:$0xff] }
  0x8f   : > { %749 = vmatpush1.msra.mxu0 %v8038_v21  ;;  %890 = vmatpush1.msra.mxu1 %v8069_v9  ;;  %v11572_v21 = vld [vmem:[#allocation79_spill] sm:$0xff] }
  0x90   : > { %752 = vmatprep.subr.mxu0 %v11563_v14  ;;  %892 = vmatprep.subr.mxu1 %v11564_v51  ;;  %v11574_v14 = vld [vmem:[#allocation82_spill] sm:$0xff] }
  0x91   : > { %755 = vmatpush1.msra.mxu0 %v11565_v60  ;;  %894 = vmatpush1.msra.mxu1 %v11566_v1  ;;  %v11575_v60 = vld [vmem:[#allocation84_spill] sm:$0xff] }
  0x92   : > { %758 = vmatprep.subr.mxu0 %v11567_v27  ;;  %896 = vmatprep.subr.mxu1 %v11568_v62  ;;  %v11577_v27 = vld [vmem:[#allocation88_spill] sm:$0xff] }
  0x93   : > { %761 = vmatpush1.msra.mxu0 %v11569_v2  ;;  %898 = vmatpush1.msra.mxu1 %v11570_v28  ;;  %v11579_v2 = vld [vmem:[#allocation94_spill] sm:$0xff] }
  0x94   : > { %764 = vmatprep.subr.mxu0 %v11571_v8  ;;  %900 = vmatprep.subr.mxu1 %v11572_v21  ;;  %v11580_v8 = vld [vmem:[#allocation100_spill] sm:$0xff] }
  0x95   : > { %767 = vmatpush1.msra.mxu0 %v11573_v0  ;;  %842 = vmatprep.mubr.f32.mxu0 %v11561_v32  ;;  %v11581_v0 = vld [vmem:[#allocation103_spill] sm:$0xff] }
  0x96   : > { %770 = vmatprep.subr.mxu0 %v11574_v14  ;;  %902 = vmatpush1.msra.mxu1 %v11575_v60  ;;  %v11582_v14 = vld [vmem:[#allocation106_spill] sm:$0xff] }
  0x97   : > { %773 = vmatpush1.msra.mxu0 %v11576_v59  ;;  %904 = vmatprep.subr.mxu1 %v11577_v27  ;;  %v11583_v59 = vld [vmem:[#allocation110_spill] sm:$0xff] }
  0x98   : > { %776 = vmatprep.subr.mxu0 %v11578_v57  ;;  %906 = vmatpush1.msra.mxu1 %v8263_v22 }
  0x99   : > { %779 = vmatpush1.msra.mxu0 %v11579_v2  ;;  %908 = vmatprep.subr.mxu1 %v8286_v56 }
  0x9a   : > { %782 = vmatprep.subr.mxu0 %v11580_v8  ;;  %910 = vmatpush1.msra.mxu1 %v8314_v52  ;;  %v11595_v8 = vld [vmem:[#allocation52_spill] sm:$0xff] }
  0x9b   : > { %785 = vmatpush1.msra.mxu0 %v11581_v0  ;;  %912 = vmatprep.subr.mxu1 %v8329_v47  ;;  %v313_v0 = vld [vmem:[%s10827_s3 + $0x1b8] sm:$0xff] }
  0x9c   : > { %788 = vmatprep.subr.mxu0 %v11582_v14  ;;  %914 = vmatpush1.msra.mxu1 %v8343_v46  ;;  %v11593_v14 = vld [vmem:[#allocation48_spill] sm:$0xff]  ;;  %v8628_v17 = vand.u32 4294901760, %v313_v0 }
  0x9d   : > { %791 = vmatpush1.msra.mxu0 %v11583_v59  ;;  %951 = vmatmul.mubr.f32.vlgmr.msra.gmra.mxu1 %v8496_v36  ;;  %v11592_v59 = vld [vmem:[#allocation47_spill] sm:$0xff]  ;;  %v11643_v36 = vld [vmem:[#allocation113_spill] sm:$0xff] }
  0x9e   : > { %794 = vmatprep.subr.mxu0 %v8361_v55  ;;  %1126 = vmatprep.subr.mxu1 %v7815_v3  ;;  %v11585_v55 = vld [vmem:[#allocation23_spill] sm:$0xff]  ;;  %11601 = vst [vmem:[#allocation143_spill] sm:$0xff] %v8628_v17 }
  0x9f   : > { %797 = vmatpush1.msra.mxu0 %v8425_v13  ;;  %1128 = vmatpush1.msra.mxu1 %v7817_v4  ;;  %v11584_v13 = vld [vmem:[#allocation22_spill] sm:$0xff]  ;;  %v11640_v4 = vld [vmem:[#allocation109_spill] sm:$0xff] }
  0xa0   : > { %800 = vmatprep.subr.mxu0 %v8429_v48  ;;  %1130 = vmatprep.subr.mxu1 %v7819_v5  ;;  %v11586_v48 = vld [vmem:[#allocation26_spill] sm:$0xff] }
  0xa1   : > { %803 = vmatpush1.msra.mxu0 %v8433_v53  ;;  %1132 = vmatpush1.msra.mxu1 %v7832_v10  ;;  %v11587_v53 = vld [vmem:[#allocation27_spill] sm:$0xff] }
  0xa2   : > { %806 = vmatprep.subr.mxu0 %v8437_v6  ;;  %1134 = vmatprep.subr.mxu1 %v7834_v11  ;;  %v11588_v6 = vld [vmem:[#allocation30_spill] sm:$0xff]  ;;  %v11636_v11 = vld [vmem:[#allocation105_spill] sm:$0xff]  ;;  %v289_v10 = vld [vmem:[%s10827_s3 + $0xf8] sm:$0xff] }
  0xa3   : > { %809 = vmatpush1.msra.mxu0 %v8441_v29  ;;  %1136 = vmatpush1.msra.mxu1 %v7836_v12  ;;  %v321_v29 = vld [vmem:[%s10827_s3 + $0x1f8] sm:$0xff] }
  0xa4   : > { %845 = vmatmul.mubr.f32.vlgmr.msra.gmra.mxu0 %v8490_v43  ;;  %960 = vmatprep.subr.mxu0 %v11584_v13  ;;  %v11589_v13 = vld [vmem:[#allocation32_spill] sm:$0xff] }
  0xa5   : > { %964 = vmatpush1.msra.mxu0 %v11585_v55  ;;  %1138 = vmatprep.subr.mxu1 %v7848_v16  ;;  %v11590_v55 = vld [vmem:[#allocation39_spill] sm:$0xff] }
  0xa6   : > { %968 = vmatprep.subr.mxu0 %v11586_v48  ;;  %1140 = vmatpush1.msra.mxu1 %v7853_v18  ;;  %v320_v48 = vld [vmem:[%s10827_s3 + $0x1f0] sm:$0xff] }
  0xa7   : > { %972 = vmatpush1.msra.mxu0 %v11587_v53  ;;  %1142 = vmatprep.subr.mxu1 %v7870_v23  ;;  %v8592_v53 = vand.u32 4294901760, %v321_v29 }
  0xa8   : > { %976 = vmatprep.subr.mxu0 %v11588_v6  ;;  %1144 = vmatpush1.msra.mxu1 %v7875_v25  ;;  %v317_v6 = vld [vmem:[%s10827_s3 + $0x1d8] sm:$0xff]  ;;  %v292_v25 = vld [vmem:[%s10827_s3 + $0x110] sm:$0xff] }
  0xa9   : > { %980 = vmatpush1.msra.mxu0 %v11589_v13  ;;  %1146 = vmatprep.subr.mxu1 %v7892_v30  ;;  %11591 = vst [vmem:[#allocation138_spill] sm:$0xff] %v8592_v53  ;;  %v316_v13 = vld [vmem:[%s10827_s3 + $0x1d0] sm:$0xff]  ;;  %v8611_v2 = vand.u32 4294901760, %v317_v6  ;;  %v11629_v30 = vld [vmem:[#allocation96_spill] sm:$0xff] }
  0xaa   : > { %984 = vmatprep.subr.mxu0 %v11590_v55  ;;  %1148 = vmatpush1.msra.mxu1 %v7905_v34  ;;  %v8604_v55 = vand.u32 4294901760, %v320_v48  ;;  %v8613_v57 = vand.u32 4294901760, %v316_v13 }
  0xab   : > { %988 = vmatpush1.msra.mxu0 %v11592_v59  ;;  %1150 = vmatprep.subr.mxu1 %v7924_v40  ;;  %11596 = vst [vmem:[#allocation140_spill] sm:$0xff] %v8611_v2  ;;  %v11598_v59 = vld [vmem:[#allocation55_spill] sm:$0xff]  ;;  %v8648_v24 = vsub.f32 %v317_v6, %v8611_v2  ;;  %v11625_v40 = vld [vmem:[#allocation90_spill] sm:$0xff] }
  0xac   : > { %992 = vmatprep.subr.mxu0 %v11593_v14  ;;  %1152 = vmatpush1.msra.mxu1 %v7950_v49  ;;  %11594 = vst [vmem:[#allocation139_spill] sm:$0xff] %v8604_v55  ;;  %11597 = vst [vmem:[#allocation141_spill] sm:$0xff] %v8613_v57  ;;  %v312_v14 = vld [vmem:[%s10827_s3 + $0x1b0] sm:$0xff]  ;;  %v8638_v26 = vsub.f32 %v320_v48, %v8604_v55  ;;  %v8654_v48 = vsub.f32 %v316_v13, %v8613_v57  ;;  %v301_v13 = vld [vmem:[%s10827_s3 + $0x158] sm:$0xff] }
  0xad   : > { %996 = vmatpush1.msra.mxu0 %v11595_v8  ;;  %1154 = vmatprep.subr.mxu1 %v7980_v58  ;;  %v8624_v8 = vsub.f32 %v321_v29, %v8592_v53  ;;  %v8635_v54 = vand.u32 4294901760, %v312_v14  ;;  %v305_v29 = vld [vmem:[%s10827_s3 + $0x178] sm:$0xff]  ;;  %11607 = vst [vmem:[#allocation147_spill] sm:$0xff] %v8648_v24  ;;  %v8710_v49 = vsub.f32 %v308_v31, %v8661_v19 }
  0xae   : > { %1000 = vmatprep.subr.mxu0 %v11598_v59  ;;  %1156 = vmatpush1.msra.mxu1 %v7997_v63  ;;  %v11602_v59 = vld [vmem:[#allocation64_spill] sm:$0xff]  ;;  %11604 = vst [vmem:[#allocation145_spill] sm:$0xff] %v8638_v26  ;;  %11608 = vst [vmem:[#allocation148_spill] sm:$0xff] %v8654_v48  ;;  %v8665_v6 = vand.u32 4294901760, %v305_v29  ;;  %v8698_v63 = vsub.f32 %v309_v44, %v8645_v50  ;;  %v11622_v58 = vld [vmem:[#allocation87_spill] sm:$0xff] }
  0xaf   : > { %11599 = vst [vmem:[#allocation142_spill] sm:$0xff] %v8624_v8  ;;  %1004 = vmatpush1.msra.mxu0 %v11600_v35  ;;  %1158 = vmatprep.subr.mxu1 %v8016_v7  ;;  %11603 = vst [vmem:[#allocation144_spill] sm:$0xff] %v8635_v54  ;;  %v11605_v35 = vld [vmem:[#allocation67_spill] sm:$0xff] }
  0xb0   : > { %1008 = vmatprep.subr.mxu0 %v11602_v59  ;;  %1160 = vmatpush1.msra.mxu1 %v8034_v20  ;;  %v304_v59 = vld [vmem:[%s10827_s3 + $0x170] sm:$0xff]  ;;  %v11618_v7 = vld [vmem:[#allocation83_spill] sm:$0xff]  ;;  %11621 = vst [vmem:[#allocation157_spill] sm:$0xff] %v8698_v63  ;;  %11624 = vst [vmem:[#allocation159_spill] sm:$0xff] %v8710_v49  ;;  %v8723_v34 = vsub.f32 %v305_v29, %v8665_v6  ;;  %v8747_v16 = vand.u32 4294901760, %v8698_v63 }
  0xb1   : > { %1012 = vmatpush1.msra.mxu0 %v11605_v35  ;;  %1162 = vmatprep.subr.mxu1 %v8050_v42  ;;  %v8659_v35 = vand.u32 4294901760, %v8624_v8  ;;  %v8671_v42 = vsub.f32 %v313_v0, %v8628_v17  ;;  %v8678_v20 = vand.u32 4294901760, %v304_v59  ;;  %v8689_v0 = vand.u32 4294901760, %v8648_v24  ;;  %v11633_v29 = vld [vmem:[#allocation99_spill] sm:$0xff] }
  0xb2   : > { %1016 = vmatprep.subr.mxu0 %v11609_v38  ;;  %1164 = vmatpush1.msra.mxu1 %v8069_v9  ;;  %v11614_v38 = vld [vmem:[#allocation81_spill] sm:$0xff]  ;;  %v8676_v9 = vand.u32 4294901760, %v8638_v26  ;;  %11628 = vst [vmem:[#allocation162_spill] sm:$0xff] %v8723_v34  ;;  %11634 = vst [vmem:[#allocation166_spill] sm:$0xff] %v8747_v16 }
  0xb3   : > { %11610 = vst [vmem:[#allocation149_spill] sm:$0xff] %v8659_v35  ;;  %1020 = vmatpush1.msra.mxu0 %v11612_v61  ;;  %1166 = vmatprep.subr.mxu1 %v11564_v51  ;;  %11613 = vst [vmem:[#allocation151_spill] sm:$0xff] %v8671_v42  ;;  %v300_v61 = vld [vmem:[%s10827_s3 + $0x150] sm:$0xff]  ;;  %v8684_v51 = vsub.f32 %v312_v14, %v8635_v54  ;;  %v1340_v14 = vsub.f32 %v8624_v8, %v8659_v35  ;;  %v8715_v44 = vand.u32 4294901760, %v8671_v42 }
  0xb4   : > { %1024 = vmatprep.subr.mxu0 %v11614_v38  ;;  %1168 = vmatpush1.msra.mxu1 %v11566_v1  ;;  %11615 = vst [vmem:[#allocation152_spill] sm:$0xff] %v8676_v9  ;;  %11616 = vst [vmem:[#allocation153_spill] sm:$0xff] %v8678_v20  ;;  %v8692_v38 = vand.u32 4294901760, %v8654_v48  ;;  %v297_v1 = vld [vmem:[%s10827_s3 + $0x138] sm:$0xff]  ;;  %v1346_v31 = vsub.f32 %v8638_v26, %v8676_v9  ;;  %v8738_v23 = vsub.f32 %v304_v59, %v8678_v20 }
  0xb5   : > { %11617 = vst [vmem:[#allocation154_spill] sm:$0xff] %v8684_v51  ;;  %1028 = vmatpush1.msra.mxu0 %v11618_v7  ;;  %1170 = vmatprep.subr.mxu1 %v11568_v62  ;;  %11619 = vst [vmem:[#allocation155_spill] sm:$0xff] %v8689_v0  ;;  %v8704_v7 = vand.u32 4294901760, %v301_v13  ;;  %v296_v62 = vld [vmem:[%s10827_s3 + $0x130] sm:$0xff]  ;;  %v8753_v59 = vand.u32 4294901760, %v1340_v14  ;;  %v1364_v14 = vsub.f32 %v8671_v42, %v8715_v44  ;;  %v281_v9 = vld [vmem:[%s10827_s3 + $0xb8] sm:$0xff] }
  0xb6   : > { %11620 = vst [vmem:[#allocation156_spill] sm:$0xff] %v8692_v38  ;;  %1032 = vmatprep.subr.mxu0 %v11622_v58  ;;  %1172 = vmatpush1.msra.mxu1 %v11570_v28  ;;  %11626 = vst [vmem:[#allocation160_spill] sm:$0xff] %v8715_v44  ;;  %v8717_v58 = vand.u32 4294901760, %v300_v61  ;;  %v293_v28 = vld [vmem:[%s10827_s3 + $0x118] sm:$0xff]  ;;  %v1358_v18 = vsub.f32 %v8654_v48, %v8692_v38  ;;  %v8749_v12 = vand.u32 4294901760, %v296_v62  ;;  %v11647_v38 = vld [vmem:[#allocation114_spill] sm:$0xff] }
  0xb7   : > { %11623 = vst [vmem:[#allocation158_spill] sm:$0xff] %v8704_v7  ;;  %1036 = vmatpush1.msra.mxu0 %v11625_v40  ;;  %1174 = vmatprep.subr.mxu1 %v11572_v21  ;;  %v8730_v40 = vand.u32 4294901760, %v8684_v51  ;;  %v8732_v21 = vand.u32 4294901760, %v297_v1  ;;  %11632 = vst [vmem:[#allocation165_spill] sm:$0xff] %v8738_v23  ;;  %v8764_v5 = vsub.f32 %v301_v13, %v8704_v7  ;;  %v8780_v13 = vand.u32 4294901760, %v1346_v31 }
  0xb8   : > { %11627 = vst [vmem:[#allocation161_spill] sm:$0xff] %v8717_v58  ;;  %1040 = vmatprep.subr.mxu0 %v11629_v30  ;;  %1117 = vmatprep.mubr.f32.mxu0 %v11561_v32  ;;  %v1352_v30 = vsub.f32 %v8648_v24, %v8689_v0  ;;  %11635 = vst [vmem:[#allocation167_spill] sm:$0xff] %v8749_v12  ;;  %v8776_v3 = vsub.f32 %v300_v61, %v8717_v58  ;;  %v8796_v31 = vand.u32 4294901760, %v289_v10 }
  0xb9   : > { %11630 = vst [vmem:[#allocation163_spill] sm:$0xff] %v8730_v40  ;;  %11631 = vst [vmem:[#allocation164_spill] sm:$0xff] %v8732_v21  ;;  %1044 = vmatpush1.msra.mxu0 %v11633_v29  ;;  %1176 = vmatpush1.msra.mxu1 %v11575_v60  ;;  %v8756_v29 = vand.u32 4294901760, %v8710_v49  ;;  %v8758_v60 = vand.u32 4294901760, %v293_v28  ;;  %v8788_v44 = vsub.f32 %v297_v1, %v8732_v21  ;;  %v8806_v1 = vand.u32 4294901760, %v1358_v18 }
  0xba   : > { %1048 = vmatprep.subr.mxu0 %v11636_v11  ;;  %1178 = vmatprep.subr.mxu1 %v11577_v27  ;;  %11637 = vst [vmem:[#allocation168_spill] sm:$0xff] %v8753_v59  ;;  %11639 = vst [vmem:[#allocation170_spill] sm:$0xff] %v8764_v5  ;;  %v8771_v11 = vand.u32 4294901760, %v8723_v34  ;;  %v8773_v27 = vand.u32 4294901760, %v292_v25  ;;  %v8792_v61 = vand.u32 4294901760, %v1352_v30  ;;  %v8861_v35 = vsub.f32 %v289_v10, %v8796_v31 }
  0xbb   : > { %11638 = vst [vmem:[#allocation169_spill] sm:$0xff] %v8756_v29  ;;  %1052 = vmatpush1.msra.mxu0 %v11640_v4  ;;  %1180 = vmatpush1.msra.mxu1 %v8263_v22  ;;  %11642 = vst [vmem:[#allocation172_spill] sm:$0xff] %v8776_v3  ;;  %v1370_v4 = vsub.f32 %v8684_v51, %v8730_v40  ;;  %v8785_v22 = vand.u32 4294901760, %v8738_v23  ;;  %v8802_v40 = vsub.f32 %v296_v62, %v8749_v12  ;;  %v11653_v62 = vld [vmem:[#allocation126_spill] sm:$0xff] }
  0xbc   : > { %11641 = vst [vmem:[#allocation171_spill] sm:$0xff] %v8771_v11  ;;  %1056 = vmatprep.subr.mxu0 %v11643_v36  ;;  %1182 = vmatprep.subr.mxu1 %v8286_v56  ;;  %11644 = vst [vmem:[#allocation173_spill] sm:$0xff] %v8780_v13  ;;  %v1376_v36 = vsub.f32 %v8698_v63, %v8747_v16  ;;  %v288_v56 = vld [vmem:[%s10827_s3 + $0xf0] sm:$0xff]  ;;  %v1382_v30 = vsub.f32 %v8710_v49, %v8756_v29 }
  0xbd   : > { %11645 = vst [vmem:[#allocation174_spill] sm:$0xff] %v8785_v22  ;;  %11646 = vst [vmem:[#allocation175_spill] sm:$0xff] %v8788_v44  ;;  %1060 = vmatpush1.msra.mxu0 %v11647_v38  ;;  %1184 = vmatpush1.msra.mxu1 %v8314_v52  ;;  %v8811_v38 = vand.u32 4294901760, %v8764_v5  ;;  %v285_v52 = vld [vmem:[%s10827_s3 + $0xd8] sm:$0xff]  ;;  %v8817_v16 = vsub.f32 %v293_v28, %v8758_v60  ;;  %v1388_v18 = vsub.f32 %v8723_v34, %v8771_v11  ;;  %v284_v29 = vld [vmem:[%s10827_s3 + $0xd0] sm:$0xff] }
  0xbe   : > { %11648 = vst [vmem:[#allocation176_spill] sm:$0xff] %v8792_v61  ;;  %11649 = vst [vmem:[#allocation177_spill] sm:$0xff] %v8802_v40  ;;  %1064 = vmatprep.subr.mxu0 %v8383_v37  ;;  %1186 = vmatprep.subr.mxu1 %v8329_v47  ;;  %v8821_v37 = vand.u32 4294901760, %v1364_v14  ;;  %v8826_v47 = vand.u32 4294901760, %v8776_v3  ;;  %v8832_v0 = vsub.f32 %v292_v25, %v8773_v27  ;;  %v11657_v28 = vld [vmem:[#allocation127_spill] sm:$0xff]  ;;  %v8843_v11 = vand.u32 4294901760, %v8788_v44 }
  0xbf   : > { %11650 = vst [vmem:[#allocation178_spill] sm:$0xff] %v8806_v1  ;;  %11651 = vst [vmem:[#allocation179_spill] sm:$0xff] %v8811_v38  ;;  %1068 = vmatpush1.msra.mxu0 %v11653_v62  ;;  %1188 = vmatpush1.msra.mxu1 %v8343_v46  ;;  %v8836_v62 = vand.u32 4294901760, %v1370_v4  ;;  %v1394_v14 = vsub.f32 %v8738_v23, %v8785_v22  ;;  %v8840_v46 = vand.u32 4294901760, %v288_v56  ;;  %v8850_v25 = vand.u32 4294901760, %v1376_v36  ;;  %v280_v22 = vld [vmem:[%s10827_s3 + $0xb0] sm:$0xff] }
  0xc0   : > { %11652 = vst [vmem:[#allocation180_spill] sm:$0xff] %v8817_v16  ;;  %11654 = vst [vmem:[#allocation181_spill] sm:$0xff] %v8821_v37  ;;  %1072 = vmatprep.subr.mxu0 %v11657_v28  ;;  %1221 = vmatprep.mubr.f32.mxu1 %v11561_v32  ;;  %v8852_v4 = vand.u32 4294901760, %v285_v52  ;;  %v8855_v28 = vand.u32 4294901760, %v8802_v40  ;;  %v1400_v36 = vsub.f32 %v8764_v5, %v8811_v38  ;;  %v8869_v43 = vand.u32 4294901760, %v284_v29  ;;  %v277_v34 = vld [vmem:[%s10827_s3 + $0x98] sm:$0xff] }
  0xc1   : > { %11655 = vst [vmem:[#allocation182_spill] sm:$0xff] %v8826_v47  ;;  %11656 = vst [vmem:[#allocation183_spill] sm:$0xff] %v8832_v0  ;;  %1076 = vmatpush1.msra.mxu0 %v8452_v45  ;;  %1223 = vmatmul.mubr.f32.vlgmr.msra.gmra.mxu1 %v8487_v39  ;;  %v8865_v45 = vand.u32 4294901760, %v1382_v30  ;;  %v8872_v23 = vand.u32 4294901760, %v8817_v16  ;;  %v8879_v10 = vand.u32 4294901760, %v1388_v18  ;;  %v1406_v30 = vsub.f32 %v8776_v3, %v8826_v47  ;;  %v276_v38 = vld [vmem:[%s10827_s3 + $0x90] sm:$0xff] }
  0xc2   : > { %11658 = vst [vmem:[#allocation184_spill] sm:$0xff] %v8836_v62  ;;  %11659 = vst [vmem:[#allocation185_spill] sm:$0xff] %v8840_v46  ;;  %1080 = vmatprep.subr.mxu0 %v8455_v41  ;;  %1342 = vmatprep.subr.mxu1 %v8753_v59  ;;  %v8883_v59 = vand.u32 4294901760, %v281_v9  ;;  %v8886_v41 = vand.u32 4294901760, %v8832_v0  ;;  %v1412_v18 = vsub.f32 %v8788_v44, %v8843_v11  ;;  %v273_v3 = vld [vmem:[%s10827_s3 + $0x78] sm:$0xff]  ;;  %v8909_v5 = vand.u32 4294901760, %v277_v34 }
  0xc3   : > { %11660 = vst [vmem:[#allocation186_spill] sm:$0xff] %v8843_v11  ;;  %11661 = vst [vmem:[#allocation187_spill] sm:$0xff] %v8850_v25  ;;  %1084 = vmatpush1.msra.mxu0 %v8458_v33  ;;  %1348 = vmatpush1.msra.mxu1 %v8780_v13  ;;  %v8893_v33 = vand.u32 4294901760, %v1394_v14  ;;  %v8897_v13 = vand.u32 4294901760, %v280_v22  ;;  %v8900_v47 = vsub.f32 %v288_v56, %v8840_v46  ;;  %v8912_v11 = vand.u32 4294901760, %v8861_v35  ;;  %v272_v56 = vld [vmem:[%s10827_s3 + $0x70] sm:$0xff] }
  0xc4   : > { %11662 = vst [vmem:[#allocation188_spill] sm:$0xff] %v8852_v4  ;;  %11663 = vst [vmem:[#allocation189_spill] sm:$0xff] %v8855_v28  ;;  %1119 = vmatmul.mubr.f32.vlgmr.msra.gmra.mxu0 %v8487_v39  ;;  %1230 = vmatprep.subr.mxu0 %v8592_v53  ;;  %v1418_v14 = vsub.f32 %v8802_v40, %v8855_v28  ;;  %v8915_v44 = vsub.f32 %v285_v52, %v8852_v4  ;;  %v8926_v40 = vand.u32 4294901760, %v276_v38 }
  0xc5   : > { %11664 = vst [vmem:[#allocation190_spill] sm:$0xff] %v8861_v35  ;;  %11665 = vst [vmem:[#allocation191_spill] sm:$0xff] %v8865_v45  ;;  %1232 = vmatpush1.msra.mxu0 %v8604_v55  ;;  %1354 = vmatprep.subr.mxu1 %v8792_v61  ;;  %v8922_v61 = vand.u32 4294901760, %v1400_v36  ;;  %v1424_v28 = vsub.f32 %v8817_v16, %v8872_v23  ;;  %v8929_v49 = vsub.f32 %v284_v29, %v8869_v43  ;;  %v269_v36 = vld [vmem:[%s10827_s3 + $0x58] sm:$0xff] }
  0xc6   : > { %11666 = vst [vmem:[#allocation192_spill] sm:$0xff] %v8869_v43  ;;  %11667 = vst [vmem:[#allocation193_spill] sm:$0xff] %v8872_v23  ;;  %1234 = vmatprep.subr.mxu0 %v8611_v2  ;;  %1360 = vmatpush1.msra.mxu1 %v8806_v1  ;;  %v8933_v52 = vand.u32 4294901760, %v1406_v30  ;;  %v1430_v63 = vsub.f32 %v8832_v0, %v8886_v41  ;;  %v8937_v1 = vand.u32 4294901760, %v273_v3  ;;  %v8947_v29 = vand.u32 4294901760, %v1412_v18  ;;  %v265_v16 = vld [vmem:[%s10827_s3 + $0x38] sm:$0xff] }
  0xc7   : > { %11668 = vst [vmem:[#allocation194_spill] sm:$0xff] %v8879_v10  ;;  %11669 = vst [vmem:[#allocation195_spill] sm:$0xff] %v8883_v59  ;;  %1236 = vmatpush1.msra.mxu0 %v8613_v57  ;;  %1366 = vmatprep.subr.mxu1 %v8821_v37  ;;  %v8943_v23 = vsub.f32 %v281_v9, %v8883_v59  ;;  %v8950_v30 = vand.u32 4294901760, %v8900_v47  ;;  %v8952_v37 = vand.u32 4294901760, %v272_v56  ;;  %v8962_v9 = vand.u32 4294901760, %v1418_v14 }
  0xc8   : > { %11670 = vst [vmem:[#allocation196_spill] sm:$0xff] %v8886_v41  ;;  %11671 = vst [vmem:[#allocation197_spill] sm:$0xff] %v8893_v33  ;;  %1238 = vmatprep.subr.mxu0 %v8628_v17  ;;  %1372 = vmatpush1.msra.mxu1 %v8836_v62  ;;  %v268_v41 = vld [vmem:[%s10827_s3 + $0x50] sm:$0xff]  ;;  %v8958_v0 = vsub.f32 %v280_v22, %v8897_v13  ;;  %v1436_v18 = vsub.f32 %v8861_v35, %v8912_v11  ;;  %v8967_v62 = vand.u32 4294901760, %v8915_v44 }
  0xc9   : > { %11672 = vst [vmem:[#allocation198_spill] sm:$0xff] %v8897_v13  ;;  %11673 = vst [vmem:[#allocation199_spill] sm:$0xff] %v8900_v47  ;;  %1240 = vmatpush1.msra.mxu0 %v8635_v54  ;;  %1378 = vmatprep.subr.mxu1 %v8850_v25  ;;  %v8973_v17 = vsub.f32 %v277_v34, %v8909_v5  ;;  %v8977_v22 = vand.u32 4294901760, %v1424_v28  ;;  %v8980_v14 = vand.u32 4294901760, %v8929_v49  ;;  %v8982_v25 = vand.u32 4294901760, %v269_v36 }
  0xca   : > { %11674 = vst [vmem:[#allocation200_spill] sm:$0xff] %v8909_v5  ;;  %11675 = vst [vmem:[#allocation201_spill] sm:$0xff] %v8912_v11  ;;  %1242 = vmatprep.subr.mxu0 %v8645_v50  ;;  %1384 = vmatpush1.msra.mxu1 %v8865_v45  ;;  %v264_v11 = vld [vmem:[%s10827_s3 + $0x30] sm:$0xff]  ;;  %v8988_v35 = vsub.f32 %v276_v38, %v8926_v40  ;;  %v8992_v34 = vand.u32 4294901760, %v1430_v63  ;;  %v8995_v28 = vand.u32 4294901760, %v8943_v23  ;;  %v8997_v45 = vand.u32 4294901760, %v268_v41 }
  0xcb   : > { %11676 = vst [vmem:[#allocation202_spill] sm:$0xff] %v8915_v44  ;;  %11677 = vst [vmem:[#allocation203_spill] sm:$0xff] %v8922_v61  ;;  %1244 = vmatpush1.msra.mxu0 %v8661_v19  ;;  %1390 = vmatprep.subr.mxu1 %v8879_v10  ;;  %v261_v50 = vld [vmem:[%s10827_s3 + $0x18] sm:$0xff]  ;;  %v9003_v54 = vsub.f32 %v273_v3, %v8937_v1  ;;  %v1442_v63 = vsub.f32 %v8900_v47, %v8950_v30  ;;  %v9010_v38 = vand.u32 4294901760, %v8958_v0  ;;  %v260_v19 = vld [vmem:[%s10827_s3 + $0x10] sm:$0xff] }
  0xcc   : > { %11678 = vst [vmem:[#allocation204_spill] sm:$0xff] %v8926_v40  ;;  %11679 = vst [vmem:[#allocation205_spill] sm:$0xff] %v8929_v49  ;;  %1246 = vmatprep.subr.mxu0 %v8665_v6  ;;  %1396 = vmatpush1.msra.mxu1 %v8893_v33  ;;  %v9012_v10 = vand.u32 4294901760, %v265_v16  ;;  %v9018_v57 = vsub.f32 %v272_v56, %v8952_v37  ;;  %v9022_v3 = vand.u32 4294901760, %v1436_v18  ;;  %v9029_v47 = vand.u32 4294901760, %v264_v11 }
  0xcd   : > { %11680 = vst [vmem:[#allocation206_spill] sm:$0xff] %v8933_v52  ;;  %11681 = vst [vmem:[#allocation207_spill] sm:$0xff] %v8937_v1  ;;  %1248 = vmatpush1.msra.mxu0 %v8678_v20  ;;  %1402 = vmatprep.subr.mxu1 %v8922_v61  ;;  %v1448_v33 = vsub.f32 %v8915_v44, %v8967_v62  ;;  %v1454_v56 = vsub.f32 %v8929_v49, %v8980_v14  ;;  %v9036_v20 = vand.u32 4294901760, %v8988_v35 }
  0xce   : > { %11682 = vst [vmem:[#allocation208_spill] sm:$0xff] %v8943_v23  ;;  %11683 = vst [vmem:[#allocation209_spill] sm:$0xff] %v8947_v29  ;;  %1250 = vmatprep.subr.mxu0 %v8704_v7  ;;  %1408 = vmatpush1.msra.mxu1 %v8933_v52  ;;  %v9038_v18 = vand.u32 4294901760, %v261_v50  ;;  %v9041_v61 = vsub.f32 %v269_v36, %v8982_v25  ;;  %v9048_v52 = vand.u32 4294901760, %v9003_v54  ;;  %v9050_v44 = vand.u32 4294901760, %v260_v19 }
  0xcf   : > { %11684 = vst [vmem:[#allocation210_spill] sm:$0xff] %v8950_v30  ;;  %11685 = vst [vmem:[#allocation211_spill] sm:$0xff] %v8952_v37  ;;  %v9027_v30 = vand.u32 4294901760, %v8973_v17  ;;  %1252 = vmatpush1.msra.mxu0 %v8717_v58  ;;  %1414 = vmatprep.subr.mxu1 %v8947_v29  ;;  %v9057_v36 = vand.u32 4294901760, %v1442_v63  ;;  %v1466_v29 = vsub.f32 %v8958_v0, %v9010_v38  ;;  %v9062_v49 = vand.u32 4294901760, %v9018_v57 }
  0xd0   : > { %11686 = vst [vmem:[#allocation212_spill] sm:$0xff] %v8958_v0  ;;  %11687 = vst [vmem:[#allocation213_spill] sm:$0xff] %v8962_v9  ;;  %1254 = vmatprep.subr.mxu0 %v8732_v21  ;;  %1420 = vmatpush1.msra.mxu1 %v8962_v9  ;;  %v9074_v63 = vsub.f32 %v264_v11, %v9029_v47  ;;  %v9083_v0 = vand.u32 4294901760, %v9041_v61 }
  0xd1   : > { %11688 = vst [vmem:[#allocation214_spill] sm:$0xff] %v8967_v62  ;;  %11689 = vst [vmem:[#allocation215_spill] sm:$0xff] %v8973_v17  ;;  %v1460_v62 = vsub.f32 %v8943_v23, %v8995_v28  ;;  %1256 = vmatpush1.msra.mxu0 %v8749_v12  ;;  %1426 = vmatprep.subr.mxu1 %v8977_v22  ;;  %v1472_v9 = vsub.f32 %v8973_v17, %v9027_v30 }
  0xd2   : > { %11690 = vst [vmem:[#allocation216_spill] sm:$0xff] %v8977_v22  ;;  %11691 = vst [vmem:[#allocation217_spill] sm:$0xff] %v8980_v14  ;;  %v9053_v14 = vsub.f32 %v268_v41, %v8997_v45  ;;  %v9069_v41 = vand.u32 4294901760, %v1448_v33  ;;  %1258 = vmatprep.subr.mxu0 %v8758_v60  ;;  %1432 = vmatpush1.msra.mxu1 %v8992_v34  ;;  %v9086_v33 = vsub.f32 %v261_v50, %v9038_v18 }
  0xd3   : > { %11692 = vst [vmem:[#allocation218_spill] sm:$0xff] %v8982_v25  ;;  %11693 = vst [vmem:[#allocation219_spill] sm:$0xff] %v8988_v35  ;;  %1260 = vmatpush1.msra.mxu0 %v8773_v27  ;;  %1438 = vmatprep.subr.mxu1 %v9022_v3  ;;  %v9090_v11 = vand.u32 4294901760, %v1460_v62  ;;  %v9098_v22 = vsub.f32 %v260_v19, %v9050_v44  ;;  %v9102_v50 = vand.u32 4294901760, %v1466_v29  ;;  %v9114_v19 = vand.u32 4294901760, %v9074_v63 }
  0xd4   : > { %11694 = vst [vmem:[#allocation220_spill] sm:$0xff] %v8992_v34  ;;  %11695 = vst [vmem:[#allocation221_spill] sm:$0xff] %v8995_v28  ;;  %v9065_v28 = vsub.f32 %v265_v16, %v9012_v10  ;;  %v1478_v16 = vsub.f32 %v8988_v35, %v9036_v20  ;;  %v1484_v34 = vsub.f32 %v9003_v54, %v9048_v52  ;;  %1262 = vmatprep.subr.mxu0 %v8796_v31 }
  0xd5   : > { %11696 = vst [vmem:[#allocation222_spill] sm:$0xff] %v8997_v45  ;;  %11697 = vst [vmem:[#allocation223_spill] sm:$0xff] %v9003_v54  ;;  %1444 = vmatpush1.msra.mxu1 %v9057_v36  ;;  %1264 = vmatpush1.msra.mxu0 %v8840_v46 }
  0xd6   : > { %11698 = vst [vmem:[#allocation224_spill] sm:$0xff] %v9010_v38  ;;  %11699 = vst [vmem:[#allocation225_spill] sm:$0xff] %v9012_v10  ;;  %v9078_v38 = vand.u32 4294901760, %v1454_v56  ;;  %v9095_v56 = vand.u32 4294901760, %v9053_v14  ;;  %v9107_v62 = vand.u32 4294901760, %v9065_v28  ;;  %1450 = vmatprep.subr.mxu1 %v9069_v41  ;;  %1266 = vmatprep.subr.mxu0 %v8852_v4  ;;  %v9118_v29 = vand.u32 4294901760, %v1478_v16 }
  0xd7   : > { %11700 = vst [vmem:[#allocation226_spill] sm:$0xff] %v9018_v57  ;;  %11701 = vst [vmem:[#allocation227_spill] sm:$0xff] %v9022_v3  ;;  %v1490_v3 = vsub.f32 %v9018_v57, %v9062_v49  ;;  %1268 = vmatpush1.msra.mxu0 %v8869_v43  ;;  %1325 = vmatprep.mubr.f32.mxu0 %v11561_v32 }
  0xd8   : > { %11702 = vst [vmem:[#allocation228_spill] sm:$0xff] %v9027_v30  ;;  %11703 = vst [vmem:[#allocation229_spill] sm:$0xff] %v9029_v47  ;;  %1456 = vmatpush1.msra.mxu1 %v9078_v38  ;;  %1270 = vmatprep.subr.mxu0 %v8883_v59 }
  0xd9   : > { %11704 = vst [vmem:[#allocation230_spill] sm:$0xff] %v9036_v20  ;;  %11705 = vst [vmem:[#allocation231_spill] sm:$0xff] %v9038_v18  ;;  %1462 = vmatprep.subr.mxu1 %v9090_v11  ;;  %v9132_v20 = vand.u32 4294901760, %v9098_v22  ;;  %v9136_v16 = vand.u32 4294901760, %v1490_v3  ;;  %1272 = vmatpush1.msra.mxu0 %v8897_v13 }
  0xda   : > { %11706 = vst [vmem:[#allocation232_spill] sm:$0xff] %v9041_v61  ;;  %11707 = vst [vmem:[#allocation233_spill] sm:$0xff] %v9048_v52  ;;  %v9111_v52 = vand.u32 4294901760, %v1472_v9  ;;  %v9127_v9 = vand.u32 4294901760, %v1484_v34  ;;  %1468 = vmatpush1.msra.mxu1 %v9102_v50  ;;  %v1514_v34 = vsub.f32 %v9074_v63, %v9114_v19  ;;  %1274 = vmatprep.subr.mxu0 %v8909_v5 }
  0xdb   : > { %11708 = vst [vmem:[#allocation234_spill] sm:$0xff] %v9050_v44  ;;  %11709 = vst [vmem:[#allocation235_spill] sm:$0xff] %v9053_v14  ;;  %1276 = vmatpush1.msra.mxu0 %v8926_v40  ;;  %1561 = vmatprep.mubr.f32.mxu1 %v11561_v32 }
  0xdc   : > { %11710 = vst [vmem:[#allocation236_spill] sm:$0xff] %v9057_v36  ;;  %11711 = vst [vmem:[#allocation237_spill] sm:$0xff] %v9062_v49  ;;  %v1496_v36 = vsub.f32 %v9041_v61, %v9083_v0  ;;  %v9123_v49 = vand.u32 4294901760, %v9086_v33  ;;  %1474 = vmatprep.subr.mxu1 %v9111_v52  ;;  %1278 = vmatprep.subr.mxu0 %v8937_v1 }
  0xdd   : > { %11712 = vst [vmem:[#allocation238_spill] sm:$0xff] %v9065_v28  ;;  %11713 = vst [vmem:[#allocation239_spill] sm:$0xff] %v9069_v41  ;;  %v1502_v41 = vsub.f32 %v9053_v14, %v9095_v56  ;;  %1480 = vmatpush1.msra.mxu1 %v9118_v29  ;;  %1280 = vmatpush1.msra.mxu0 %v8952_v37 }
  0xde   : > { %11714 = vst [vmem:[#allocation240_spill] sm:$0xff] %v9074_v63  ;;  %11715 = vst [vmem:[#allocation241_spill] sm:$0xff] %v9078_v38  ;;  %v1508_v38 = vsub.f32 %v9065_v28, %v9107_v62  ;;  %v1520_v3 = vsub.f32 %v9086_v33, %v9123_v49  ;;  %1486 = vmatprep.subr.mxu1 %v9127_v9  ;;  %1282 = vmatprep.subr.mxu0 %v8982_v25 }
  0xdf   : > { %11716 = vst [vmem:[#allocation242_spill] sm:$0xff] %v9083_v0  ;;  %11717 = vst [vmem:[#allocation243_spill] sm:$0xff] %v9086_v33  ;;  %1492 = vmatpush1.msra.mxu1 %v9136_v16  ;;  %1284 = vmatpush1.msra.mxu0 %v8997_v45 }
  0xe0   : > { %11718 = vst [vmem:[#allocation244_spill] sm:$0xff] %v9090_v11  ;;  %11719 = vst [vmem:[#allocation245_spill] sm:$0xff] %v9095_v56  ;;  %v9146_v11 = vand.u32 4294901760, %v1496_v36  ;;  %v9162_v36 = vand.u32 4294901760, %v1514_v34  ;;  %1286 = vmatprep.subr.mxu0 %v9012_v10  ;;  %v11739_v34 = vld [vmem:[#allocation143_spill] sm:$0xff] }
  0xe1   : > { %11720 = vst [vmem:[#allocation246_spill] sm:$0xff] %v9098_v22  ;;  %11721 = vst [vmem:[#allocation247_spill] sm:$0xff] %v9102_v50  ;;  %v9152_v50 = vand.u32 4294901760, %v1502_v41  ;;  %v9166_v41 = vand.u32 4294901760, %v1520_v3  ;;  %1288 = vmatpush1.msra.mxu0 %v9029_v47  ;;  %v11740_v3 = vld [vmem:[#allocation162_spill] sm:$0xff] }
  0xe2   : > { %11722 = vst [vmem:[#allocation248_spill] sm:$0xff] %v9107_v62  ;;  %11723 = vst [vmem:[#allocation249_spill] sm:$0xff] %v9111_v52  ;;  %v1526_v52 = vsub.f32 %v9098_v22, %v9132_v20  ;;  %1498 = vmatprep.subr.mxu1 %v9146_v11  ;;  %1290 = vmatprep.subr.mxu0 %v9038_v18 }
  0xe3   : > { %11724 = vst [vmem:[#allocation250_spill] sm:$0xff] %v9114_v19  ;;  %11725 = vst [vmem:[#allocation251_spill] sm:$0xff] %v9118_v29  ;;  %v9158_v19 = vand.u32 4294901760, %v1508_v38  ;;  %1504 = vmatpush1.msra.mxu1 %v9152_v50  ;;  %1292 = vmatpush1.msra.mxu0 %v9050_v44  ;;  %v11738_v38 = vld [vmem:[#allocation159_spill] sm:$0xff]  ;;  %v11836_v29 = vld [vmem:[#allocation98_spill] sm:$0xff] }
  0xe4   : > { %11726 = vst [vmem:[#allocation252_spill] sm:$0xff] %v9123_v49  ;;  %11727 = vst [vmem:[#allocation253_spill] sm:$0xff] %v9127_v9  ;;  %v9170_v9 = vand.u32 4294901760, %v1526_v52  ;;  %1571 = vmatprep.subr.mxu0 %v8624_v8  ;;  %1331 = vmatmul.mubr.f32.vlgmr.msra.gmra.mxu0 %v8504_v15  ;;  %v11736_v15 = vld [vmem:[#allocation157_spill] sm:$0xff]  ;;  %v11826_v8 = vld [vmem:[#allocation80_spill] sm:$0xff] }
  0xe5   : > { %11728 = vst [vmem:[#allocation254_spill] sm:$0xff] %v9132_v20  ;;  %11729 = vst [vmem:[#allocation255_spill] sm:$0xff] %v9136_v16  ;;  %1510 = vmatprep.subr.mxu1 %v9158_v19  ;;  %1574 = vmatpush1.msra.mxu0 %v8638_v26  ;;  %v11737_v52 = vld [vmem:[#allocation141_spill] sm:$0xff]  ;;  %v11823_v26 = vld [vmem:[#allocation56_spill] sm:$0xff] }
  0xe6   : > { %11730 = vst [vmem:[#allocation256_spill] sm:$0xff] %v9146_v11  ;;  %11731 = vst [vmem:[#allocation257_spill] sm:$0xff] %v9152_v50  ;;  %1516 = vmatpush1.msra.mxu1 %v9162_v36  ;;  %1577 = vmatprep.subr.mxu0 %v8648_v24  ;;  %v11749_v24 = vld [vmem:[#allocation177_spill] sm:$0xff]  ;;  %v11824_v50 = vld [vmem:[#allocation76_spill] sm:$0xff] }
  0xe7   : > { %11732 = vst [vmem:[#allocation258_spill] sm:$0xff] %v9158_v19  ;;  %11733 = vst [vmem:[#allocation259_spill] sm:$0xff] %v9162_v36  ;;  %1522 = vmatprep.subr.mxu1 %v9166_v41  ;;  %1580 = vmatpush1.msra.mxu0 %v8654_v48  ;;  %v11744_v48 = vld [vmem:[#allocation170_spill] sm:$0xff]  ;;  %v11746_v36 = vld [vmem:[#allocation172_spill] sm:$0xff] }
  0xe8   : > { %11734 = vst [vmem:[#allocation260_spill] sm:$0xff] %v9166_v41  ;;  %11735 = vst [vmem:[#allocation261_spill] sm:$0xff] %v9170_v9  ;;  %1528 = vmatpush1.msra.mxu1 %v9170_v9  ;;  %1583 = vmatprep.subr.mxu0 %v8671_v42  ;;  %v11741_v9 = vld [vmem:[#allocation144_spill] sm:$0xff]  ;;  %v11742_v41 = vld [vmem:[#allocation165_spill] sm:$0xff] }
  0xe9   : > { %1563 = vmatmul.mubr.f32.vlgmr.msra.gmra.mxu1 %v8487_v39  ;;  %1707 = vmatprep.subr.mxu1 %v8592_v53  ;;  %v11743_v42 = vld [vmem:[#allocation146_spill] sm:$0xff]  ;;  %v11818_v19 = vld [vmem:[#allocation63_spill] sm:$0xff]  ;;  %v11830_v16 = vld [vmem:[#allocation89_spill] sm:$0xff] }
  0xea   : > { %1709 = vmatpush1.msra.mxu1 %v8604_v55  ;;  %1586 = vmatpush1.msra.mxu0 %v8684_v51  ;;  %v11745_v51 = vld [vmem:[#allocation150_spill] sm:$0xff] }
  0xeb   : > { %1711 = vmatprep.subr.mxu1 %v8611_v2  ;;  %1589 = vmatprep.subr.mxu0 %v11736_v15  ;;  %v11747_v15 = vld [vmem:[#allocation175_spill] sm:$0xff]  ;;  %v11828_v11 = vld [vmem:[#allocation86_spill] sm:$0xff] }
  0xec   : > { %1713 = vmatpush1.msra.mxu1 %v11737_v52  ;;  %1592 = vmatpush1.msra.mxu0 %v11738_v38  ;;  %v11748_v38 = vld [vmem:[#allocation153_spill] sm:$0xff] }
  0xed   : > { %1715 = vmatprep.subr.mxu1 %v11739_v34  ;;  %1595 = vmatprep.subr.mxu0 %v11740_v3  ;;  %v11750_v3 = vld [vmem:[#allocation180_spill] sm:$0xff] }
  0xee   : > { %1717 = vmatpush1.msra.mxu1 %v11741_v9  ;;  %1598 = vmatpush1.msra.mxu0 %v11742_v41  ;;  %v11751_v41 = vld [vmem:[#allocation183_spill] sm:$0xff] }
  0xef   : > { %1719 = vmatprep.subr.mxu1 %v11743_v42  ;;  %1601 = vmatprep.subr.mxu0 %v11744_v48  ;;  %v11752_v48 = vld [vmem:[#allocation190_spill] sm:$0xff] }
  0xf0   : > { %1721 = vmatpush1.msra.mxu1 %v11745_v51  ;;  %1604 = vmatpush1.msra.mxu0 %v11746_v36  ;;  %v11753_v36 = vld [vmem:[#allocation199_spill] sm:$0xff] }
  0xf1   : > { %1723 = vmatprep.subr.mxu1 %v8665_v6  ;;  %1607 = vmatprep.subr.mxu0 %v11747_v15  ;;  %v11754_v15 = vld [vmem:[#allocation202_spill] sm:$0xff] }
  0xf2   : > { %1725 = vmatpush1.msra.mxu1 %v11748_v38  ;;  %1610 = vmatpush1.msra.mxu0 %v11749_v24  ;;  %v11755_v24 = vld [vmem:[#allocation205_spill] sm:$0xff] }
  0xf3   : > { %1727 = vmatprep.subr.mxu1 %v8704_v7  ;;  %1613 = vmatprep.subr.mxu0 %v11750_v3  ;;  %v11816_v3 = vld [vmem:[#allocation61_spill] sm:$0xff] }
  0xf4   : > { %1729 = vmatpush1.msra.mxu1 %v8717_v58  ;;  %1616 = vmatpush1.msra.mxu0 %v11751_v41  ;;  %v11756_v41 = vld [vmem:[#allocation212_spill] sm:$0xff] }
  0xf5   : > { %1731 = vmatprep.subr.mxu1 %v8732_v21  ;;  %1619 = vmatprep.subr.mxu0 %v11752_v48  ;;  %v11815_v48 = vld [vmem:[#allocation42_spill] sm:$0xff] }
  0xf6   : > { %1733 = vmatpush1.msra.mxu1 %v8749_v12  ;;  %1622 = vmatpush1.msra.mxu0 %v11753_v36  ;;  %v11813_v36 = vld [vmem:[#allocation36_spill] sm:$0xff] }
  0xf7   : > { %1735 = vmatprep.subr.mxu1 %v8758_v60  ;;  %1625 = vmatprep.subr.mxu0 %v11754_v15  ;;  %v11811_v15 = vld [vmem:[#allocation31_spill] sm:$0xff] }
  0xf8   : > { %1737 = vmatpush1.msra.mxu1 %v8773_v27  ;;  %1628 = vmatpush1.msra.mxu0 %v11755_v24  ;;  %v11810_v24 = vld [vmem:[#allocation44_spill] sm:$0xff] }
  0xf9   : > { %1739 = vmatprep.subr.mxu1 %v8796_v31  ;;  %1631 = vmatprep.subr.mxu0 %v8943_v23  ;;  %v11809_v23 = vld [vmem:[#allocation28_spill] sm:$0xff] }
  0xfa   : > { %1741 = vmatpush1.msra.mxu1 %v8840_v46  ;;  %1634 = vmatpush1.msra.mxu0 %v11756_v41  ;;  %v11769_v41 = vld [vmem:[#allocation171_spill] sm:$0xff] }
  0xfb   : > { %1743 = vmatprep.subr.mxu1 %v8852_v4  ;;  %1637 = vmatprep.subr.mxu0 %v8973_v17  ;;  %v11767_v17 = vld [vmem:[#allocation166_spill] sm:$0xff] }
  0xfc   : > { %1745 = vmatpush1.msra.mxu1 %v8869_v43  ;;  %1640 = vmatpush1.msra.mxu0 %v8988_v35 }
  0xfd   : > { %1747 = vmatprep.subr.mxu1 %v8883_v59  ;;  %1643 = vmatprep.subr.mxu0 %v9003_v54  ;;  %v9271_v54 = vld [vmem:[%s8298_s11 + $0x2] sm:$0x3] }
  0xfe   : > { %1749 = vmatpush1.msra.mxu1 %v8897_v13  ;;  %1646 = vmatpush1.msra.mxu0 %v9018_v57  ;;  %v2111_v57 = vstv %s9236_s24  ;;  %11765 = vst [vmem:[#allocation262_spill] sm:$0xff] %v9271_v54  ;;  %s10214_s24 = sld [smem:[#allocation2 + $0x181]] }
  0xff   : > { %1751 = vmatprep.subr.mxu1 %v8909_v5  ;;  %1649 = vmatprep.subr.mxu0 %v9041_v61  ;;  %v11759_v61 = vld [vmem:[#allocation152_spill] sm:$0xff]  ;;  %v2112_v35 = vmul.f32 %v9271_v54, %v2111_v57  ;;  %v11772_v54 = vld [vmem:[#allocation179_spill] sm:$0xff] }
 0x100   : > { %1753 = vmatpush1.msra.mxu1 %v8926_v40  ;;  %1652 = vmatpush1.msra.mxu0 %v9053_v14  ;;  %v11757_v14 = vld [vmem:[#allocation136_spill] sm:$0xff] }
 0x101   : > { %1755 = vmatprep.subr.mxu1 %v8937_v1  ;;  %1655 = vmatprep.subr.mxu0 %v9065_v28  ;;  %v11758_v28 = vld [vmem:[#allocation149_spill] sm:$0xff] }
 0x102   : > { %1697 = vmatprep.mubr.f32.mxu0 %v11561_v32  ;;  %1658 = vmatpush1.msra.mxu0 %v9074_v63  ;;  %v11760_v63 = vld [vmem:[#allocation155_spill] sm:$0xff] }
 0x103   : > { %1757 = vmatpush1.msra.mxu1 %v8952_v37  ;;  %1661 = vmatprep.subr.mxu0 %v9086_v33  ;;  %v2108_v33 = vstv %s9232_s23  ;;  %s10210_s23 = sld [smem:[#allocation2 + $0x180]] }
 0x104   : > { %1759 = vmatprep.subr.mxu1 %v8982_v25  ;;  %1664 = vmatpush1.msra.mxu0 %v9098_v22  ;;  %v11761_v22 = vld [vmem:[#allocation156_spill] sm:$0xff] }
 0x105   : > { %1761 = vmatpush1.msra.mxu1 %v8997_v45  ;;  %1700 = vmatmul.mubr.f32.vlgmr.msra.gmra.mxu0 %v11757_v14  ;;  %v11762_v14 = vld [vmem:[#allocation160_spill] sm:$0xff] }
 0x106   : > { %1815 = vmatprep.subr.mxu0 %v11758_v28  ;;  %1763 = vmatprep.subr.mxu1 %v9012_v10 }
 0x107   : > { %1819 = vmatpush1.msra.mxu0 %v11759_v61  ;;  %1765 = vmatpush1.msra.mxu1 %v9029_v47  ;;  %v11763_v61 = vld [vmem:[#allocation163_spill] sm:$0xff] }
 0x108   : > { %1823 = vmatprep.subr.mxu0 %v11760_v63  ;;  %1767 = vmatprep.subr.mxu1 %v9038_v18  ;;  %v9267_v63 = vld [vmem:[%s8298_s11] sm:$0x3] }
 0x109   : > { %1827 = vmatpush1.msra.mxu0 %v11761_v22  ;;  %1769 = vmatpush1.msra.mxu1 %v9050_v44  ;;  %11764 = vst [vmem:[#allocation136_spill] sm:$0xff] %v9267_v63  ;;  %v2109_v28 = vmul.f32 %v9267_v63, %v2108_v33  ;;  %v11766_v22 = vld [vmem:[#allocation137_spill] sm:$0xff]  ;;  %v11770_v33 = vld [vmem:[#allocation174_spill] sm:$0xff]  ;;  %v11807_v63 = vld [vmem:[#allocation24_spill] sm:$0xff] }
 0x10a   : > { %1831 = vmatprep.subr.mxu0 %v11762_v14  ;;  %1802 = vmatprep.mubr.f32.mxu1 %v11561_v32  ;;  %v2115_v14 = vstv %s9246_s25  ;;  %s10228_s25 = sld [smem:[#allocation2 + $0x182]] }
 0x10b   : > { %1835 = vmatpush1.msra.mxu0 %v11763_v61  ;;  %1806 = vmatmul.mubr.f32.vlgmr.msra.gmra.mxu1 %v11766_v22  ;;  %v11768_v61 = vld [vmem:[#allocation169_spill] sm:$0xff]  ;;  %v2113_v57 = vadd.f32 %v2112_v35, %v2109_v28  ;;  %v9286_v22 = vld [vmem:[%s8298_s11 + $0x4] sm:$0x3] }
 0x10c   : > { %1839 = vmatprep.subr.mxu0 %v11767_v17  ;;  %1981 = vmatprep.subr.mxu1 %v8592_v53  ;;  %11771 = vst [vmem:[#allocation137_spill] sm:$0xff] %v9286_v22  ;;  %v2116_v17 = vmul.f32 %v9286_v22, %v2115_v14  ;;  %v11775_v35 = vld [vmem:[#allocation189_spill] sm:$0xff]  ;;  %v9301_v14 = vld [vmem:[%s8298_s11 + $0x6] sm:$0x3] }
 0x10d   : > { %1843 = vmatpush1.msra.mxu0 %v11768_v61  ;;  %1983 = vmatpush1.msra.mxu1 %v8604_v55  ;;  %v2119_v61 = vstv %s9258_s26  ;;  %11776 = vst [vmem:[#allocation263_spill] sm:$0xff] %v9301_v14  ;;  %v11777_v22 = vld [vmem:[#allocation193_spill] sm:$0xff]  ;;  %s10244_s26 = sld [smem:[#allocation2 + $0x183]] }
 0x10e   : > { %1847 = vmatprep.subr.mxu0 %v11769_v41  ;;  %1985 = vmatprep.subr.mxu1 %v8611_v2  ;;  %v11773_v41 = vld [vmem:[#allocation182_spill] sm:$0xff]  ;;  %v2117_v28 = vadd.f32 %v2116_v17, %v2113_v57  ;;  %v9316_v57 = vld [vmem:[%s8298_s11 + $0x8] sm:$0x3] }
 0x10f   : > { %1851 = vmatpush1.msra.mxu0 %v11770_v33  ;;  %1987 = vmatpush1.msra.mxu1 %v11737_v52  ;;  %v11774_v33 = vld [vmem:[#allocation186_spill] sm:$0xff]  ;;  %11781 = vst [vmem:[#allocation264_spill] sm:$0xff] %v9316_v57 }
 0x110   : > { %1855 = vmatprep.subr.mxu0 %v11772_v54  ;;  %1989 = vmatprep.subr.mxu1 %v11739_v34  ;;  %v2120_v54 = vmul.f32 %v9301_v14, %v2119_v61  ;;  %v11780_v17 = vld [vmem:[#allocation210_spill] sm:$0xff] }
 0x111   : > { %1859 = vmatpush1.msra.mxu0 %v11773_v41  ;;  %1991 = vmatpush1.msra.mxu1 %v11741_v9  ;;  %v2123_v41 = vstv %s9277_s27  ;;  %v11782_v14 = vld [vmem:[#allocation214_spill] sm:$0xff]  ;;  %s10263_s27 = sld [smem:[#allocation2 + $0x184]] }
 0x112   : > { %1863 = vmatprep.subr.mxu0 %v11774_v33  ;;  %1993 = vmatprep.subr.mxu1 %v11743_v42  ;;  %v11778_v33 = vld [vmem:[#allocation196_spill] sm:$0xff]  ;;  %v2121_v61 = vadd.f32 %v2120_v54, %v2117_v28  ;;  %v9331_v28 = vld [vmem:[%s8298_s11 + $0xa] sm:$0x3] }
 0x113   : > { %1867 = vmatpush1.msra.mxu0 %v11775_v35  ;;  %1995 = vmatpush1.msra.mxu1 %v11745_v51  ;;  %v11779_v35 = vld [vmem:[#allocation201_spill] sm:$0xff]  ;;  %v11785_v54 = vld [vmem:[#allocation224_spill] sm:$0xff]  ;;  %11786 = vst [vmem:[#allocation265_spill] sm:$0xff] %v9331_v28 }
 0x114   : > { %1871 = vmatprep.subr.mxu0 %v11777_v22  ;;  %1997 = vmatprep.subr.mxu1 %v8665_v6  ;;  %v2124_v22 = vmul.f32 %v9316_v57, %v2123_v41  ;;  %v11787_v57 = vld [vmem:[#allocation230_spill] sm:$0xff] }
 0x115   : > { %1875 = vmatpush1.msra.mxu0 %v11778_v33  ;;  %1999 = vmatpush1.msra.mxu1 %v11748_v38  ;;  %v2127_v33 = vstv %s9292_s28  ;;  %s10281_s28 = sld [smem:[#allocation2 + $0x185]] }
 0x116   : > { %1879 = vmatprep.subr.mxu0 %v11779_v35  ;;  %2001 = vmatprep.subr.mxu1 %v8704_v7  ;;  %v11783_v35 = vld [vmem:[#allocation217_spill] sm:$0xff]  ;;  %v2125_v41 = vadd.f32 %v2124_v22, %v2121_v61 }
 0x117   : > { %1883 = vmatpush1.msra.mxu0 %v11780_v17  ;;  %2003 = vmatpush1.msra.mxu1 %v8717_v58  ;;  %v11784_v17 = vld [vmem:[#allocation221_spill] sm:$0xff] }
 0x118   : > { %1887 = vmatprep.subr.mxu0 %v11782_v14  ;;  %2005 = vmatprep.subr.mxu1 %v8732_v21  ;;  %v2128_v14 = vmul.f32 %v9331_v28, %v2127_v33  ;;  %v11789_v22 = vld [vmem:[#allocation237_spill] sm:$0xff]  ;;  %v11806_v28 = vld [vmem:[#allocation38_spill] sm:$0xff] }
 0x119   : > { %1891 = vmatpush1.msra.mxu0 %v11783_v35  ;;  %2007 = vmatpush1.msra.mxu1 %v8749_v12  ;;  %v2131_v35 = vstv %s9307_s29  ;;  %v9344_v33 = vld [vmem:[%s8298_s11 + $0xc] sm:$0x3]  ;;  %s10295_s29 = sld [smem:[#allocation2 + $0x186]] }
 0x11a   : > { %1895 = vmatprep.subr.mxu0 %v11784_v17  ;;  %2009 = vmatprep.subr.mxu1 %v8758_v60  ;;  %v11788_v17 = vld [vmem:[#allocation233_spill] sm:$0xff]  ;;  %v2129_v61 = vadd.f32 %v2128_v14, %v2125_v41  ;;  %11790 = vst [vmem:[#allocation266_spill] sm:$0xff] %v9344_v33  ;;  %v11791_v14 = vld [vmem:[#allocation250_spill] sm:$0xff] }
 0x11b   : > { %1899 = vmatpush1.msra.mxu0 %v11785_v54  ;;  %2011 = vmatpush1.msra.mxu1 %v8773_v27  ;;  %v2132_v54 = vmul.f32 %v9344_v33, %v2131_v35  ;;  %v9357_v35 = vld [vmem:[%s8298_s11 + $0xe] sm:$0x3] }
 0x11c   : > { %1903 = vmatprep.subr.mxu0 %v9027_v30  ;;  %2013 = vmatprep.subr.mxu1 %v8796_v31  ;;  %v2135_v30 = vstv %s9322_s30  ;;  %11792 = vst [vmem:[#allocation267_spill] sm:$0xff] %v9357_v35  ;;  %s10307_s30 = sld [smem:[#allocation2 + $0x187]] }
 0x11d   : > { %1907 = vmatpush1.msra.mxu0 %v11787_v57  ;;  %2015 = vmatpush1.msra.mxu1 %v8840_v46  ;;  %v2133_v41 = vadd.f32 %v2132_v54, %v2129_v61  ;;  %v11793_v61 = vld [vmem:[#allocation8_spill] sm:$0xff]  ;;  %v11860_v46 = vld [vmem:[#allocation25_spill] sm:$0xff] }
 0x11e   : > { %1911 = vmatprep.subr.mxu0 %v11788_v17  ;;  %2017 = vmatprep.subr.mxu1 %v8852_v4  ;;  %v11802_v17 = vld [vmem:[#allocation35_spill] sm:$0xff]  ;;  %v11805_v57 = vld [vmem:[#allocation20_spill] sm:$0xff]  ;;  %v11858_v4 = vld [vmem:[#allocation21_spill] sm:$0xff] }
 0x11f   : > { %1915 = vmatpush1.msra.mxu0 %v11789_v22  ;;  %2019 = vmatpush1.msra.mxu1 %v8869_v43  ;;  %v2136_v22 = vmul.f32 %v9357_v35, %v2135_v30  ;;  %v2139_v30 = vstv %s7567_s5  ;;  %v11856_v43 = vld [vmem:[#allocation19_spill] sm:$0xff]  ;;  %s10341_s5 = sld [smem:[#allocation4 + $0x3]] }
 0x120   : > { %1919 = vmatprep.subr.mxu0 %v9083_v0  ;;  %2021 = vmatprep.subr.mxu1 %v8883_v59  ;;  %v11801_v0 = vld [vmem:[#allocation16_spill] sm:$0xff]  ;;  %v11852_v59 = vld [vmem:[#allocation15_spill] sm:$0xff] }
 0x121   : > { %1923 = vmatpush1.msra.mxu0 %v9095_v56  ;;  %2023 = vmatpush1.msra.mxu1 %v8897_v13  ;;  %v2137_v54 = vadd.f32 %v2136_v22, %v2133_v41  ;;  %v11798_v22 = vld [vmem:[#allocation13_spill] sm:$0xff]  ;;  %v11799_v41 = vld [vmem:[#allocation14_spill] sm:$0xff]  ;;  %v11849_v13 = vld [vmem:[#allocation107_spill] sm:$0xff] }
 0x122   : > { %1927 = vmatprep.subr.mxu0 %v9107_v62  ;;  %2025 = vmatprep.subr.mxu1 %v8909_v5  ;;  %v11797_v62 = vld [vmem:[#allocation12_spill] sm:$0xff]  ;;  %v11800_v56 = vld [vmem:[#allocation34_spill] sm:$0xff] }
 0x123   : > { %1931 = vmatpush1.msra.mxu0 %v11791_v14  ;;  %2027 = vmatpush1.msra.mxu1 %v8926_v40  ;;  %v11794_v14 = vld [vmem:[#allocation9_spill] sm:$0xff]  ;;  %v2140_v35 = vadd.f32 %v2139_v30, %v2137_v54  ;;  %v11803_v54 = vld [vmem:[#allocation18_spill] sm:$0xff] }
 0x124   : > { %1935 = vmatprep.subr.mxu0 %v9123_v49  ;;  %2029 = vmatprep.subr.mxu1 %v8937_v1  ;;  %v11795_v49 = vld [vmem:[#allocation10_spill] sm:$0xff]  ;;  %v11804_v30 = vld [vmem:[#allocation37_spill] sm:$0xff] }
 0x125   : > { %1939 = vmatpush1.msra.mxu0 %v9132_v20  ;;  %1972 = vmatprep.mubr.f32.mxu0 %v11561_v32  ;;  %v11796_v20 = vld [vmem:[#allocation11_spill] sm:$0xff]  ;;  %v2142_v33 = vmul.f32 0.1, %v2140_v35  ;;  %vm2141_vm1 = vcmp.gt.f32.partialorder %v2140_v35, 0.0  ;;  %v11846_v1 = vld [vmem:[#allocation117_spill] sm:$0xff]  ;;  %v11848_v5 = vld [vmem:[#allocation118_spill] sm:$0xff] }
 0x126   : > { %2031 = vmatpush1.msra.mxu1 %v8952_v37  ;;  %1974 = vmatmul.mubr.f32.vlgmr.msra.gmra.mxu0 %v8487_v39  ;;  %v11844_v37 = vld [vmem:[#allocation116_spill] sm:$0xff] }
 0x127   : > { %2033 = vmatprep.subr.mxu1 %v8982_v25  ;;  %2145 = vmatprep.subr.mxu0 %v11793_v61  ;;  %v11842_v25 = vld [vmem:[#allocation112_spill] sm:$0xff] }
 0x128   : > { %2035 = vmatpush1.msra.mxu1 %v8997_v45  ;;  %2147 = vmatpush1.msra.mxu0 %v11794_v14  ;;  %v11840_v45 = vld [vmem:[#allocation108_spill] sm:$0xff] }
 0x129   : > { %2037 = vmatprep.subr.mxu1 %v9012_v10  ;;  %2149 = vmatprep.subr.mxu0 %v11795_v49 }
 0x12a   : > { %2039 = vmatpush1.msra.mxu1 %v9029_v47  ;;  %2151 = vmatpush1.msra.mxu0 %v11796_v20  ;;  %v11838_v47 = vld [vmem:[#allocation102_spill] sm:$0xff] }
 0x12b   : > { %2041 = vmatprep.subr.mxu1 %v9038_v18  ;;  %2153 = vmatprep.subr.mxu0 %v11797_v62  ;;  %v11834_v18 = vld [vmem:[#allocation95_spill] sm:$0xff] }
 0x12c   : > { %2043 = vmatpush1.msra.mxu1 %v9050_v44  ;;  %2076 = vmatprep.mubr.f32.mxu1 %v11561_v32 }
 0x12d   : > { %2155 = vmatpush1.msra.mxu0 %v11798_v22  ;;  %2078 = vmatmul.mubr.f32.vlgmr.msra.gmra.mxu1 %v8487_v39  ;;  %v11808_v39 = vld [vmem:[#allocation40_spill] sm:$0xff] }
 0x12e   : > { %2157 = vmatprep.subr.mxu0 %v11799_v41  ;;  %2257 = vmatprep.subr.mxu1 %v11800_v56  ;;  %v2143_v56 = vsel %vm2141_vm1, %v2140_v35, %v2142_v33  ;;  %v11819_v33 = vld [vmem:[#allocation49_spill] sm:$0xff]  ;;  %v11820_v35 = vld [vmem:[#allocation66_spill] sm:$0xff] }
 0x12f   : > { %2159 = vmatpush1.msra.mxu0 %v11801_v0  ;;  %2263 = vmatpush1.msra.mxu1 %v11802_v17  ;;  %v11812_v17 = vld [vmem:[#allocation51_spill] sm:$0xff] }
 0x130   : > { %2161 = vmatprep.subr.mxu0 %v11803_v54  ;;  %2269 = vmatprep.subr.mxu1 %v11804_v30  ;;  %v11814_v30 = vld [vmem:[#allocation60_spill] sm:$0xff] }
 0x131   : > { %2163 = vmatpush1.msra.mxu0 %v11805_v57  ;;  %2275 = vmatpush1.msra.mxu1 %v11806_v28  ;;  %v9398_v28 = vand.u32 4294901760, %v2143_v56 }
 0x132   : > { %2165 = vmatprep.subr.mxu0 %v11807_v63  ;;  %2281 = vmatprep.subr.mxu1 %v11808_v39  ;;  %v11817_v39 = vld [vmem:[#allocation45_spill] sm:$0xff] }
 0x133   : > { %2167 = vmatpush1.msra.mxu0 %v11809_v23  ;;  %2287 = vmatpush1.msra.mxu1 %v11810_v24  ;;  %v11821_v24 = vld [vmem:[#allocation53_spill] sm:$0xff] }
 0x134   : > { %2169 = vmatprep.subr.mxu0 %v11811_v15  ;;  %2293 = vmatprep.subr.mxu1 %v11812_v17  ;;  %v11822_v17 = vld [vmem:[#allocation70_spill] sm:$0xff] }
 0x135   : > { %2171 = vmatpush1.msra.mxu0 %v11813_v36  ;;  %2299 = vmatpush1.msra.mxu1 %v11814_v30  ;;  %v9409_v30 = vsub.f32 %v2143_v56, %v9398_v28  ;;  %v11832_v56 = vld [vmem:[#allocation92_spill] sm:$0xff] }
 0x136   : > { %2173 = vmatprep.subr.mxu0 %v11815_v48  ;;  %2305 = vmatprep.subr.mxu1 %v11816_v3  ;;  %v11825_v3 = vld [vmem:[#allocation59_spill] sm:$0xff] }
 0x137   : > { %2175 = vmatpush1.msra.mxu0 %v11817_v39  ;;  %2311 = vmatpush1.msra.mxu1 %v11818_v19  ;;  %v11827_v19 = vld [vmem:[#allocation65_spill] sm:$0xff]  ;;  %v9420_v44 = vand.u32 4294901760, %v9409_v30 }
 0x138   : > { %2177 = vmatprep.subr.mxu0 %v11819_v33  ;;  %2317 = vmatprep.subr.mxu1 %v11820_v35  ;;  %v11829_v35 = vld [vmem:[#allocation69_spill] sm:$0xff] }
 0x139   : > { %2179 = vmatpush1.msra.mxu0 %v11821_v24  ;;  %2323 = vmatpush1.msra.mxu1 %v11822_v17  ;;  %v11831_v17 = vld [vmem:[#allocation72_spill] sm:$0xff]  ;;  %v2244_v10 = vsub.f32 %v9409_v30, %v9420_v44 }
 0x13a   : > { %2181 = vmatprep.subr.mxu0 %v11823_v26  ;;  %2329 = vmatprep.subr.mxu1 %v11824_v50  ;;  %v11833_v50 = vld [vmem:[#allocation75_spill] sm:$0xff] }
 0x13b   : > { %2183 = vmatpush1.msra.mxu0 %v11825_v3  ;;  %2335 = vmatpush1.msra.mxu1 %v11826_v8  ;;  %v11835_v8 = vld [vmem:[#allocation79_spill] sm:$0xff]  ;;  %v9440_v40 = vand.u32 4294901760, %v2244_v10  ;;  %v11855_v10 = vld [vmem:[#allocation132_spill] sm:$0xff] }
 0x13c   : > { %2185 = vmatprep.subr.mxu0 %v11827_v19  ;;  %2341 = vmatprep.subr.mxu1 %v11828_v11  ;;  %v11837_v11 = vld [vmem:[#allocation84_spill] sm:$0xff] }
 0x13d   : > { %2187 = vmatpush1.msra.mxu0 %v11829_v35  ;;  %2347 = vmatpush1.msra.mxu1 %v11830_v16  ;;  %v11839_v16 = vld [vmem:[#allocation88_spill] sm:$0xff] }
 0x13e   : > { %2189 = vmatprep.subr.mxu0 %v11831_v17  ;;  %2353 = vmatprep.subr.mxu1 %v11832_v56  ;;  %v11841_v56 = vld [vmem:[#allocation93_spill] sm:$0xff] }
 0x13f   : > { %2191 = vmatpush1.msra.mxu0 %v11833_v50  ;;  %2359 = vmatpush1.msra.mxu1 %v11834_v18  ;;  %v11843_v18 = vld [vmem:[#allocation97_spill] sm:$0xff] }
 0x140   : > { %2193 = vmatprep.subr.mxu0 %v11835_v8  ;;  %2365 = vmatprep.subr.mxu1 %v11836_v29  ;;  %v11845_v29 = vld [vmem:[#allocation101_spill] sm:$0xff] }
 0x141   : > { %2195 = vmatpush1.msra.mxu0 %v11837_v11  ;;  %2371 = vmatpush1.msra.mxu1 %v11838_v47  ;;  %v11847_v47 = vld [vmem:[#allocation104_spill] sm:$0xff] }
 0x142   : > { %2197 = vmatprep.subr.mxu0 %v11839_v16  ;;  %2377 = vmatprep.subr.mxu1 %v11840_v45  ;;  %v11850_v45 = vld [vmem:[#allocation119_spill] sm:$0xff] }
 0x143   : > { %2199 = vmatpush1.msra.mxu0 %v11841_v56  ;;  %2383 = vmatpush1.msra.mxu1 %v11842_v25  ;;  %v11851_v25 = vld [vmem:[#allocation120_spill] sm:$0xff] }
 0x144   : > { %2201 = vmatprep.subr.mxu0 %v11843_v18  ;;  %2389 = vmatprep.subr.mxu1 %v11844_v37  ;;  %v11853_v37 = vld [vmem:[#allocation131_spill] sm:$0xff] }
 0x145   : > { %2203 = vmatpush1.msra.mxu0 %v11845_v29  ;;  %2395 = vmatpush1.msra.mxu1 %v11846_v1  ;;  %v11854_v1 = vld [vmem:[#allocation17_spill] sm:$0xff] }
 0x146   : > { %2205 = vmatprep.subr.mxu0 %v11847_v47  ;;  %2401 = vmatprep.subr.mxu1 %v11848_v5  ;;  %v11857_v5 = vld [vmem:[#allocation133_spill] sm:$0xff] }
 0x147   : > { %2207 = vmatpush1.msra.mxu0 %v11849_v13  ;;  %2407 = vmatpush1.msra.mxu1 %v11850_v45  ;;  %v11859_v45 = vld [vmem:[#allocation134_spill] sm:$0xff] }
 0x148   : > { %2240 = vmatprep.mubr.f32.mxu0 %v11561_v32  ;;  %2413 = vmatprep.subr.mxu1 %v11851_v25  ;;  %v11861_v25 = vld [vmem:[#allocation135_spill] sm:$0xff] }
 0x149   : > { %2486 = vmatprep.subr.mxu0 %v11852_v59  ;;  %2246 = vmatmul.mubr.f32.vlgmr.msra.gmra.mxu0 %v9440_v40  ;;  %v11862_v59 = vld [vmem:[#allocation29_spill] sm:$0xff] }
 0x14a   : > { %2419 = vmatpush1.msra.mxu1 %v11853_v37  ;;  %2489 = vmatpush1.msra.mxu0 %v11854_v1  ;;  %v11863_v1 = vld [vmem:[#allocation33_spill] sm:$0xff]  ;;  %v11939_v37 = vld [vmem:[#allocation216_spill] sm:$0xff] }
 0x14b   : > { %2425 = vmatprep.subr.mxu1 %v11855_v10  ;;  %2492 = vmatprep.subr.mxu0 %v11856_v43  ;;  %v11864_v43 = vld [vmem:[#allocation41_spill] sm:$0xff] }
 0x14c   : > { %2431 = vmatpush1.msra.mxu1 %v11857_v5  ;;  %2495 = vmatpush1.msra.mxu0 %v11858_v4  ;;  %v11865_v4 = vld [vmem:[#allocation43_spill] sm:$0xff]  ;;  %v11935_v5 = vld [vmem:[#allocation209_spill] sm:$0xff] }
 0x14d   : > { %2437 = vmatprep.subr.mxu1 %v11859_v45  ;;  %2498 = vmatprep.subr.mxu0 %v11860_v46  ;;  %v11866_v46 = vld [vmem:[#allocation46_spill] sm:$0xff]  ;;  %v11937_v10 = vld [vmem:[#allocation213_spill] sm:$0xff] }
 0x14e   : > { %2443 = vmatpush1.msra.mxu1 %v11861_v25  ;;  %2476 = vmatprep.mubr.f32.mxu1 %v11561_v32  ;;  %v11867_v25 = vld [vmem:[#allocation50_spill] sm:$0xff] }
 0x14f   : > { %2501 = vmatpush1.msra.mxu0 %v11862_v59  ;;  %2478 = vmatmul.mubr.f32.vlgmr.msra.gmra.mxu1 %v9398_v28  ;;  %v11868_v59 = vld [vmem:[#allocation54_spill] sm:$0xff] }
 0x150   : > { %2504 = vmatprep.subr.mxu0 %v11863_v1  ;;  %2622 = vmatprep.subr.mxu1 %v11793_v61  ;;  %v11869_v1 = vld [vmem:[#allocation58_spill] sm:$0xff] }
 0x151   : > { %2507 = vmatpush1.msra.mxu0 %v11864_v43  ;;  %2624 = vmatpush1.msra.mxu1 %v11794_v14  ;;  %v11870_v43 = vld [vmem:[#allocation62_spill] sm:$0xff] }
 0x152   : > { %2510 = vmatprep.subr.mxu0 %v11865_v4  ;;  %2626 = vmatprep.subr.mxu1 %v11795_v49  ;;  %v11871_v4 = vld [vmem:[#allocation68_spill] sm:$0xff]  ;;  %v11933_v45 = vld [vmem:[#allocation206_spill] sm:$0xff] }
 0x153   : > { %2513 = vmatpush1.msra.mxu0 %v11866_v46  ;;  %2628 = vmatpush1.msra.mxu1 %v11796_v20  ;;  %v11872_v46 = vld [vmem:[#allocation71_spill] sm:$0xff] }
 0x154   : > { %2516 = vmatprep.subr.mxu0 %v11867_v25  ;;  %2630 = vmatprep.subr.mxu1 %v11797_v62  ;;  %v11873_v25 = vld [vmem:[#allocation74_spill] sm:$0xff] }
 0x155   : > { %2519 = vmatpush1.msra.mxu0 %v11868_v59  ;;  %2632 = vmatpush1.msra.mxu1 %v11798_v22  ;;  %v11874_v59 = vld [vmem:[#allocation78_spill] sm:$0xff] }
 0x156   : > { %2522 = vmatprep.subr.mxu0 %v11869_v1  ;;  %2634 = vmatprep.subr.mxu1 %v11799_v41  ;;  %v11875_v1 = vld [vmem:[#allocation82_spill] sm:$0xff] }
 0x157   : > { %2525 = vmatpush1.msra.mxu0 %v11870_v43  ;;  %2636 = vmatpush1.msra.mxu1 %v11801_v0  ;;  %v11876_v43 = vld [vmem:[#allocation85_spill] sm:$0xff] }
 0x158   : > { %2528 = vmatprep.subr.mxu0 %v11871_v4  ;;  %2638 = vmatprep.subr.mxu1 %v11803_v54  ;;  %v11877_v4 = vld [vmem:[#allocation91_spill] sm:$0xff] }
 0x159   : > { %2531 = vmatpush1.msra.mxu0 %v11872_v46  ;;  %2640 = vmatpush1.msra.mxu1 %v11805_v57  ;;  %v11878_v46 = vld [vmem:[#allocation94_spill] sm:$0xff] }
 0x15a   : > { %2534 = vmatprep.subr.mxu0 %v11873_v25  ;;  %2642 = vmatprep.subr.mxu1 %v11807_v63  ;;  %v11879_v25 = vld [vmem:[#allocation100_spill] sm:$0xff] }
 0x15b   : > { %2537 = vmatpush1.msra.mxu0 %v11874_v59  ;;  %2644 = vmatpush1.msra.mxu1 %v11809_v23  ;;  %v11880_v59 = vld [vmem:[#allocation103_spill] sm:$0xff] }
 0x15c   : > { %2540 = vmatprep.subr.mxu0 %v11875_v1  ;;  %2646 = vmatprep.subr.mxu1 %v11811_v15  ;;  %v11881_v1 = vld [vmem:[#allocation106_spill] sm:$0xff] }
 0x15d   : > { %2543 = vmatpush1.msra.mxu0 %v11876_v43  ;;  %2648 = vmatpush1.msra.mxu1 %v11813_v36  ;;  %v11882_v43 = vld [vmem:[#allocation110_spill] sm:$0xff] }
 0x15e   : > { %2546 = vmatprep.subr.mxu0 %v11877_v4  ;;  %2650 = vmatprep.subr.mxu1 %v11815_v48  ;;  %v11883_v4 = vld [vmem:[#allocation111_spill] sm:$0xff] }
 0x15f   : > { %2549 = vmatpush1.msra.mxu0 %v11878_v46  ;;  %2652 = vmatpush1.msra.mxu1 %v11817_v39  ;;  %v11884_v46 = vld [vmem:[#allocation121_spill] sm:$0xff] }
 0x160   : > { %2552 = vmatprep.subr.mxu0 %v11879_v25  ;;  %2654 = vmatprep.subr.mxu1 %v11819_v33  ;;  %v11885_v25 = vld [vmem:[#allocation122_spill] sm:$0xff] }
 0x161   : > { %2555 = vmatpush1.msra.mxu0 %v11880_v59  ;;  %2656 = vmatpush1.msra.mxu1 %v11821_v24  ;;  %v11886_v59 = vld [vmem:[#allocation123_spill] sm:$0xff] }
 0x162   : > { %2558 = vmatprep.subr.mxu0 %v11881_v1  ;;  %2658 = vmatprep.subr.mxu1 %v11823_v26  ;;  %v11887_v1 = vld [vmem:[#allocation124_spill] sm:$0xff] }
 0x163   : > { %2561 = vmatpush1.msra.mxu0 %v11882_v43  ;;  %2660 = vmatpush1.msra.mxu1 %v11825_v3  ;;  %v11888_v43 = vld [vmem:[#allocation125_spill] sm:$0xff] }
 0x164   : > { %2564 = vmatprep.subr.mxu0 %v11883_v4  ;;  %2662 = vmatprep.subr.mxu1 %v11827_v19  ;;  %v11899_v4 = vld [vmem:[#allocation55_spill] sm:$0xff] }
 0x165   : > { %2567 = vmatpush1.msra.mxu0 %v11884_v46  ;;  %2664 = vmatpush1.msra.mxu1 %v11829_v35  ;;  %v11893_v46 = vld [vmem:[#allocation30_spill] sm:$0xff] }
 0x166   : > { %2570 = vmatprep.subr.mxu0 %v11885_v25  ;;  %2666 = vmatprep.subr.mxu1 %v11831_v17  ;;  %v11889_v25 = vld [vmem:[#allocation22_spill] sm:$0xff] }
 0x167   : > { %2573 = vmatpush1.msra.mxu0 %v11886_v59  ;;  %2668 = vmatpush1.msra.mxu1 %v11833_v50  ;;  %v11890_v59 = vld [vmem:[#allocation23_spill] sm:$0xff] }
 0x168   : > { %2576 = vmatprep.subr.mxu0 %v11887_v1  ;;  %2670 = vmatprep.subr.mxu1 %v11835_v8  ;;  %v11891_v1 = vld [vmem:[#allocation26_spill] sm:$0xff] }
 0x169   : > { %2579 = vmatpush1.msra.mxu0 %v11888_v43  ;;  %2612 = vmatprep.mubr.f32.mxu0 %v11561_v32  ;;  %v11892_v43 = vld [vmem:[#allocation27_spill] sm:$0xff] }
 0x16a   : > { %2672 = vmatpush1.msra.mxu1 %v11837_v11  ;;  %2615 = vmatmul.mubr.f32.vlgmr.msra.gmra.mxu0 %v9409_v30 }
 0x16b   : > { %2674 = vmatprep.subr.mxu1 %v11839_v16  ;;  %2730 = vmatprep.subr.mxu0 %v11889_v25  ;;  %v11894_v25 = vld [vmem:[#allocation32_spill] sm:$0xff] }
 0x16c   : > { %2676 = vmatpush1.msra.mxu1 %v11841_v56  ;;  %2734 = vmatpush1.msra.mxu0 %v11890_v59  ;;  %v11895_v59 = vld [vmem:[#allocation39_spill] sm:$0xff] }
 0x16d   : > { %2678 = vmatprep.subr.mxu1 %v11843_v18  ;;  %2738 = vmatprep.subr.mxu0 %v11891_v1  ;;  %v11896_v1 = vld [vmem:[#allocation47_spill] sm:$0xff] }
 0x16e   : > { %2680 = vmatpush1.msra.mxu1 %v11845_v29  ;;  %2742 = vmatpush1.msra.mxu0 %v11892_v43  ;;  %v11897_v43 = vld [vmem:[#allocation48_spill] sm:$0xff] }
 0x16f   : > { %2682 = vmatprep.subr.mxu1 %v11847_v47  ;;  %2746 = vmatprep.subr.mxu0 %v11893_v46  ;;  %v11898_v46 = vld [vmem:[#allocation52_spill] sm:$0xff] }
 0x170   : > { %2684 = vmatpush1.msra.mxu1 %v11849_v13  ;;  %2717 = vmatprep.mubr.f32.mxu1 %v11561_v32 }
 0x171   : > { %2750 = vmatpush1.msra.mxu0 %v11894_v25  ;;  %2721 = vmatmul.mubr.f32.vlgmr.msra.gmra.mxu1 %v9420_v44  ;;  %v11900_v25 = vld [vmem:[#allocation57_spill] sm:$0xff] }
 0x172   : > { %2754 = vmatprep.subr.mxu0 %v11895_v59  ;;  %2896 = vmatprep.subr.mxu1 %v11793_v61  ;;  %v11901_v59 = vld [vmem:[#allocation64_spill] sm:$0xff] }
 0x173   : > { %2758 = vmatpush1.msra.mxu0 %v11896_v1  ;;  %2898 = vmatpush1.msra.mxu1 %v11794_v14  ;;  %v11902_v1 = vld [vmem:[#allocation67_spill] sm:$0xff] }
 0x174   : > { %2762 = vmatprep.subr.mxu0 %v11897_v43  ;;  %2900 = vmatprep.subr.mxu1 %v11795_v49  ;;  %v11903_v43 = vld [vmem:[#allocation73_spill] sm:$0xff] }
 0x175   : > { %2766 = vmatpush1.msra.mxu0 %v11898_v46  ;;  %2902 = vmatpush1.msra.mxu1 %v11796_v20  ;;  %v11904_v46 = vld [vmem:[#allocation77_spill] sm:$0xff] }
 0x176   : > { %2770 = vmatprep.subr.mxu0 %v11899_v4  ;;  %2904 = vmatprep.subr.mxu1 %v11797_v62  ;;  %v11905_v4 = vld [vmem:[#allocation81_spill] sm:$0xff] }
 0x177   : > { %2774 = vmatpush1.msra.mxu0 %v11900_v25  ;;  %2906 = vmatpush1.msra.mxu1 %v11798_v22  ;;  %v11906_v25 = vld [vmem:[#allocation83_spill] sm:$0xff] }
 0x178   : > { %2778 = vmatprep.subr.mxu0 %v11901_v59  ;;  %2908 = vmatprep.subr.mxu1 %v11799_v41  ;;  %v11907_v59 = vld [vmem:[#allocation87_spill] sm:$0xff] }
 0x179   : > { %2782 = vmatpush1.msra.mxu0 %v11902_v1  ;;  %2910 = vmatpush1.msra.mxu1 %v11801_v0  ;;  %v11908_v1 = vld [vmem:[#allocation90_spill] sm:$0xff] }
 0x17a   : > { %2786 = vmatprep.subr.mxu0 %v11903_v43  ;;  %2912 = vmatprep.subr.mxu1 %v11803_v54  ;;  %v11909_v43 = vld [vmem:[#allocation96_spill] sm:$0xff] }
 0x17b   : > { %2790 = vmatpush1.msra.mxu0 %v11904_v46  ;;  %2914 = vmatpush1.msra.mxu1 %v11805_v57  ;;  %v11910_v46 = vld [vmem:[#allocation99_spill] sm:$0xff] }
 0x17c   : > { %2794 = vmatprep.subr.mxu0 %v11905_v4  ;;  %2916 = vmatprep.subr.mxu1 %v11807_v63  ;;  %v11911_v4 = vld [vmem:[#allocation105_spill] sm:$0xff]  ;;  %v12008_v63 = vld [vmem:[#allocation166_spill] sm:$0xff] }
 0x17d   : > { %2798 = vmatpush1.msra.mxu0 %v11906_v25  ;;  %2918 = vmatpush1.msra.mxu1 %v11809_v23  ;;  %v11912_v25 = vld [vmem:[#allocation109_spill] sm:$0xff]  ;;  %v12007_v23 = vld [vmem:[#allocation163_spill] sm:$0xff] }
 0x17e   : > { %2802 = vmatprep.subr.mxu0 %v11907_v59  ;;  %2920 = vmatprep.subr.mxu1 %v11811_v15  ;;  %v11913_v59 = vld [vmem:[#allocation113_spill] sm:$0xff] }
 0x17f   : > { %2806 = vmatpush1.msra.mxu0 %v11908_v1  ;;  %2922 = vmatpush1.msra.mxu1 %v11813_v36  ;;  %v11914_v1 = vld [vmem:[#allocation114_spill] sm:$0xff] }
 0x180   : > { %2810 = vmatprep.subr.mxu0 %v11909_v43  ;;  %2924 = vmatprep.subr.mxu1 %v11815_v48  ;;  %v11915_v43 = vld [vmem:[#allocation115_spill] sm:$0xff]  ;;  %v12006_v36 = vld [vmem:[#allocation262_spill] sm:$0xff] }
 0x181   : > { %2814 = vmatpush1.msra.mxu0 %v11910_v46  ;;  %2926 = vmatpush1.msra.mxu1 %v11817_v39  ;;  %v11916_v46 = vld [vmem:[#allocation126_spill] sm:$0xff]  ;;  %v12005_v39 = vld [vmem:[#allocation136_spill] sm:$0xff] }
 0x182   : > { %2818 = vmatprep.subr.mxu0 %v11911_v4  ;;  %2928 = vmatprep.subr.mxu1 %v11819_v33  ;;  %v11917_v4 = vld [vmem:[#allocation127_spill] sm:$0xff]  ;;  %v12004_v33 = vld [vmem:[#allocation160_spill] sm:$0xff] }
 0x183   : > { %2822 = vmatpush1.msra.mxu0 %v11912_v25  ;;  %2930 = vmatpush1.msra.mxu1 %v11821_v24  ;;  %v11918_v25 = vld [vmem:[#allocation128_spill] sm:$0xff]  ;;  %v11971_v24 = vld [vmem:[#allocation151_spill] sm:$0xff] }
 0x184   : > { %2826 = vmatprep.subr.mxu0 %v11913_v59  ;;  %2932 = vmatprep.subr.mxu1 %v11823_v26  ;;  %v11919_v59 = vld [vmem:[#allocation129_spill] sm:$0xff]  ;;  %v11969_v26 = vld [vmem:[#allocation148_spill] sm:$0xff] }
 0x185   : > { %2830 = vmatpush1.msra.mxu0 %v11914_v1  ;;  %2934 = vmatpush1.msra.mxu1 %v11825_v3  ;;  %v11920_v1 = vld [vmem:[#allocation130_spill] sm:$0xff]  ;;  %v11967_v3 = vld [vmem:[#allocation147_spill] sm:$0xff] }
 0x186   : > { %2834 = vmatprep.subr.mxu0 %v11915_v43  ;;  %2936 = vmatprep.subr.mxu1 %v11827_v19  ;;  %v11926_v43 = vld [vmem:[#allocation184_spill] sm:$0xff]  ;;  %v11965_v19 = vld [vmem:[#allocation145_spill] sm:$0xff] }
 0x187   : > { %2838 = vmatpush1.msra.mxu0 %v11916_v46  ;;  %2938 = vmatpush1.msra.mxu1 %v11829_v35  ;;  %v11925_v46 = vld [vmem:[#allocation181_spill] sm:$0xff]  ;;  %v11961_v35 = vld [vmem:[#allocation255_spill] sm:$0xff] }
 0x188   : > { %2842 = vmatprep.subr.mxu0 %v11917_v4  ;;  %2940 = vmatprep.subr.mxu1 %v11831_v17  ;;  %v11924_v4 = vld [vmem:[#allocation178_spill] sm:$0xff]  ;;  %v11959_v17 = vld [vmem:[#allocation253_spill] sm:$0xff] }
 0x189   : > { %2846 = vmatpush1.msra.mxu0 %v11918_v25  ;;  %2942 = vmatpush1.msra.mxu1 %v11833_v50  ;;  %v11923_v25 = vld [vmem:[#allocation176_spill] sm:$0xff]  ;;  %v11957_v50 = vld [vmem:[#allocation251_spill] sm:$0xff] }
 0x18a   : > { %2850 = vmatprep.subr.mxu0 %v11919_v59  ;;  %2944 = vmatprep.subr.mxu1 %v11835_v8  ;;  %v11922_v59 = vld [vmem:[#allocation173_spill] sm:$0xff] }
 0x18b   : > { %2854 = vmatpush1.msra.mxu0 %v11920_v1  ;;  %2887 = vmatprep.mubr.f32.mxu0 %v11561_v32  ;;  %v11921_v1 = vld [vmem:[#allocation168_spill] sm:$0xff]  ;;  %v11955_v8 = vld [vmem:[#allocation249_spill] sm:$0xff] }
 0x18c   : > { %2946 = vmatpush1.msra.mxu1 %v11837_v11  ;;  %2889 = vmatmul.mubr.f32.vlgmr.msra.gmra.mxu0 %v9398_v28  ;;  %v11953_v11 = vld [vmem:[#allocation247_spill] sm:$0xff] }
 0x18d   : > { %2948 = vmatprep.subr.mxu1 %v11839_v16  ;;  %3000 = vmatprep.subr.mxu0 %v8592_v53  ;;  %v11951_v16 = vld [vmem:[#allocation244_spill] sm:$0xff] }
 0x18e   : > { %2950 = vmatpush1.msra.mxu1 %v11841_v56  ;;  %3002 = vmatpush1.msra.mxu0 %v8604_v55  ;;  %v11949_v56 = vld [vmem:[#allocation241_spill] sm:$0xff] }
 0x18f   : > { %2952 = vmatprep.subr.mxu1 %v11843_v18  ;;  %3004 = vmatprep.subr.mxu0 %v8611_v2  ;;  %v11947_v18 = vld [vmem:[#allocation239_spill] sm:$0xff] }
 0x190   : > { %2954 = vmatpush1.msra.mxu1 %v11845_v29  ;;  %3006 = vmatpush1.msra.mxu0 %v11737_v52  ;;  %v11945_v29 = vld [vmem:[#allocation236_spill] sm:$0xff] }
 0x191   : > { %2956 = vmatprep.subr.mxu1 %v11847_v47  ;;  %3008 = vmatprep.subr.mxu0 %v11739_v34  ;;  %v11943_v47 = vld [vmem:[#allocation227_spill] sm:$0xff] }
 0x192   : > { %2958 = vmatpush1.msra.mxu1 %v11849_v13  ;;  %2991 = vmatprep.mubr.f32.mxu1 %v11561_v32  ;;  %v11941_v13 = vld [vmem:[#allocation220_spill] sm:$0xff] }
 0x193   : > { %3010 = vmatpush1.msra.mxu0 %v11741_v9  ;;  %2993 = vmatmul.mubr.f32.vlgmr.msra.gmra.mxu1 %v9398_v28 }
 0x194   : > { %3012 = vmatprep.subr.mxu0 %v11743_v42  ;;  %3112 = vmatprep.subr.mxu1 %v11921_v1  ;;  %v11927_v1 = vld [vmem:[#allocation187_spill] sm:$0xff] }
 0x195   : > { %3014 = vmatpush1.msra.mxu0 %v11745_v51  ;;  %3118 = vmatpush1.msra.mxu1 %v11922_v59  ;;  %v11928_v59 = vld [vmem:[#allocation191_spill] sm:$0xff] }
 0x196   : > { %3016 = vmatprep.subr.mxu0 %v8665_v6  ;;  %3124 = vmatprep.subr.mxu1 %v11923_v25  ;;  %v11929_v25 = vld [vmem:[#allocation194_spill] sm:$0xff] }
 0x197   : > { %3018 = vmatpush1.msra.mxu0 %v11748_v38  ;;  %3130 = vmatpush1.msra.mxu1 %v11924_v4  ;;  %v11930_v4 = vld [vmem:[#allocation197_spill] sm:$0xff] }
 0x198   : > { %3020 = vmatprep.subr.mxu0 %v8704_v7  ;;  %3136 = vmatprep.subr.mxu1 %v11925_v46  ;;  %v11931_v46 = vld [vmem:[#allocation203_spill] sm:$0xff] }
 0x199   : > { %3022 = vmatpush1.msra.mxu0 %v8717_v58  ;;  %3142 = vmatpush1.msra.mxu1 %v11926_v43  ;;  %v11932_v43 = vld [vmem:[#allocation185_spill] sm:$0xff] }
 0x19a   : > { %3024 = vmatprep.subr.mxu0 %v8732_v21  ;;  %3148 = vmatprep.subr.mxu1 %v11927_v1  ;;  %v11934_v1 = vld [vmem:[#allocation188_spill] sm:$0xff] }
 0x19b   : > { %3026 = vmatpush1.msra.mxu0 %v8749_v12  ;;  %3154 = vmatpush1.msra.mxu1 %v11928_v59  ;;  %v11936_v59 = vld [vmem:[#allocation192_spill] sm:$0xff] }
 0x19c   : > { %3028 = vmatprep.subr.mxu0 %v8758_v60  ;;  %3160 = vmatprep.subr.mxu1 %v11929_v25  ;;  %v11938_v25 = vld [vmem:[#allocation195_spill] sm:$0xff] }
 0x19d   : > { %3030 = vmatpush1.msra.mxu0 %v8773_v27  ;;  %3166 = vmatpush1.msra.mxu1 %v11930_v4  ;;  %v11940_v4 = vld [vmem:[#allocation198_spill] sm:$0xff] }
 0x19e   : > { %3032 = vmatprep.subr.mxu0 %v8796_v31  ;;  %3172 = vmatprep.subr.mxu1 %v11931_v46  ;;  %v11942_v46 = vld [vmem:[#allocation200_spill] sm:$0xff] }
 0x19f   : > { %3034 = vmatpush1.msra.mxu0 %v11932_v43  ;;  %3178 = vmatpush1.msra.mxu1 %v11933_v45  ;;  %v11944_v45 = vld [vmem:[#allocation204_spill] sm:$0xff] }
 0x1a0   : > { %3036 = vmatprep.subr.mxu0 %v11934_v1  ;;  %3184 = vmatprep.subr.mxu1 %v11935_v5  ;;  %v11946_v5 = vld [vmem:[#allocation207_spill] sm:$0xff] }
 0x1a1   : > { %3038 = vmatpush1.msra.mxu0 %v11936_v59  ;;  %3190 = vmatpush1.msra.mxu1 %v11937_v10  ;;  %v11948_v10 = vld [vmem:[#allocation211_spill] sm:$0xff] }
 0x1a2   : > { %3040 = vmatprep.subr.mxu0 %v11938_v25  ;;  %3196 = vmatprep.subr.mxu1 %v11939_v37  ;;  %v11950_v37 = vld [vmem:[#allocation218_spill] sm:$0xff] }
 0x1a3   : > { %3042 = vmatpush1.msra.mxu0 %v11940_v4  ;;  %3202 = vmatpush1.msra.mxu1 %v11941_v13  ;;  %v11952_v13 = vld [vmem:[#allocation222_spill] sm:$0xff] }
 0x1a4   : > { %3044 = vmatprep.subr.mxu0 %v11942_v46  ;;  %3208 = vmatprep.subr.mxu1 %v11943_v47  ;;  %v11954_v47 = vld [vmem:[#allocation225_spill] sm:$0xff] }
 0x1a5   : > { %3046 = vmatpush1.msra.mxu0 %v11944_v45  ;;  %3214 = vmatpush1.msra.mxu1 %v11945_v29  ;;  %v11956_v29 = vld [vmem:[#allocation229_spill] sm:$0xff] }
 0x1a6   : > { %3048 = vmatprep.subr.mxu0 %v11946_v5  ;;  %3220 = vmatprep.subr.mxu1 %v11947_v18  ;;  %v11958_v18 = vld [vmem:[#allocation231_spill] sm:$0xff] }
 0x1a7   : > { %3050 = vmatpush1.msra.mxu0 %v11948_v10  ;;  %3226 = vmatpush1.msra.mxu1 %v11949_v56  ;;  %v11960_v56 = vld [vmem:[#allocation234_spill] sm:$0xff] }
 0x1a8   : > { %3052 = vmatprep.subr.mxu0 %v11950_v37  ;;  %3232 = vmatprep.subr.mxu1 %v11951_v16  ;;  %v11962_v16 = vld [vmem:[#allocation256_spill] sm:$0xff] }
 0x1a9   : > { %3054 = vmatpush1.msra.mxu0 %v11952_v13  ;;  %3238 = vmatpush1.msra.mxu1 %v11953_v11  ;;  %v11963_v11 = vld [vmem:[#allocation142_spill] sm:$0xff] }
 0x1aa   : > { %3056 = vmatprep.subr.mxu0 %v11954_v47  ;;  %3244 = vmatprep.subr.mxu1 %v11955_v8  ;;  %v11964_v8 = vld [vmem:[#allocation257_spill] sm:$0xff] }
 0x1ab   : > { %3058 = vmatpush1.msra.mxu0 %v11956_v29  ;;  %3250 = vmatpush1.msra.mxu1 %v11957_v50  ;;  %v11966_v50 = vld [vmem:[#allocation258_spill] sm:$0xff] }
 0x1ac   : > { %3060 = vmatprep.subr.mxu0 %v11958_v18  ;;  %3256 = vmatprep.subr.mxu1 %v11959_v17  ;;  %v11968_v17 = vld [vmem:[#allocation259_spill] sm:$0xff] }
 0x1ad   : > { %3062 = vmatpush1.msra.mxu0 %v11960_v56  ;;  %3262 = vmatpush1.msra.mxu1 %v11961_v35  ;;  %v11970_v35 = vld [vmem:[#allocation260_spill] sm:$0xff] }
 0x1ae   : > { %3095 = vmatprep.mubr.f32.mxu0 %v11561_v32  ;;  %3268 = vmatprep.subr.mxu1 %v11962_v16  ;;  %v11972_v16 = vld [vmem:[#allocation261_spill] sm:$0xff] }
 0x1af   : > { %3341 = vmatprep.subr.mxu0 %v11963_v11  ;;  %3101 = vmatmul.mubr.f32.vlgmr.msra.gmra.mxu0 %v9440_v40  ;;  %v11973_v40 = vld [vmem:[#allocation154_spill] sm:$0xff]  ;;  %v12002_v11 = vld [vmem:[#allocation155_spill] sm:$0xff] }
 0x1b0   : > { %3274 = vmatpush1.msra.mxu1 %v11964_v8  ;;  %3344 = vmatpush1.msra.mxu0 %v11965_v19  ;;  %v11974_v19 = vld [vmem:[#allocation157_spill] sm:$0xff] }
 0x1b1   : > { %3280 = vmatprep.subr.mxu1 %v11966_v50  ;;  %3347 = vmatprep.subr.mxu0 %v11967_v3  ;;  %v11975_v3 = vld [vmem:[#allocation159_spill] sm:$0xff]  ;;  %v3882_v50 = vstv %s9712_s7 }
 0x1b2   : > { %3286 = vmatpush1.msra.mxu1 %v11968_v17  ;;  %3350 = vmatpush1.msra.mxu0 %v11969_v26  ;;  %v11976_v26 = vld [vmem:[#allocation162_spill] sm:$0xff]  ;;  %v12000_v17 = vld [vmem:[#allocation149_spill] sm:$0xff]  ;;  %v3883_v15 = vmul.f32 %v12006_v36, %v3882_v50  ;;  %v12010_v36 = vld [vmem:[#allocation171_spill] sm:$0xff] }
 0x1b3   : > { %3292 = vmatprep.subr.mxu1 %v11970_v35  ;;  %3353 = vmatprep.subr.mxu0 %v11971_v24  ;;  %v11977_v24 = vld [vmem:[#allocation165_spill] sm:$0xff]  ;;  %v9720_v35 = vpop.f32.mrf.mxu1 }
 0x1b4   : > { %3298 = vmatpush1.msra.mxu1 %v11972_v16  ;;  %3331 = vmatprep.mubr.f32.mxu1 %v11561_v32  ;;  %v11978_v16 = vld [vmem:[#allocation170_spill] sm:$0xff] }
 0x1b5   : > { %3356 = vmatpush1.msra.mxu0 %v11973_v40  ;;  %3333 = vmatmul.mubr.f32.vlgmr.msra.gmra.mxu1 %v9398_v28  ;;  %v11979_v40 = vld [vmem:[#allocation172_spill] sm:$0xff] }
 0x1b6   : > { %3359 = vmatprep.subr.mxu0 %v11974_v19  ;;  %3477 = vmatprep.subr.mxu1 %v8592_v53  ;;  %v11980_v19 = vld [vmem:[#allocation175_spill] sm:$0xff] }
 0x1b7   : > { %3362 = vmatpush1.msra.mxu0 %v11975_v3  ;;  %3479 = vmatpush1.msra.mxu1 %v8604_v55  ;;  %v11981_v3 = vld [vmem:[#allocation177_spill] sm:$0xff] }
 0x1b8   : > { %3365 = vmatprep.subr.mxu0 %v11976_v26  ;;  %3481 = vmatprep.subr.mxu1 %v8611_v2  ;;  %v11982_v26 = vld [vmem:[#allocation180_spill] sm:$0xff] }
 0x1b9   : > { %3368 = vmatpush1.msra.mxu0 %v11977_v24  ;;  %3483 = vmatpush1.msra.mxu1 %v11737_v52  ;;  %v11983_v24 = vld [vmem:[#allocation183_spill] sm:$0xff] }
 0x1ba   : > { %3371 = vmatprep.subr.mxu0 %v11978_v16  ;;  %3485 = vmatprep.subr.mxu1 %v11739_v34  ;;  %v11984_v16 = vld [vmem:[#allocation190_spill] sm:$0xff] }
 0x1bb   : > { %3374 = vmatpush1.msra.mxu0 %v11979_v40  ;;  %3487 = vmatpush1.msra.mxu1 %v11741_v9  ;;  %v11985_v40 = vld [vmem:[#allocation199_spill] sm:$0xff] }
 0x1bc   : > { %3377 = vmatprep.subr.mxu0 %v11980_v19  ;;  %3489 = vmatprep.subr.mxu1 %v11743_v42  ;;  %v11986_v19 = vld [vmem:[#allocation202_spill] sm:$0xff] }
 0x1bd   : > { %3380 = vmatpush1.msra.mxu0 %v11981_v3  ;;  %3491 = vmatpush1.msra.mxu1 %v11745_v51  ;;  %v11987_v3 = vld [vmem:[#allocation205_spill] sm:$0xff] }
 0x1be   : > { %3383 = vmatprep.subr.mxu0 %v11982_v26  ;;  %3493 = vmatprep.subr.mxu1 %v8665_v6  ;;  %v11988_v26 = vld [vmem:[#allocation208_spill] sm:$0xff] }
 0x1bf   : > { %3386 = vmatpush1.msra.mxu0 %v11983_v24  ;;  %3495 = vmatpush1.msra.mxu1 %v11748_v38  ;;  %v11989_v24 = vld [vmem:[#allocation212_spill] sm:$0xff] }
 0x1c0   : > { %3389 = vmatprep.subr.mxu0 %v11984_v16  ;;  %3497 = vmatprep.subr.mxu1 %v8704_v7  ;;  %v11990_v16 = vld [vmem:[#allocation215_spill] sm:$0xff] }
 0x1c1   : > { %3392 = vmatpush1.msra.mxu0 %v11985_v40  ;;  %3499 = vmatpush1.msra.mxu1 %v8717_v58  ;;  %v11991_v40 = vld [vmem:[#allocation219_spill] sm:$0xff] }
 0x1c2   : > { %3395 = vmatprep.subr.mxu0 %v11986_v19  ;;  %3501 = vmatprep.subr.mxu1 %v8732_v21  ;;  %v11992_v19 = vld [vmem:[#allocation223_spill] sm:$0xff] }
 0x1c3   : > { %3398 = vmatpush1.msra.mxu0 %v11987_v3  ;;  %3503 = vmatpush1.msra.mxu1 %v8749_v12  ;;  %v11993_v3 = vld [vmem:[#allocation226_spill] sm:$0xff] }
 0x1c4   : > { %3401 = vmatprep.subr.mxu0 %v11988_v26  ;;  %3505 = vmatprep.subr.mxu1 %v8758_v60  ;;  %v9704_v26 = vpop.f32.mrf.mxu0 }
 0x1c5   : > { %3404 = vmatpush1.msra.mxu0 %v11989_v24  ;;  %3507 = vmatpush1.msra.mxu1 %v8773_v27  ;;  %v11994_v24 = vld [vmem:[#allocation232_spill] sm:$0xff] }
 0x1c6   : > { %3407 = vmatprep.subr.mxu0 %v11990_v16  ;;  %3509 = vmatprep.subr.mxu1 %v8796_v31  ;;  %v11995_v16 = vld [vmem:[#allocation235_spill] sm:$0xff] }
 0x1c7   : > { %3410 = vmatpush1.msra.mxu0 %v11991_v40  ;;  %3511 = vmatpush1.msra.mxu1 %v11932_v43  ;;  %v9718_v40 = vpop.f32.mrf.mxu0 }
 0x1c8   : > { %3413 = vmatprep.subr.mxu0 %v11992_v19  ;;  %3513 = vmatprep.subr.mxu1 %v11934_v1  ;;  %v11996_v19 = vld [vmem:[#allocation238_spill] sm:$0xff] }
 0x1c9   : > { %3416 = vmatpush1.msra.mxu0 %v11993_v3  ;;  %3515 = vmatpush1.msra.mxu1 %v11936_v59  ;;  %v11997_v3 = vld [vmem:[#allocation240_spill] sm:$0xff] }
 0x1ca   : > { %3419 = vmatprep.subr.mxu0 %v11994_v24  ;;  %3517 = vmatprep.subr.mxu1 %v11938_v25  ;;  %v11998_v24 = vld [vmem:[#allocation243_spill] sm:$0xff] }
 0x1cb   : > { %3422 = vmatpush1.msra.mxu0 %v11995_v16  ;;  %3519 = vmatpush1.msra.mxu1 %v11940_v4  ;;  %v11999_v16 = vld [vmem:[#allocation246_spill] sm:$0xff] }
 0x1cc   : > { %3425 = vmatprep.subr.mxu0 %v11996_v19  ;;  %3521 = vmatprep.subr.mxu1 %v11942_v46  ;;  %v9728_v19 = vpop.f32.mrf.mxu0 }
 0x1cd   : > { %3428 = vmatpush1.msra.mxu0 %v11997_v3  ;;  %3523 = vmatpush1.msra.mxu1 %v11944_v45  ;;  %v9734_v3 = vpop.f32.mrf.mxu1 }
 0x1ce   : > { %3431 = vmatprep.subr.mxu0 %v11998_v24  ;;  %3525 = vmatprep.subr.mxu1 %v11946_v5  ;;  %v12001_v24 = vld [vmem:[#allocation152_spill] sm:$0xff]  ;;  %v9744_v8 = vpop.f32.mrf.mxu0 }
 0x1cf   : > { %3434 = vmatpush1.msra.mxu0 %v11999_v16  ;;  %3467 = vmatprep.mubr.f32.mxu0 %v11561_v32  ;;  %v3879_v16 = vstv %s9708_s6 }
 0x1d0   : > { %3527 = vmatpush1.msra.mxu1 %v11948_v10  ;;  %3470 = vmatmul.mubr.f32.vlgmr.msra.gmra.mxu0 %v9409_v30  ;;  %v9746_v30 = vpop.f32.mrf.mxu1  ;;  %v3880_v48 = vmul.f32 %v12005_v39, %v3879_v16 }
 0x1d1   : > { %3529 = vmatprep.subr.mxu1 %v11950_v37  ;;  %3585 = vmatprep.subr.mxu0 %v12000_v17  ;;  %v12003_v17 = vld [vmem:[#allocation156_spill] sm:$0xff] }
 0x1d2   : > { %3531 = vmatpush1.msra.mxu1 %v11952_v13  ;;  %3589 = vmatpush1.msra.mxu0 %v12001_v24  ;;  %v9752_v24 = vpop.f32.mrf.mxu0  ;;  %v3884_v39 = vadd.f32 %v3883_v15, %v3880_v48  ;;  %v12016_v15 = vld [vmem:[#allocation263_spill] sm:$0xff] }
 0x1d3   : > { %3533 = vmatprep.subr.mxu1 %v11954_v47  ;;  %3593 = vmatprep.subr.mxu0 %v12002_v11  ;;  %v3886_v11 = vstv %s9726_s8 }
 0x1d4   : > { %3535 = vmatpush1.msra.mxu1 %v11956_v29  ;;  %3597 = vmatpush1.msra.mxu0 %v12003_v17  ;;  %v9763_v17 = vpop.f32.mrf.mxu1  ;;  %v9769_v16 = vpop.f32.mrf.mxu0 }
 0x1d5   : > { %3537 = vmatprep.subr.mxu1 %v11958_v18  ;;  %3601 = vmatprep.subr.mxu0 %v12004_v33  ;;  %v12009_v33 = vld [vmem:[#allocation169_spill] sm:$0xff] }
 0x1d6   : > { %3539 = vmatpush1.msra.mxu1 %v11960_v56  ;;  %3572 = vmatprep.mubr.f32.mxu1 %v11561_v32  ;;  %v9771_v50 = vpop.f32.mrf.mxu1 }
 0x1d7   : > { %3605 = vmatpush1.msra.mxu0 %v12007_v23  ;;  %3576 = vmatmul.mubr.f32.vlgmr.msra.gmra.mxu1 %v9420_v44  ;;  %v12011_v23 = vld [vmem:[#allocation137_spill] sm:$0xff]  ;;  %v12012_v44 = vld [vmem:[#allocation174_spill] sm:$0xff] }
 0x1d8   : > { %3609 = vmatprep.subr.mxu0 %v12008_v63  ;;  %3751 = vmatprep.subr.mxu1 %v8592_v53  ;;  %v3887_v57 = vmul.f32 %v12011_v23, %v3886_v11  ;;  %v3890_v63 = vstv %s9742_s9  ;;  %v12013_v53 = vld [vmem:[#allocation179_spill] sm:$0xff]  ;;  %v9785_v48 = vpop.f32.mrf.mxu1  ;;  %v12015_v23 = vld [vmem:[#allocation186_spill] sm:$0xff] }
 0x1d9   : > { %3613 = vmatpush1.msra.mxu0 %v12009_v33  ;;  %3753 = vmatpush1.msra.mxu1 %v8604_v55  ;;  %v1332_v33 = vpop.f32.mrf.mxu0  ;;  %v12014_v55 = vld [vmem:[#allocation182_spill] sm:$0xff] }
 0x1da   : > { %3617 = vmatprep.subr.mxu0 %v12010_v36  ;;  %3755 = vmatprep.subr.mxu1 %v8611_v2  ;;  %v3888_v11 = vadd.f32 %v3887_v57, %v3884_v39  ;;  %v12017_v36 = vld [vmem:[#allocation189_spill] sm:$0xff] }
 0x1db   : > { %3621 = vmatpush1.msra.mxu0 %v12012_v44  ;;  %3757 = vmatpush1.msra.mxu1 %v11737_v52  ;;  %v3891_v44 = vmul.f32 %v12016_v15, %v3890_v63  ;;  %v3894_v52 = vstv %s9761_s10  ;;  %v12020_v63 = vld [vmem:[#allocation201_spill] sm:$0xff]  ;;  %v12021_v15 = vld [vmem:[#allocation264_spill] sm:$0xff] }
 0x1dc   : > { %3625 = vmatprep.subr.mxu0 %v12013_v53  ;;  %3759 = vmatprep.subr.mxu1 %v11739_v34  ;;  %v1334_v53 = vpop.f32.mrf.mxu0  ;;  %v1564_v34 = vpop.f32.mrf.mxu1 }
 0x1dd   : > { %3629 = vmatpush1.msra.mxu0 %v12014_v55  ;;  %3761 = vmatpush1.msra.mxu1 %v11741_v9  ;;  %v12018_v55 = vld [vmem:[#allocation193_spill] sm:$0xff]  ;;  %v3892_v39 = vadd.f32 %v3891_v44, %v3888_v11  ;;  %v3898_v9 = vstv %s9779_s12 }
 0x1de   : > { %3633 = vmatprep.subr.mxu0 %v12015_v23  ;;  %3763 = vmatprep.subr.mxu1 %v11743_v42  ;;  %v12019_v23 = vld [vmem:[#allocation196_spill] sm:$0xff]  ;;  %v1701_v57 = vpop.f32.mrf.mxu0  ;;  %v12022_v42 = vld [vmem:[#allocation210_spill] sm:$0xff]  ;;  %v12024_v44 = vld [vmem:[#allocation217_spill] sm:$0xff] }
 0x1df   : > { %3637 = vmatpush1.msra.mxu0 %v12017_v36  ;;  %3765 = vmatpush1.msra.mxu1 %v11745_v51  ;;  %v3895_v36 = vmul.f32 %v12021_v15, %v3894_v52  ;;  %v710_v52 = vadd.f32 %v9720_v35, %v9704_v26  ;;  %v2093_v35 = vlaneseq }
 0x1e0   : > { %3641 = vmatprep.subr.mxu0 %v12018_v55  ;;  %3767 = vmatprep.subr.mxu1 %v8665_v6  ;;  %v1566_v55 = vpop.f32.mrf.mxu1  ;;  %v1703_v11 = vpop.f32.mrf.mxu0 }
 0x1e1   : > { %3645 = vmatpush1.msra.mxu0 %v12019_v23  ;;  %3769 = vmatpush1.msra.mxu1 %v11748_v38  ;;  %v12023_v23 = vld [vmem:[#allocation214_spill] sm:$0xff]  ;;  %v712_v38 = vadd.f32 %v9734_v3, %v9718_v40  ;;  %v12027_v3 = vld [vmem:[#allocation224_spill] sm:$0xff]  ;;  %v3902_v40 = vstv %s9793_s13 }
 0x1e2   : > { %3649 = vmatprep.subr.mxu0 %v12020_v63  ;;  %3771 = vmatprep.subr.mxu1 %v8704_v7  ;;  %v1807_v15 = vpop.f32.mrf.mxu1  ;;  %v3896_v63 = vadd.f32 %v3895_v36, %v3892_v39 }
 0x1e3   : > { %3653 = vmatpush1.msra.mxu0 %v12022_v42  ;;  %3773 = vmatpush1.msra.mxu1 %v8717_v58  ;;  %v12025_v42 = vld [vmem:[#allocation221_spill] sm:$0xff] }
 0x1e4   : > { %3657 = vmatprep.subr.mxu0 %v12023_v23  ;;  %3775 = vmatprep.subr.mxu1 %v8732_v21  ;;  %v12026_v58 = vld [vmem:[#allocation265_spill] sm:$0xff]  ;;  %v849_v23 = vadd.f32 %v9744_v8, %v712_v38  ;;  %v7721_v21 = vmov 1983009808   ;;  %v1567_v8 = vadd.f32 %v1566_v55, %v1334_v53  ;;  %v3906_v53 = vstv %s9805_s14 }
 0x1e5   : > { %3661 = vmatpush1.msra.mxu0 %v12024_v44  ;;  %3777 = vmatpush1.msra.mxu1 %v8749_v12  ;;  %v3899_v7 = vmul.f32 %v12026_v58, %v3898_v9  ;;  %v847_v44 = vadd.f32 %v9728_v19, %v710_v52  ;;  %v2091_v26 = vunpack.c.l.s4 %v7721_v21  ;;  %v12028_v12 = vld [vmem:[#allocation228_spill] sm:$0xff]  ;;  %v1565_v58 = vadd.f32 %v1564_v34, %v1332_v33  ;;  %v12029_v9 = vld [vmem:[#allocation230_spill] sm:$0xff]  ;;  %v1809_v19 = vpop.f32.mrf.mxu1  ;;  %v12030_v21 = vld [vmem:[#allocation233_spill] sm:$0xff] }
 0x1e6   : > { %3665 = vmatprep.subr.mxu0 %v12025_v42  ;;  %3779 = vmatprep.subr.mxu1 %v8758_v60  ;;  %v1975_v42 = vpop.f32.mrf.mxu0  ;;  %v955_v36 = vadd.f32 %v9763_v17, %v849_v23  ;;  %v12031_v52 = vld [vmem:[#allocation266_spill] sm:$0xff]  ;;  %v1704_v23 = vadd.f32 %v1703_v11, %v1567_v8  ;;  %v12032_v55 = vld [vmem:[#allocation237_spill] sm:$0xff] }
 0x1e7   : > { %3669 = vmatpush1.msra.mxu0 %v12027_v3  ;;  %3781 = vmatpush1.msra.mxu1 %v8773_v27  ;;  %v953_v38 = vadd.f32 %v9746_v30, %v847_v44  ;;  %v3900_v39 = vadd.f32 %v3899_v7, %v3896_v63  ;;  %v1702_v17 = vadd.f32 %v1701_v57, %v1565_v58  ;;  %v2092_v33 = vunpack.c.0.s8 %v2091_v26  ;;  %v12033_v44 = vld [vmem:[#allocation242_spill] sm:$0xff]  ;;  %v12034_v11 = vld [vmem:[#allocation245_spill] sm:$0xff] }
 0x1e8   : > { %3673 = vmatprep.subr.mxu0 %v12028_v12  ;;  %3783 = vmatprep.subr.mxu1 %v8796_v31  ;;  %v3903_v12 = vmul.f32 %v12031_v52, %v3902_v40  ;;  %v1123_v3 = vadd.f32 %v9769_v16, %v955_v36  ;;  %v2094_v30 = vshrl.u32 %v2093_v35, 7  ;;  %v1977_v7 = vpop.f32.mrf.mxu0  ;;  %v1810_v63 = vadd.f32 %v1809_v19, %v1704_v23  ;;  %v12036_v35 = vld [vmem:[#allocation267_spill] sm:$0xff]  ;;  %v12037_v8 = vld [vmem:[#allocation250_spill] sm:$0xff] }
 0x1e9   : > { %3677 = vmatpush1.msra.mxu0 %v12029_v9  ;;  %3785 = vmatpush1.msra.mxu1 %v11932_v43  ;;  %v1121_v34 = vadd.f32 %v9752_v24, %v953_v38  ;;  %v1808_v57 = vadd.f32 %v1807_v15, %v1702_v17  ;;  %v12035_v24 = vld [vmem:[#allocation248_spill] sm:$0xff]  ;;  %v3907_v36 = vmul.f32 %v12036_v35, %v3906_v53  ;;  %v3910_v23 = vstv %s9839_s18  ;;  %v12088_v9 = vld [vmem:[#allocation107_spill] sm:$0xff] }
 0x1ea   : > { %3681 = vmatprep.subr.mxu0 %v12030_v21  ;;  %3787 = vmatprep.subr.mxu1 %v11934_v1  ;;  %v1227_v16 = vadd.f32 %v9785_v48, %v1123_v3  ;;  %v3904_v26 = vadd.f32 %v3903_v12, %v3900_v39  ;;  %v1978_v15 = vadd.f32 %v1977_v7, %v1810_v63  ;;  %v12039_v38 = vld [vmem:[#allocation252_spill] sm:$0xff]  ;;  %v12040_v39 = vld [vmem:[#allocation254_spill] sm:$0xff]  ;;  %v12043_v63 = vld [vmem:[#allocation37_spill] sm:$0xff] }
 0x1eb   : > { %3685 = vmatpush1.msra.mxu0 %v12032_v55  ;;  %3789 = vmatpush1.msra.mxu1 %v11936_v59  ;;  %v1225_v58 = vadd.f32 %v9771_v50, %v1121_v34  ;;  %v1976_v48 = vadd.f32 %v1975_v42, %v1808_v57  ;;  %v9850_v3 = vsub.s32 %v2092_v33, %v2094_v30  ;;  %v12041_v7 = vld [vmem:[#allocation34_spill] sm:$0xff]  ;;  %v12042_v57 = vld [vmem:[#allocation35_spill] sm:$0xff]  ;;  %v12046_v35 = vld [vmem:[#allocation24_spill] sm:$0xff] }
 0x1ec   : > { %3689 = vmatprep.subr.mxu0 %v12033_v44  ;;  %3791 = vmatprep.subr.mxu1 %v11938_v25  ;;  %v3908_v17 = vadd.f32 %v3907_v36, %v3904_v26  ;;  %v12045_v26 = vld [vmem:[#allocation38_spill] sm:$0xff]  ;;  %v12048_v36 = vld [vmem:[#allocation28_spill] sm:$0xff]  ;;  %v12085_v44 = vld [vmem:[#allocation117_spill] sm:$0xff] }
 0x1ed   : > { %3693 = vmatpush1.msra.mxu0 %v12034_v11  ;;  %3793 = vmatpush1.msra.mxu1 %v11940_v4  ;;  %v2079_v40 = vpop.f32.mrf.mxu1  ;;  %12038 = vst [vmem:[#allocation8_spill] sm:$0xff] %v9850_v3  ;;  %v2088_v12 = vcombine.low %v1225_v58, %v1227_v16  ;;  %v12083_v11 = vld [vmem:[#allocation116_spill] sm:$0xff]  ;;  %v12087_v21 = vld [vmem:[#allocation118_spill] sm:$0xff] }
 0x1ee   : > { %3697 = vmatprep.subr.mxu0 %v12035_v24  ;;  %3795 = vmatprep.subr.mxu1 %v11942_v46  ;;  %v2080_v50 = vadd.f32 %v2079_v40, %v1976_v48  ;;  %v3911_v30 = vadd.f32 %v3910_v23, %v3908_v17  ;;  %v12044_v40 = vld [vmem:[#allocation20_spill] sm:$0xff]  ;;  %v12055_v17 = vld [vmem:[#allocation61_spill] sm:$0xff] }
 0x1ef   : > { %3701 = vmatpush1.msra.mxu0 %v12037_v8  ;;  %3797 = vmatpush1.msra.mxu1 %v11944_v45  ;;  %v2081_v19 = vpop.f32.mrf.mxu1  ;;  %v2096_v53 = vrot.slane %v2088_v12, %v9850_v3  ;;  %v12049_v48 = vld [vmem:[#allocation44_spill] sm:$0xff]  ;;  %v12056_v23 = vld [vmem:[#allocation45_spill] sm:$0xff] }
 0x1f0   : > { %3705 = vmatprep.subr.mxu0 %v12039_v38  ;;  %3799 = vmatprep.subr.mxu1 %v11946_v5  ;;  %v2082_v52 = vadd.f32 %v2081_v19, %v1978_v15  ;;  %v3913_v16 = vmul.f32 0.1, %v3911_v30  ;;  %vm3912_vm2 = vcmp.gt.f32.partialorder %v3911_v30, 0.0  ;;  %v12050_v15 = vld [vmem:[#allocation31_spill] sm:$0xff]  ;;  %v12052_v12 = vld [vmem:[#allocation36_spill] sm:$0xff] }
 0x1f1   : > { %3709 = vmatpush1.msra.mxu0 %v12040_v39  ;;  %3742 = vmatprep.mubr.f32.mxu0 %v11561_v32  ;;  %v12051_v19 = vld [vmem:[#allocation51_spill] sm:$0xff]  ;;  %v12077_v39 = vld [vmem:[#allocation102_spill] sm:$0xff]  ;;  %v12079_v8 = vld [vmem:[#allocation108_spill] sm:$0xff] }
 0x1f2   : > { %3801 = vmatpush1.msra.mxu1 %v11948_v10  ;;  %3744 = vmatmul.mubr.f32.vlgmr.msra.gmra.mxu0 %v9398_v28  ;;  %v2089_v42 = vcombine.low %v2080_v50, %v2082_v52  ;;  %v3914_v58 = vsel %vm3912_vm2, %v3911_v30, %v3913_v16  ;;  %v12053_v50 = vld [vmem:[#allocation60_spill] sm:$0xff]  ;;  %v12054_v52 = vld [vmem:[#allocation42_spill] sm:$0xff]  ;;  %v12060_v30 = vld [vmem:[#allocation53_spill] sm:$0xff] }
 0x1f3   : > { %3803 = vmatprep.subr.mxu1 %v11950_v37  ;;  %3916 = vmatprep.subr.mxu0 %v11793_v61  ;;  %v12061_v16 = vld [vmem:[#allocation70_spill] sm:$0xff]  ;;  %v12081_v24 = vld [vmem:[#allocation112_spill] sm:$0xff] }
 0x1f4   : > { %3805 = vmatpush1.msra.mxu1 %v11952_v13  ;;  %3918 = vmatpush1.msra.mxu0 %v11794_v14  ;;  %v2103_v34 = vrot.slane %v2089_v42, %v9850_v3  ;;  %v9900_v42 = vand.u32 4294901760, %v3914_v58  ;;  %v12075_v3 = vld [vmem:[#allocation98_spill] sm:$0xff] }
 0x1f5   : > { %3807 = vmatprep.subr.mxu1 %v11954_v47  ;;  %3920 = vmatprep.subr.mxu0 %v11795_v49  ;;  %v12099_v47 = vld [vmem:[#allocation25_spill] sm:$0xff] }
 0x1f6   : > { %3809 = vmatpush1.msra.mxu1 %v11956_v29  ;;  %3922 = vmatpush1.msra.mxu0 %v11796_v20  ;;  %v2104_v33 = vcombine.low %v2096_v53, %v2103_v34  ;;  %v12057_v53 = vld [vmem:[#allocation63_spill] sm:$0xff]  ;;  %v12058_v34 = vld [vmem:[#allocation49_spill] sm:$0xff] }
 0x1f7   : > { %3811 = vmatprep.subr.mxu1 %v11958_v18  ;;  %3924 = vmatprep.subr.mxu0 %v11797_v62  ;;  %v12095_v18 = vld [vmem:[#allocation19_spill] sm:$0xff]  ;;  %v12097_v29 = vld [vmem:[#allocation21_spill] sm:$0xff] }
 0x1f8   : > { %3813 = vmatpush1.msra.mxu1 %v11960_v56  ;;  %3846 = vmatprep.mubr.f32.mxu1 %v11561_v32  ;;  %2106 = vst [vmem:[%s9873_s22] sm:$0xff] %v2104_v33  ;;  %v12059_v33 = vld [vmem:[#allocation66_spill] sm:$0xff]  ;;  %v12091_v56 = vld [vmem:[#allocation15_spill] sm:$0xff] }
 0x1f9   : > { %3926 = vmatpush1.msra.mxu0 %v11798_v22  ;;  %3848 = vmatmul.mubr.f32.vlgmr.msra.gmra.mxu1 %v9398_v28  ;;  %v12047_v28 = vld [vmem:[#allocation40_spill] sm:$0xff] }
 0x1fa   : > { %3928 = vmatprep.subr.mxu0 %v11799_v41  ;;  %4028 = vmatprep.subr.mxu1 %v12041_v7  ;;  %v12073_v7 = vld [vmem:[#allocation95_spill] sm:$0xff] }
 0x1fb   : > { %3930 = vmatpush1.msra.mxu0 %v11801_v0  ;;  %4034 = vmatpush1.msra.mxu1 %v12042_v57 }
 0x1fc   : > { %3932 = vmatprep.subr.mxu0 %v11803_v54  ;;  %4040 = vmatprep.subr.mxu1 %v12043_v63  ;;  %v12069_v63 = vld [vmem:[#allocation89_spill] sm:$0xff] }
 0x1fd   : > { %3934 = vmatpush1.msra.mxu0 %v12044_v40  ;;  %4046 = vmatpush1.msra.mxu1 %v12045_v26  ;;  %v12067_v26 = vld [vmem:[#allocation86_spill] sm:$0xff] }
 0x1fe   : > { %3936 = vmatprep.subr.mxu0 %v12046_v35  ;;  %4052 = vmatprep.subr.mxu1 %v12047_v28  ;;  %v12065_v28 = vld [vmem:[#allocation80_spill] sm:$0xff] }
 0x1ff   : > { %3938 = vmatpush1.msra.mxu0 %v12048_v36  ;;  %4058 = vmatpush1.msra.mxu1 %v12049_v48  ;;  %v12063_v48 = vld [vmem:[#allocation76_spill] sm:$0xff] }
 0x200   : > { %3940 = vmatprep.subr.mxu0 %v12050_v15  ;;  %4064 = vmatprep.subr.mxu1 %v12051_v19  ;;  %v12062_v19 = vld [vmem:[#allocation56_spill] sm:$0xff] }
 0x201   : > { %3942 = vmatpush1.msra.mxu0 %v12052_v12  ;;  %4070 = vmatpush1.msra.mxu1 %v12053_v50  ;;  %v9911_v50 = vsub.f32 %v3914_v58, %v9900_v42  ;;  %v12071_v58 = vld [vmem:[#allocation92_spill] sm:$0xff] }
 0x202   : > { %3944 = vmatprep.subr.mxu0 %v12054_v52  ;;  %4076 = vmatprep.subr.mxu1 %v12055_v17  ;;  %v12064_v17 = vld [vmem:[#allocation59_spill] sm:$0xff] }
 0x203   : > { %3946 = vmatpush1.msra.mxu0 %v12056_v23  ;;  %4082 = vmatpush1.msra.mxu1 %v12057_v53  ;;  %v12066_v53 = vld [vmem:[#allocation65_spill] sm:$0xff]  ;;  %v9922_v57 = vand.u32 4294901760, %v9911_v50 }
 0x204   : > { %3948 = vmatprep.subr.mxu0 %v12058_v34  ;;  %4088 = vmatprep.subr.mxu1 %v12059_v33  ;;  %v12068_v33 = vld [vmem:[#allocation69_spill] sm:$0xff] }
 0x205   : > { %3950 = vmatpush1.msra.mxu0 %v12060_v30  ;;  %4094 = vmatpush1.msra.mxu1 %v12061_v16  ;;  %v12070_v16 = vld [vmem:[#allocation72_spill] sm:$0xff]  ;;  %v4015_v38 = vsub.f32 %v9911_v50, %v9922_v57 }
 0x206   : > { %3952 = vmatprep.subr.mxu0 %v12062_v19  ;;  %4100 = vmatprep.subr.mxu1 %v12063_v48  ;;  %v12072_v48 = vld [vmem:[#allocation75_spill] sm:$0xff] }
 0x207   : > { %3954 = vmatpush1.msra.mxu0 %v12064_v17  ;;  %4106 = vmatpush1.msra.mxu1 %v12065_v28  ;;  %v12074_v28 = vld [vmem:[#allocation79_spill] sm:$0xff]  ;;  %v9942_v55 = vand.u32 4294901760, %v4015_v38  ;;  %v12094_v38 = vld [vmem:[#allocation132_spill] sm:$0xff] }
 0x208   : > { %3956 = vmatprep.subr.mxu0 %v12066_v53  ;;  %4112 = vmatprep.subr.mxu1 %v12067_v26  ;;  %v12076_v26 = vld [vmem:[#allocation84_spill] sm:$0xff] }
 0x209   : > { %3958 = vmatpush1.msra.mxu0 %v12068_v33  ;;  %4118 = vmatpush1.msra.mxu1 %v12069_v63  ;;  %v12078_v63 = vld [vmem:[#allocation88_spill] sm:$0xff] }
 0x20a   : > { %3960 = vmatprep.subr.mxu0 %v12070_v16  ;;  %4124 = vmatprep.subr.mxu1 %v12071_v58  ;;  %v12080_v58 = vld [vmem:[#allocation93_spill] sm:$0xff] }
 0x20b   : > { %3962 = vmatpush1.msra.mxu0 %v12072_v48  ;;  %4130 = vmatpush1.msra.mxu1 %v12073_v7  ;;  %v12082_v7 = vld [vmem:[#allocation97_spill] sm:$0xff] }
 0x20c   : > { %3964 = vmatprep.subr.mxu0 %v12074_v28  ;;  %4136 = vmatprep.subr.mxu1 %v12075_v3  ;;  %v12084_v3 = vld [vmem:[#allocation101_spill] sm:$0xff] }
 0x20d   : > { %3966 = vmatpush1.msra.mxu0 %v12076_v26  ;;  %4142 = vmatpush1.msra.mxu1 %v12077_v39  ;;  %v12086_v39 = vld [vmem:[#allocation104_spill] sm:$0xff] }
 0x20e   : > { %3968 = vmatprep.subr.mxu0 %v12078_v63  ;;  %4148 = vmatprep.subr.mxu1 %v12079_v8  ;;  %v12089_v8 = vld [vmem:[#allocation119_spill] sm:$0xff] }
 0x20f   : > { %3970 = vmatpush1.msra.mxu0 %v12080_v58  ;;  %4154 = vmatpush1.msra.mxu1 %v12081_v24  ;;  %v12090_v24 = vld [vmem:[#allocation120_spill] sm:$0xff] }
 0x210   : > { %3972 = vmatprep.subr.mxu0 %v12082_v7  ;;  %4160 = vmatprep.subr.mxu1 %v12083_v11  ;;  %v12092_v11 = vld [vmem:[#allocation131_spill] sm:$0xff] }
 0x211   : > { %3974 = vmatpush1.msra.mxu0 %v12084_v3  ;;  %4166 = vmatpush1.msra.mxu1 %v12085_v44  ;;  %v12093_v44 = vld [vmem:[#allocation17_spill] sm:$0xff] }
 0x212   : > { %3976 = vmatprep.subr.mxu0 %v12086_v39  ;;  %4172 = vmatprep.subr.mxu1 %v12087_v21  ;;  %v12096_v21 = vld [vmem:[#allocation133_spill] sm:$0xff] }
 0x213   : > { %3978 = vmatpush1.msra.mxu0 %v12088_v9  ;;  %4178 = vmatpush1.msra.mxu1 %v12089_v8  ;;  %v12098_v8 = vld [vmem:[#allocation134_spill] sm:$0xff] }
 0x214   : > { %4011 = vmatprep.mubr.f32.mxu0 %v11561_v32  ;;  %4184 = vmatprep.subr.mxu1 %v12090_v24  ;;  %v12100_v24 = vld [vmem:[#allocation135_spill] sm:$0xff] }
 0x215   : > { %4257 = vmatprep.subr.mxu0 %v12091_v56  ;;  %4017 = vmatmul.mubr.f32.vlgmr.msra.gmra.mxu0 %v9942_v55  ;;  %v12101_v56 = vld [vmem:[#allocation29_spill] sm:$0xff] }
 0x216   : > { %4190 = vmatpush1.msra.mxu1 %v12092_v11  ;;  %4260 = vmatpush1.msra.mxu0 %v12093_v44  ;;  %v12102_v44 = vld [vmem:[#allocation33_spill] sm:$0xff] }
 0x217   : > { %4196 = vmatprep.subr.mxu1 %v12094_v38  ;;  %4263 = vmatprep.subr.mxu0 %v12095_v18  ;;  %v12103_v18 = vld [vmem:[#allocation41_spill] sm:$0xff]  ;;  %v12168_v38 = vld [vmem:[#allocation176_spill] sm:$0xff] }
 0x218   : > { %4202 = vmatpush1.msra.mxu1 %v12096_v21  ;;  %4266 = vmatpush1.msra.mxu0 %v12097_v29  ;;  %v12104_v29 = vld [vmem:[#allocation43_spill] sm:$0xff]  ;;  %v12167_v21 = vld [vmem:[#allocation173_spill] sm:$0xff] }
 0x219   : > { %4208 = vmatprep.subr.mxu1 %v12098_v8  ;;  %4269 = vmatprep.subr.mxu0 %v12099_v47  ;;  %v12105_v47 = vld [vmem:[#allocation46_spill] sm:$0xff]  ;;  %v12166_v8 = vld [vmem:[#allocation168_spill] sm:$0xff]  ;;  %v12169_v11 = vld [vmem:[#allocation153_spill] sm:$0xff] }
 0x21a   : > { %4214 = vmatpush1.msra.mxu1 %v12100_v24  ;;  %4247 = vmatprep.mubr.f32.mxu1 %v11561_v32  ;;  %v12106_v24 = vld [vmem:[#allocation50_spill] sm:$0xff] }
 0x21b   : > { %4272 = vmatpush1.msra.mxu0 %v12101_v56  ;;  %4249 = vmatmul.mubr.f32.vlgmr.msra.gmra.mxu1 %v9900_v42  ;;  %v12107_v56 = vld [vmem:[#allocation54_spill] sm:$0xff] }
 0x21c   : > { %4275 = vmatprep.subr.mxu0 %v12102_v44  ;;  %4393 = vmatprep.subr.mxu1 %v11793_v61  ;;  %v12108_v44 = vld [vmem:[#allocation58_spill] sm:$0xff] }
 0x21d   : > { %4278 = vmatpush1.msra.mxu0 %v12103_v18  ;;  %4395 = vmatpush1.msra.mxu1 %v11794_v14  ;;  %v12109_v18 = vld [vmem:[#allocation62_spill] sm:$0xff] }
 0x21e   : > { %4281 = vmatprep.subr.mxu0 %v12104_v29  ;;  %4397 = vmatprep.subr.mxu1 %v11795_v49  ;;  %v12110_v29 = vld [vmem:[#allocation68_spill] sm:$0xff] }
 0x21f   : > { %4284 = vmatpush1.msra.mxu0 %v12105_v47  ;;  %4399 = vmatpush1.msra.mxu1 %v11796_v20  ;;  %v12111_v47 = vld [vmem:[#allocation71_spill] sm:$0xff] }
 0x220   : > { %4287 = vmatprep.subr.mxu0 %v12106_v24  ;;  %4401 = vmatprep.subr.mxu1 %v11797_v62  ;;  %v12112_v24 = vld [vmem:[#allocation74_spill] sm:$0xff] }
 0x221   : > { %4290 = vmatpush1.msra.mxu0 %v12107_v56  ;;  %4403 = vmatpush1.msra.mxu1 %v11798_v22  ;;  %v12113_v56 = vld [vmem:[#allocation78_spill] sm:$0xff] }
 0x222   : > { %4293 = vmatprep.subr.mxu0 %v12108_v44  ;;  %4405 = vmatprep.subr.mxu1 %v11799_v41  ;;  %v12114_v44 = vld [vmem:[#allocation82_spill] sm:$0xff] }
 0x223   : > { %4296 = vmatpush1.msra.mxu0 %v12109_v18  ;;  %4407 = vmatpush1.msra.mxu1 %v11801_v0  ;;  %v12115_v18 = vld [vmem:[#allocation85_spill] sm:$0xff] }
 0x224   : > { %4299 = vmatprep.subr.mxu0 %v12110_v29  ;;  %4409 = vmatprep.subr.mxu1 %v11803_v54  ;;  %v12116_v29 = vld [vmem:[#allocation91_spill] sm:$0xff] }
 0x225   : > { %4302 = vmatpush1.msra.mxu0 %v12111_v47  ;;  %4411 = vmatpush1.msra.mxu1 %v12044_v40  ;;  %v12117_v47 = vld [vmem:[#allocation94_spill] sm:$0xff] }
 0x226   : > { %4305 = vmatprep.subr.mxu0 %v12112_v24  ;;  %4413 = vmatprep.subr.mxu1 %v12046_v35  ;;  %v12118_v24 = vld [vmem:[#allocation100_spill] sm:$0xff] }
 0x227   : > { %4308 = vmatpush1.msra.mxu0 %v12113_v56  ;;  %4415 = vmatpush1.msra.mxu1 %v12048_v36  ;;  %v12119_v56 = vld [vmem:[#allocation103_spill] sm:$0xff] }
 0x228   : > { %4311 = vmatprep.subr.mxu0 %v12114_v44  ;;  %4417 = vmatprep.subr.mxu1 %v12050_v15  ;;  %v12120_v44 = vld [vmem:[#allocation106_spill] sm:$0xff] }
 0x229   : > { %4314 = vmatpush1.msra.mxu0 %v12115_v18  ;;  %4419 = vmatpush1.msra.mxu1 %v12052_v12  ;;  %v12121_v18 = vld [vmem:[#allocation110_spill] sm:$0xff] }
 0x22a   : > { %4317 = vmatprep.subr.mxu0 %v12116_v29  ;;  %4421 = vmatprep.subr.mxu1 %v12054_v52  ;;  %v12122_v29 = vld [vmem:[#allocation111_spill] sm:$0xff] }
 0x22b   : > { %4320 = vmatpush1.msra.mxu0 %v12117_v47  ;;  %4423 = vmatpush1.msra.mxu1 %v12056_v23  ;;  %v12123_v47 = vld [vmem:[#allocation121_spill] sm:$0xff] }
 0x22c   : > { %4323 = vmatprep.subr.mxu0 %v12118_v24  ;;  %4425 = vmatprep.subr.mxu1 %v12058_v34  ;;  %v12124_v24 = vld [vmem:[#allocation122_spill] sm:$0xff] }
 0x22d   : > { %4326 = vmatpush1.msra.mxu0 %v12119_v56  ;;  %4427 = vmatpush1.msra.mxu1 %v12060_v30  ;;  %v12125_v56 = vld [vmem:[#allocation123_spill] sm:$0xff] }
 0x22e   : > { %4329 = vmatprep.subr.mxu0 %v12120_v44  ;;  %4429 = vmatprep.subr.mxu1 %v12062_v19  ;;  %v12126_v44 = vld [vmem:[#allocation124_spill] sm:$0xff] }
 0x22f   : > { %4332 = vmatpush1.msra.mxu0 %v12121_v18  ;;  %4431 = vmatpush1.msra.mxu1 %v12064_v17  ;;  %v12127_v18 = vld [vmem:[#allocation125_spill] sm:$0xff] }
 0x230   : > { %4335 = vmatprep.subr.mxu0 %v12122_v29  ;;  %4433 = vmatprep.subr.mxu1 %v12066_v53  ;;  %v12138_v29 = vld [vmem:[#allocation55_spill] sm:$0xff] }
 0x231   : > { %4338 = vmatpush1.msra.mxu0 %v12123_v47  ;;  %4435 = vmatpush1.msra.mxu1 %v12068_v33  ;;  %v12132_v47 = vld [vmem:[#allocation30_spill] sm:$0xff] }
 0x232   : > { %4341 = vmatprep.subr.mxu0 %v12124_v24  ;;  %4437 = vmatprep.subr.mxu1 %v12070_v16  ;;  %v12128_v24 = vld [vmem:[#allocation22_spill] sm:$0xff] }
 0x233   : > { %4344 = vmatpush1.msra.mxu0 %v12125_v56  ;;  %4439 = vmatpush1.msra.mxu1 %v12072_v48  ;;  %v12129_v56 = vld [vmem:[#allocation23_spill] sm:$0xff] }
 0x234   : > { %4347 = vmatprep.subr.mxu0 %v12126_v44  ;;  %4441 = vmatprep.subr.mxu1 %v12074_v28  ;;  %v12130_v44 = vld [vmem:[#allocation26_spill] sm:$0xff] }
 0x235   : > { %4350 = vmatpush1.msra.mxu0 %v12127_v18  ;;  %4383 = vmatprep.mubr.f32.mxu0 %v11561_v32  ;;  %v12131_v18 = vld [vmem:[#allocation27_spill] sm:$0xff] }
 0x236   : > { %4443 = vmatpush1.msra.mxu1 %v12076_v26  ;;  %4386 = vmatmul.mubr.f32.vlgmr.msra.gmra.mxu0 %v9911_v50 }
 0x237   : > { %4445 = vmatprep.subr.mxu1 %v12078_v63  ;;  %4501 = vmatprep.subr.mxu0 %v12128_v24  ;;  %v12133_v24 = vld [vmem:[#allocation32_spill] sm:$0xff] }
 0x238   : > { %4447 = vmatpush1.msra.mxu1 %v12080_v58  ;;  %4505 = vmatpush1.msra.mxu0 %v12129_v56  ;;  %v12134_v56 = vld [vmem:[#allocation39_spill] sm:$0xff] }
 0x239   : > { %4449 = vmatprep.subr.mxu1 %v12082_v7  ;;  %4509 = vmatprep.subr.mxu0 %v12130_v44  ;;  %v12135_v44 = vld [vmem:[#allocation47_spill] sm:$0xff] }
 0x23a   : > { %4451 = vmatpush1.msra.mxu1 %v12084_v3  ;;  %4513 = vmatpush1.msra.mxu0 %v12131_v18  ;;  %v12136_v18 = vld [vmem:[#allocation48_spill] sm:$0xff] }
 0x23b   : > { %4453 = vmatprep.subr.mxu1 %v12086_v39  ;;  %4517 = vmatprep.subr.mxu0 %v12132_v47  ;;  %v12137_v47 = vld [vmem:[#allocation52_spill] sm:$0xff] }
 0x23c   : > { %4455 = vmatpush1.msra.mxu1 %v12088_v9  ;;  %4488 = vmatprep.mubr.f32.mxu1 %v11561_v32 }
 0x23d   : > { %4521 = vmatpush1.msra.mxu0 %v12133_v24  ;;  %4492 = vmatmul.mubr.f32.vlgmr.msra.gmra.mxu1 %v9922_v57  ;;  %v12139_v24 = vld [vmem:[#allocation57_spill] sm:$0xff] }
 0x23e   : > { %4525 = vmatprep.subr.mxu0 %v12134_v56  ;;  %4667 = vmatprep.subr.mxu1 %v11793_v61  ;;  %v12140_v56 = vld [vmem:[#allocation64_spill] sm:$0xff] }
 0x23f   : > { %4529 = vmatpush1.msra.mxu0 %v12135_v44  ;;  %4669 = vmatpush1.msra.mxu1 %v11794_v14  ;;  %v12141_v44 = vld [vmem:[#allocation67_spill] sm:$0xff] }
 0x240   : > { %4533 = vmatprep.subr.mxu0 %v12136_v18  ;;  %4671 = vmatprep.subr.mxu1 %v11795_v49  ;;  %v12142_v18 = vld [vmem:[#allocation73_spill] sm:$0xff] }
 0x241   : > { %4537 = vmatpush1.msra.mxu0 %v12137_v47  ;;  %4673 = vmatpush1.msra.mxu1 %v11796_v20  ;;  %v12143_v47 = vld [vmem:[#allocation77_spill] sm:$0xff] }
 0x242   : > { %4541 = vmatprep.subr.mxu0 %v12138_v29  ;;  %4675 = vmatprep.subr.mxu1 %v11797_v62  ;;  %v12144_v29 = vld [vmem:[#allocation81_spill] sm:$0xff] }
 0x243   : > { %4545 = vmatpush1.msra.mxu0 %v12139_v24  ;;  %4677 = vmatpush1.msra.mxu1 %v11798_v22  ;;  %v12145_v24 = vld [vmem:[#allocation83_spill] sm:$0xff] }
 0x244   : > { %4549 = vmatprep.subr.mxu0 %v12140_v56  ;;  %4679 = vmatprep.subr.mxu1 %v11799_v41  ;;  %v12146_v56 = vld [vmem:[#allocation87_spill] sm:$0xff] }
 0x245   : > { %4553 = vmatpush1.msra.mxu0 %v12141_v44  ;;  %4681 = vmatpush1.msra.mxu1 %v11801_v0  ;;  %v12147_v44 = vld [vmem:[#allocation90_spill] sm:$0xff] }
 0x246   : > { %4557 = vmatprep.subr.mxu0 %v12142_v18  ;;  %4683 = vmatprep.subr.mxu1 %v11803_v54  ;;  %v12148_v18 = vld [vmem:[#allocation96_spill] sm:$0xff] }
 0x247   : > { %4561 = vmatpush1.msra.mxu0 %v12143_v47  ;;  %4685 = vmatpush1.msra.mxu1 %v12044_v40  ;;  %v12149_v47 = vld [vmem:[#allocation99_spill] sm:$0xff] }
 0x248   : > { %4565 = vmatprep.subr.mxu0 %v12144_v29  ;;  %4687 = vmatprep.subr.mxu1 %v12046_v35  ;;  %v12150_v29 = vld [vmem:[#allocation105_spill] sm:$0xff]  ;;  %v7650_v35 = vld [vmem:[%s8298_s11 + $0x4] sm:$0x3] }
 0x249   : > { %4569 = vmatpush1.msra.mxu0 %v12145_v24  ;;  %4689 = vmatpush1.msra.mxu1 %v12048_v36  ;;  %v12151_v24 = vld [vmem:[#allocation109_spill] sm:$0xff]  ;;  %v5657_v36 = vstv %s10228_s25 }
 0x24a   : > { %4573 = vmatprep.subr.mxu0 %v12146_v56  ;;  %4691 = vmatprep.subr.mxu1 %v12050_v15  ;;  %v12152_v56 = vld [vmem:[#allocation113_spill] sm:$0xff]  ;;  %v5658_v40 = vmul.f32 %v7650_v35, %v5657_v36  ;;  %v12251_v35 = vld [vmem:[#allocation186_spill] sm:$0xff] }
 0x24b   : > { %4577 = vmatpush1.msra.mxu0 %v12147_v44  ;;  %4693 = vmatpush1.msra.mxu1 %v12052_v12  ;;  %v12153_v44 = vld [vmem:[#allocation114_spill] sm:$0xff]  ;;  %v7649_v12 = vld [vmem:[%s8298_s11 + $0x2] sm:$0x3] }
 0x24c   : > { %4581 = vmatprep.subr.mxu0 %v12148_v18  ;;  %4695 = vmatprep.subr.mxu1 %v12054_v52  ;;  %v12154_v18 = vld [vmem:[#allocation115_spill] sm:$0xff] }
 0x24d   : > { %4585 = vmatpush1.msra.mxu0 %v12149_v47  ;;  %4697 = vmatpush1.msra.mxu1 %v12056_v23  ;;  %v12155_v47 = vld [vmem:[#allocation126_spill] sm:$0xff]  ;;  %v7648_v23 = vld [vmem:[%s8298_s11] sm:$0x3] }
 0x24e   : > { %4589 = vmatprep.subr.mxu0 %v12150_v29  ;;  %4699 = vmatprep.subr.mxu1 %v12058_v34  ;;  %v12156_v29 = vld [vmem:[#allocation127_spill] sm:$0xff]  ;;  %v12243_v34 = vld [vmem:[#allocation160_spill] sm:$0xff] }
 0x24f   : > { %4593 = vmatpush1.msra.mxu0 %v12151_v24  ;;  %4701 = vmatpush1.msra.mxu1 %v12060_v30  ;;  %v12157_v24 = vld [vmem:[#allocation128_spill] sm:$0xff]  ;;  %v12210_v30 = vld [vmem:[#allocation151_spill] sm:$0xff] }
 0x250   : > { %4597 = vmatprep.subr.mxu0 %v12152_v56  ;;  %4703 = vmatprep.subr.mxu1 %v12062_v19  ;;  %v12158_v56 = vld [vmem:[#allocation129_spill] sm:$0xff]  ;;  %v12208_v19 = vld [vmem:[#allocation148_spill] sm:$0xff] }
 0x251   : > { %4601 = vmatpush1.msra.mxu0 %v12153_v44  ;;  %4705 = vmatpush1.msra.mxu1 %v12064_v17  ;;  %v12159_v44 = vld [vmem:[#allocation130_spill] sm:$0xff]  ;;  %v12206_v17 = vld [vmem:[#allocation147_spill] sm:$0xff] }
 0x252   : > { %4605 = vmatprep.subr.mxu0 %v12154_v18  ;;  %4707 = vmatprep.subr.mxu1 %v12066_v53  ;;  %v12165_v18 = vld [vmem:[#allocation146_spill] sm:$0xff]  ;;  %v12204_v53 = vld [vmem:[#allocation145_spill] sm:$0xff] }
 0x253   : > { %4609 = vmatpush1.msra.mxu0 %v12155_v47  ;;  %4709 = vmatpush1.msra.mxu1 %v12068_v33  ;;  %v12164_v47 = vld [vmem:[#allocation144_spill] sm:$0xff]  ;;  %v12200_v33 = vld [vmem:[#allocation255_spill] sm:$0xff] }
 0x254   : > { %4613 = vmatprep.subr.mxu0 %v12156_v29  ;;  %4711 = vmatprep.subr.mxu1 %v12070_v16  ;;  %v12160_v29 = vld [vmem:[#allocation138_spill] sm:$0xff]  ;;  %v12198_v16 = vld [vmem:[#allocation253_spill] sm:$0xff] }
 0x255   : > { %4617 = vmatpush1.msra.mxu0 %v12157_v24  ;;  %4713 = vmatpush1.msra.mxu1 %v12072_v48  ;;  %v12161_v24 = vld [vmem:[#allocation139_spill] sm:$0xff] }
 0x256   : > { %4621 = vmatprep.subr.mxu0 %v12158_v56  ;;  %4715 = vmatprep.subr.mxu1 %v12074_v28  ;;  %v12163_v56 = vld [vmem:[#allocation143_spill] sm:$0xff]  ;;  %v12194_v28 = vld [vmem:[#allocation249_spill] sm:$0xff] }
 0x257   : > { %4625 = vmatpush1.msra.mxu0 %v12159_v44  ;;  %4658 = vmatprep.mubr.f32.mxu0 %v11561_v32  ;;  %v12162_v44 = vld [vmem:[#allocation141_spill] sm:$0xff]  ;;  %v12196_v48 = vld [vmem:[#allocation251_spill] sm:$0xff] }
 0x258   : > { %4717 = vmatpush1.msra.mxu1 %v12076_v26  ;;  %4660 = vmatmul.mubr.f32.vlgmr.msra.gmra.mxu0 %v9900_v42  ;;  %v12178_v26 = vld [vmem:[#allocation191_spill] sm:$0xff] }
 0x259   : > { %4719 = vmatprep.subr.mxu1 %v12078_v63  ;;  %4771 = vmatprep.subr.mxu0 %v12160_v29  ;;  %v12176_v63 = vld [vmem:[#allocation187_spill] sm:$0xff] }
 0x25a   : > { %4721 = vmatpush1.msra.mxu1 %v12080_v58  ;;  %4773 = vmatpush1.msra.mxu0 %v12161_v24  ;;  %v12174_v58 = vld [vmem:[#allocation184_spill] sm:$0xff] }
 0x25b   : > { %4723 = vmatprep.subr.mxu1 %v12082_v7  ;;  %4775 = vmatprep.subr.mxu0 %v8611_v2  ;;  %v12173_v7 = vld [vmem:[#allocation161_spill] sm:$0xff] }
 0x25c   : > { %4725 = vmatpush1.msra.mxu1 %v12084_v3  ;;  %4777 = vmatpush1.msra.mxu0 %v12162_v44  ;;  %v12172_v3 = vld [vmem:[#allocation181_spill] sm:$0xff] }
 0x25d   : > { %4727 = vmatprep.subr.mxu1 %v12086_v39  ;;  %4779 = vmatprep.subr.mxu0 %v12163_v56  ;;  %v12171_v39 = vld [vmem:[#allocation158_spill] sm:$0xff] }
 0x25e   : > { %4729 = vmatpush1.msra.mxu1 %v12088_v9  ;;  %4762 = vmatprep.mubr.f32.mxu1 %v11561_v32  ;;  %v12170_v9 = vld [vmem:[#allocation178_spill] sm:$0xff] }
 0x25f   : > { %4781 = vmatpush1.msra.mxu0 %v12164_v47  ;;  %4764 = vmatmul.mubr.f32.vlgmr.msra.gmra.mxu1 %v9900_v42 }
 0x260   : > { %4783 = vmatprep.subr.mxu0 %v12165_v18  ;;  %4883 = vmatprep.subr.mxu1 %v12166_v8  ;;  %v12175_v8 = vld [vmem:[#allocation164_spill] sm:$0xff] }
 0x261   : > { %4785 = vmatpush1.msra.mxu0 %v11745_v51  ;;  %4889 = vmatpush1.msra.mxu1 %v12167_v21  ;;  %v12177_v21 = vld [vmem:[#allocation167_spill] sm:$0xff] }
 0x262   : > { %4787 = vmatprep.subr.mxu0 %v8665_v6  ;;  %4895 = vmatprep.subr.mxu1 %v12168_v38  ;;  %v12179_v38 = vld [vmem:[#allocation194_spill] sm:$0xff] }
 0x263   : > { %4789 = vmatpush1.msra.mxu0 %v12169_v11  ;;  %4901 = vmatpush1.msra.mxu1 %v12170_v9  ;;  %v12180_v9 = vld [vmem:[#allocation197_spill] sm:$0xff] }
 0x264   : > { %4791 = vmatprep.subr.mxu0 %v12171_v39  ;;  %4907 = vmatprep.subr.mxu1 %v12172_v3  ;;  %v12181_v3 = vld [vmem:[#allocation203_spill] sm:$0xff] }
 0x265   : > { %4793 = vmatpush1.msra.mxu0 %v12173_v7  ;;  %4913 = vmatpush1.msra.mxu1 %v12174_v58  ;;  %v12182_v58 = vld [vmem:[#allocation206_spill] sm:$0xff] }
 0x266   : > { %4795 = vmatprep.subr.mxu0 %v12175_v8  ;;  %4919 = vmatprep.subr.mxu1 %v12176_v63  ;;  %v12183_v63 = vld [vmem:[#allocation209_spill] sm:$0xff] }
 0x267   : > { %4797 = vmatpush1.msra.mxu0 %v12177_v21  ;;  %4925 = vmatpush1.msra.mxu1 %v12178_v26  ;;  %v12184_v26 = vld [vmem:[#allocation213_spill] sm:$0xff] }
 0x268   : > { %4799 = vmatprep.subr.mxu0 %v8758_v60  ;;  %4931 = vmatprep.subr.mxu1 %v12179_v38  ;;  %v12185_v38 = vld [vmem:[#allocation216_spill] sm:$0xff] }
 0x269   : > { %4801 = vmatpush1.msra.mxu0 %v8773_v27  ;;  %4937 = vmatpush1.msra.mxu1 %v12180_v9  ;;  %v12186_v9 = vld [vmem:[#allocation220_spill] sm:$0xff] }
 0x26a   : > { %4803 = vmatprep.subr.mxu0 %v8796_v31  ;;  %4943 = vmatprep.subr.mxu1 %v12181_v3  ;;  %v12187_v3 = vld [vmem:[#allocation227_spill] sm:$0xff] }
 0x26b   : > { %4805 = vmatpush1.msra.mxu0 %v11932_v43  ;;  %4949 = vmatpush1.msra.mxu1 %v12182_v58  ;;  %v12188_v58 = vld [vmem:[#allocation236_spill] sm:$0xff] }
 0x26c   : > { %4807 = vmatprep.subr.mxu0 %v11934_v1  ;;  %4955 = vmatprep.subr.mxu1 %v12183_v63  ;;  %v12189_v63 = vld [vmem:[#allocation239_spill] sm:$0xff] }
 0x26d   : > { %4809 = vmatpush1.msra.mxu0 %v11936_v59  ;;  %4961 = vmatpush1.msra.mxu1 %v12184_v26  ;;  %v12190_v26 = vld [vmem:[#allocation241_spill] sm:$0xff] }
 0x26e   : > { %4811 = vmatprep.subr.mxu0 %v11938_v25  ;;  %4967 = vmatprep.subr.mxu1 %v12185_v38  ;;  %v12191_v38 = vld [vmem:[#allocation244_spill] sm:$0xff] }
 0x26f   : > { %4813 = vmatpush1.msra.mxu0 %v11940_v4  ;;  %4973 = vmatpush1.msra.mxu1 %v12186_v9  ;;  %v12192_v9 = vld [vmem:[#allocation247_spill] sm:$0xff] }
 0x270   : > { %4815 = vmatprep.subr.mxu0 %v11942_v46  ;;  %4979 = vmatprep.subr.mxu1 %v12187_v3  ;;  %v12193_v3 = vld [vmem:[#allocation225_spill] sm:$0xff] }
 0x271   : > { %4817 = vmatpush1.msra.mxu0 %v11944_v45  ;;  %4985 = vmatpush1.msra.mxu1 %v12188_v58  ;;  %v12195_v58 = vld [vmem:[#allocation229_spill] sm:$0xff] }
 0x272   : > { %4819 = vmatprep.subr.mxu0 %v11946_v5  ;;  %4991 = vmatprep.subr.mxu1 %v12189_v63  ;;  %v12197_v63 = vld [vmem:[#allocation231_spill] sm:$0xff] }
 0x273   : > { %4821 = vmatpush1.msra.mxu0 %v11948_v10  ;;  %4997 = vmatpush1.msra.mxu1 %v12190_v26  ;;  %v12199_v26 = vld [vmem:[#allocation234_spill] sm:$0xff] }
 0x274   : > { %4823 = vmatprep.subr.mxu0 %v11950_v37  ;;  %5003 = vmatprep.subr.mxu1 %v12191_v38  ;;  %v12201_v38 = vld [vmem:[#allocation256_spill] sm:$0xff] }
 0x275   : > { %4825 = vmatpush1.msra.mxu0 %v11952_v13  ;;  %5009 = vmatpush1.msra.mxu1 %v12192_v9  ;;  %v12202_v9 = vld [vmem:[#allocation142_spill] sm:$0xff] }
 0x276   : > { %4827 = vmatprep.subr.mxu0 %v12193_v3  ;;  %5015 = vmatprep.subr.mxu1 %v12194_v28  ;;  %v12203_v28 = vld [vmem:[#allocation257_spill] sm:$0xff] }
 0x277   : > { %4829 = vmatpush1.msra.mxu0 %v12195_v58  ;;  %5021 = vmatpush1.msra.mxu1 %v12196_v48  ;;  %v12205_v48 = vld [vmem:[#allocation258_spill] sm:$0xff] }
 0x278   : > { %4831 = vmatprep.subr.mxu0 %v12197_v63  ;;  %5027 = vmatprep.subr.mxu1 %v12198_v16  ;;  %v12207_v16 = vld [vmem:[#allocation259_spill] sm:$0xff] }
 0x279   : > { %4833 = vmatpush1.msra.mxu0 %v12199_v26  ;;  %5033 = vmatpush1.msra.mxu1 %v12200_v33  ;;  %v12209_v33 = vld [vmem:[#allocation260_spill] sm:$0xff] }
 0x27a   : > { %4866 = vmatprep.mubr.f32.mxu0 %v11561_v32  ;;  %5039 = vmatprep.subr.mxu1 %v12201_v38  ;;  %v12211_v38 = vld [vmem:[#allocation261_spill] sm:$0xff] }
 0x27b   : > { %5112 = vmatprep.subr.mxu0 %v12202_v9  ;;  %4872 = vmatmul.mubr.f32.vlgmr.msra.gmra.mxu0 %v9942_v55  ;;  %v12212_v55 = vld [vmem:[#allocation154_spill] sm:$0xff]  ;;  %v12241_v9 = vld [vmem:[#allocation155_spill] sm:$0xff] }
 0x27c   : > { %5045 = vmatpush1.msra.mxu1 %v12203_v28  ;;  %5115 = vmatpush1.msra.mxu0 %v12204_v53  ;;  %v12213_v53 = vld [vmem:[#allocation157_spill] sm:$0xff] }
 0x27d   : > { %5051 = vmatprep.subr.mxu1 %v12205_v48  ;;  %5118 = vmatprep.subr.mxu0 %v12206_v17  ;;  %v12214_v17 = vld [vmem:[#allocation159_spill] sm:$0xff]  ;;  %v5653_v48 = vstv %s10214_s24 }
 0x27e   : > { %5057 = vmatpush1.msra.mxu1 %v12207_v16  ;;  %5121 = vmatpush1.msra.mxu0 %v12208_v19  ;;  %v12215_v19 = vld [vmem:[#allocation162_spill] sm:$0xff]  ;;  %v12239_v16 = vld [vmem:[#allocation149_spill] sm:$0xff]  ;;  %v5654_v15 = vmul.f32 %v7649_v12, %v5653_v48  ;;  %v12247_v12 = vld [vmem:[#allocation171_spill] sm:$0xff] }
 0x27f   : > { %5063 = vmatprep.subr.mxu1 %v12209_v33  ;;  %5124 = vmatprep.subr.mxu0 %v12210_v30  ;;  %v12216_v30 = vld [vmem:[#allocation165_spill] sm:$0xff]  ;;  %v10222_v33 = vpop.f32.mrf.mxu1 }
 0x280   : > { %5069 = vmatpush1.msra.mxu1 %v12211_v38  ;;  %5102 = vmatprep.mubr.f32.mxu1 %v11561_v32  ;;  %v12217_v38 = vld [vmem:[#allocation170_spill] sm:$0xff] }
 0x281   : > { %5127 = vmatpush1.msra.mxu0 %v12212_v55  ;;  %5104 = vmatmul.mubr.f32.vlgmr.msra.gmra.mxu1 %v9900_v42  ;;  %v12218_v55 = vld [vmem:[#allocation172_spill] sm:$0xff] }
 0x282   : > { %5130 = vmatprep.subr.mxu0 %v12213_v53  ;;  %5248 = vmatprep.subr.mxu1 %v12160_v29  ;;  %v12219_v53 = vld [vmem:[#allocation175_spill] sm:$0xff] }
 0x283   : > { %5133 = vmatpush1.msra.mxu0 %v12214_v17  ;;  %5250 = vmatpush1.msra.mxu1 %v12161_v24  ;;  %v12220_v17 = vld [vmem:[#allocation177_spill] sm:$0xff] }
 0x284   : > { %5136 = vmatprep.subr.mxu0 %v12215_v19  ;;  %5252 = vmatprep.subr.mxu1 %v8611_v2  ;;  %v12221_v19 = vld [vmem:[#allocation180_spill] sm:$0xff] }
 0x285   : > { %5139 = vmatpush1.msra.mxu0 %v12216_v30  ;;  %5254 = vmatpush1.msra.mxu1 %v12162_v44  ;;  %v12222_v30 = vld [vmem:[#allocation183_spill] sm:$0xff] }
 0x286   : > { %5142 = vmatprep.subr.mxu0 %v12217_v38  ;;  %5256 = vmatprep.subr.mxu1 %v12163_v56  ;;  %v12223_v38 = vld [vmem:[#allocation190_spill] sm:$0xff] }
 0x287   : > { %5145 = vmatpush1.msra.mxu0 %v12218_v55  ;;  %5258 = vmatpush1.msra.mxu1 %v12164_v47  ;;  %v12224_v55 = vld [vmem:[#allocation199_spill] sm:$0xff] }
 0x288   : > { %5148 = vmatprep.subr.mxu0 %v12219_v53  ;;  %5260 = vmatprep.subr.mxu1 %v12165_v18  ;;  %v12225_v53 = vld [vmem:[#allocation202_spill] sm:$0xff] }
 0x289   : > { %5151 = vmatpush1.msra.mxu0 %v12220_v17  ;;  %5262 = vmatpush1.msra.mxu1 %v11745_v51  ;;  %v12226_v17 = vld [vmem:[#allocation205_spill] sm:$0xff] }
 0x28a   : > { %5154 = vmatprep.subr.mxu0 %v12221_v19  ;;  %5264 = vmatprep.subr.mxu1 %v8665_v6  ;;  %v12227_v19 = vld [vmem:[#allocation208_spill] sm:$0xff] }
 0x28b   : > { %5157 = vmatpush1.msra.mxu0 %v12222_v30  ;;  %5266 = vmatpush1.msra.mxu1 %v12169_v11  ;;  %v12228_v30 = vld [vmem:[#allocation212_spill] sm:$0xff] }
 0x28c   : > { %5160 = vmatprep.subr.mxu0 %v12223_v38  ;;  %5268 = vmatprep.subr.mxu1 %v12171_v39  ;;  %v12229_v38 = vld [vmem:[#allocation215_spill] sm:$0xff] }
 0x28d   : > { %5163 = vmatpush1.msra.mxu0 %v12224_v55  ;;  %5270 = vmatpush1.msra.mxu1 %v12173_v7  ;;  %v12230_v55 = vld [vmem:[#allocation219_spill] sm:$0xff] }
 0x28e   : > { %5166 = vmatprep.subr.mxu0 %v12225_v53  ;;  %5272 = vmatprep.subr.mxu1 %v12175_v8  ;;  %v12231_v53 = vld [vmem:[#allocation223_spill] sm:$0xff] }
 0x28f   : > { %5169 = vmatpush1.msra.mxu0 %v12226_v17  ;;  %5274 = vmatpush1.msra.mxu1 %v12177_v21  ;;  %v12232_v17 = vld [vmem:[#allocation226_spill] sm:$0xff] }
 0x290   : > { %5172 = vmatprep.subr.mxu0 %v12227_v19  ;;  %5276 = vmatprep.subr.mxu1 %v8758_v60  ;;  %v10206_v19 = vpop.f32.mrf.mxu0 }
 0x291   : > { %5175 = vmatpush1.msra.mxu0 %v12228_v30  ;;  %5278 = vmatpush1.msra.mxu1 %v8773_v27  ;;  %v12233_v30 = vld [vmem:[#allocation232_spill] sm:$0xff] }
 0x292   : > { %5178 = vmatprep.subr.mxu0 %v12229_v38  ;;  %5280 = vmatprep.subr.mxu1 %v8796_v31  ;;  %v12234_v38 = vld [vmem:[#allocation235_spill] sm:$0xff] }
 0x293   : > { %5181 = vmatpush1.msra.mxu0 %v12230_v55  ;;  %5282 = vmatpush1.msra.mxu1 %v11932_v43  ;;  %v10220_v55 = vpop.f32.mrf.mxu0 }
 0x294   : > { %5184 = vmatprep.subr.mxu0 %v12231_v53  ;;  %5284 = vmatprep.subr.mxu1 %v11934_v1  ;;  %v12235_v53 = vld [vmem:[#allocation238_spill] sm:$0xff] }
 0x295   : > { %5187 = vmatpush1.msra.mxu0 %v12232_v17  ;;  %5286 = vmatpush1.msra.mxu1 %v11936_v59  ;;  %v12236_v17 = vld [vmem:[#allocation240_spill] sm:$0xff] }
 0x296   : > { %5190 = vmatprep.subr.mxu0 %v12233_v30  ;;  %5288 = vmatprep.subr.mxu1 %v11938_v25  ;;  %v12237_v30 = vld [vmem:[#allocation243_spill] sm:$0xff] }
 0x297   : > { %5193 = vmatpush1.msra.mxu0 %v12234_v38  ;;  %5290 = vmatpush1.msra.mxu1 %v11940_v4  ;;  %v12238_v38 = vld [vmem:[#allocation246_spill] sm:$0xff] }
 0x298   : > { %5196 = vmatprep.subr.mxu0 %v12235_v53  ;;  %5292 = vmatprep.subr.mxu1 %v11942_v46  ;;  %v10230_v53 = vpop.f32.mrf.mxu0 }
 0x299   : > { %5199 = vmatpush1.msra.mxu0 %v12236_v17  ;;  %5294 = vmatpush1.msra.mxu1 %v11944_v45  ;;  %v10236_v17 = vpop.f32.mrf.mxu1 }
 0x29a   : > { %5202 = vmatprep.subr.mxu0 %v12237_v30  ;;  %5296 = vmatprep.subr.mxu1 %v11946_v5  ;;  %v5650_v30 = vstv %s10210_s23 }
 0x29b   : > { %5205 = vmatpush1.msra.mxu0 %v12238_v38  ;;  %5238 = vmatprep.mubr.f32.mxu0 %v11561_v32  ;;  %v12240_v38 = vld [vmem:[#allocation152_spill] sm:$0xff]  ;;  %v10248_v28 = vpop.f32.mrf.mxu1  ;;  %v5651_v52 = vmul.f32 %v7648_v23, %v5650_v30  ;;  %v12246_v23 = vld [vmem:[#allocation169_spill] sm:$0xff] }
 0x29c   : > { %5298 = vmatpush1.msra.mxu1 %v11948_v10  ;;  %5241 = vmatmul.mubr.f32.vlgmr.msra.gmra.mxu0 %v9911_v50  ;;  %v10246_v50 = vpop.f32.mrf.mxu0 }
 0x29d   : > { %5300 = vmatprep.subr.mxu1 %v11950_v37  ;;  %5356 = vmatprep.subr.mxu0 %v12239_v16  ;;  %v12242_v16 = vld [vmem:[#allocation156_spill] sm:$0xff] }
 0x29e   : > { %5302 = vmatpush1.msra.mxu1 %v11952_v13  ;;  %5360 = vmatpush1.msra.mxu0 %v12240_v38  ;;  %v10254_v38 = vpop.f32.mrf.mxu0 }
 0x29f   : > { %5304 = vmatprep.subr.mxu1 %v12193_v3  ;;  %5364 = vmatprep.subr.mxu0 %v12241_v9  ;;  %v12244_v9 = vld [vmem:[#allocation163_spill] sm:$0xff] }
 0x2a0   : > { %5306 = vmatpush1.msra.mxu1 %v12195_v58  ;;  %5368 = vmatpush1.msra.mxu0 %v12242_v16  ;;  %v10265_v16 = vpop.f32.mrf.mxu1  ;;  %v10271_v30 = vpop.f32.mrf.mxu0 }
 0x2a1   : > { %5308 = vmatprep.subr.mxu1 %v12197_v63  ;;  %5372 = vmatprep.subr.mxu0 %v12243_v34  ;;  %v12245_v34 = vld [vmem:[#allocation166_spill] sm:$0xff] }
 0x2a2   : > { %5310 = vmatpush1.msra.mxu1 %v12199_v26  ;;  %5343 = vmatprep.mubr.f32.mxu1 %v11561_v32  ;;  %v10273_v48 = vpop.f32.mrf.mxu1 }
 0x2a3   : > { %5376 = vmatpush1.msra.mxu0 %v12244_v9  ;;  %5347 = vmatmul.mubr.f32.vlgmr.msra.gmra.mxu1 %v9922_v57  ;;  %v5655_v9 = vadd.f32 %v5654_v15, %v5651_v52  ;;  %v12248_v57 = vld [vmem:[#allocation174_spill] sm:$0xff]  ;;  %v7651_v52 = vld [vmem:[%s8298_s11 + $0x6] sm:$0x3] }
 0x2a4   : > { %5380 = vmatprep.subr.mxu0 %v12245_v34  ;;  %5522 = vmatprep.subr.mxu1 %v12160_v29  ;;  %v5661_v34 = vstv %s10244_s26  ;;  %v12249_v29 = vld [vmem:[#allocation179_spill] sm:$0xff]  ;;  %v10287_v15 = vpop.f32.mrf.mxu1 }
 0x2a5   : > { %5384 = vmatpush1.msra.mxu0 %v12246_v23  ;;  %5524 = vmatpush1.msra.mxu1 %v12161_v24  ;;  %v3102_v23 = vpop.f32.mrf.mxu0  ;;  %v5659_v36 = vadd.f32 %v5658_v40, %v5655_v9  ;;  %v12254_v9 = vld [vmem:[#allocation196_spill] sm:$0xff] }
 0x2a6   : > { %5388 = vmatprep.subr.mxu0 %v12247_v12  ;;  %5526 = vmatprep.subr.mxu1 %v8611_v2  ;;  %v12250_v12 = vld [vmem:[#allocation182_spill] sm:$0xff]  ;;  %v12252_v2 = vld [vmem:[#allocation189_spill] sm:$0xff] }
 0x2a7   : > { %5392 = vmatpush1.msra.mxu0 %v12248_v57  ;;  %5528 = vmatpush1.msra.mxu1 %v12162_v44  ;;  %v5662_v57 = vmul.f32 %v7651_v52, %v5661_v34  ;;  %v5665_v44 = vstv %s10263_s27  ;;  %v12255_v34 = vld [vmem:[#allocation201_spill] sm:$0xff] }
 0x2a8   : > { %5396 = vmatprep.subr.mxu0 %v12249_v29  ;;  %5530 = vmatprep.subr.mxu1 %v12163_v56  ;;  %v3104_v29 = vpop.f32.mrf.mxu0  ;;  %v12253_v56 = vld [vmem:[#allocation193_spill] sm:$0xff] }
 0x2a9   : > { %5400 = vmatpush1.msra.mxu0 %v12250_v12  ;;  %5532 = vmatpush1.msra.mxu1 %v12164_v47  ;;  %v3334_v12 = vpop.f32.mrf.mxu1  ;;  %v5663_v52 = vadd.f32 %v5662_v57, %v5659_v36 }
 0x2aa   : > { %5404 = vmatprep.subr.mxu0 %v12251_v35  ;;  %5534 = vmatprep.subr.mxu1 %v12165_v18  ;;  %v3471_v40 = vpop.f32.mrf.mxu0  ;;  %v12256_v18 = vld [vmem:[#allocation210_spill] sm:$0xff] }
 0x2ab   : > { %5408 = vmatpush1.msra.mxu0 %v12252_v2  ;;  %5536 = vmatpush1.msra.mxu1 %v11745_v51  ;;  %v7652_v2 = vld [vmem:[%s8298_s11 + $0x8] sm:$0x3]  ;;  %v5669_v51 = vstv %s10281_s28 }
 0x2ac   : > { %5412 = vmatprep.subr.mxu0 %v12253_v56  ;;  %5538 = vmatprep.subr.mxu1 %v8665_v6  ;;  %v5666_v35 = vmul.f32 %v7652_v2, %v5665_v44  ;;  %v3336_v56 = vpop.f32.mrf.mxu1  ;;  %v12258_v2 = vld [vmem:[#allocation217_spill] sm:$0xff]  ;;  %v2480_v44 = vadd.f32 %v10222_v33, %v10206_v19  ;;  %v3473_v57 = vpop.f32.mrf.mxu0  ;;  %v12261_v19 = vld [vmem:[#allocation228_spill] sm:$0xff] }
 0x2ad   : > { %5416 = vmatpush1.msra.mxu0 %v12254_v9  ;;  %5540 = vmatpush1.msra.mxu1 %v12169_v11  ;;  %v12257_v9 = vld [vmem:[#allocation214_spill] sm:$0xff] }
 0x2ae   : > { %5420 = vmatprep.subr.mxu0 %v12255_v34  ;;  %5542 = vmatprep.subr.mxu1 %v12171_v39  ;;  %v2482_v34 = vadd.f32 %v10236_v17, %v10220_v55  ;;  %v3577_v36 = vpop.f32.mrf.mxu1  ;;  %v7653_v39 = vld [vmem:[%s8298_s11 + $0xa] sm:$0x3]  ;;  %v12260_v17 = vld [vmem:[#allocation224_spill] sm:$0xff]  ;;  %v5673_v55 = vstv %s10295_s29 }
 0x2af   : > { %5424 = vmatpush1.msra.mxu0 %v12256_v18  ;;  %5544 = vmatpush1.msra.mxu1 %v12173_v7  ;;  %v12259_v18 = vld [vmem:[#allocation221_spill] sm:$0xff]  ;;  %v5667_v7 = vadd.f32 %v5666_v35, %v5663_v52  ;;  %v5670_v11 = vmul.f32 %v7653_v39, %v5669_v51  ;;  %v3335_v35 = vadd.f32 %v3334_v12, %v3102_v23  ;;  %v12262_v39 = vld [vmem:[#allocation230_spill] sm:$0xff] }
 0x2b0   : > { %5428 = vmatprep.subr.mxu0 %v12257_v9  ;;  %5546 = vmatprep.subr.mxu1 %v12175_v8  ;;  %v2619_v9 = vadd.f32 %v10246_v50, %v2482_v34  ;;  %v3337_v51 = vadd.f32 %v3336_v56, %v3104_v29  ;;  %v3579_v34 = vpop.f32.mrf.mxu1  ;;  %v12264_v29 = vld [vmem:[#allocation237_spill] sm:$0xff]  ;;  %v5677_v56 = vstv %s10307_s30  ;;  %v12265_v12 = vld [vmem:[#allocation242_spill] sm:$0xff] }
 0x2b1   : > { %5432 = vmatpush1.msra.mxu0 %v12258_v2  ;;  %5548 = vmatpush1.msra.mxu1 %v12177_v21  ;;  %v2617_v2 = vadd.f32 %v10230_v53, %v2480_v44  ;;  %v12263_v53 = vld [vmem:[#allocation233_spill] sm:$0xff]  ;;  %v5671_v52 = vadd.f32 %v5670_v11, %v5667_v7 }
 0x2b2   : > { %5436 = vmatprep.subr.mxu0 %v12259_v18  ;;  %5550 = vmatprep.subr.mxu1 %v8758_v60  ;;  %v3745_v33 = vpop.f32.mrf.mxu0  ;;  %v2725_v18 = vadd.f32 %v10265_v16, %v2619_v9  ;;  %v7654_v44 = vld [vmem:[%s8298_s11 + $0xc] sm:$0x3]  ;;  %v3472_v16 = vadd.f32 %v3471_v40, %v3335_v35  ;;  %v3474_v23 = vadd.f32 %v3473_v57, %v3337_v51  ;;  %v12267_v40 = vld [vmem:[#allocation248_spill] sm:$0xff]  ;;  %v7655_v57 = vld [vmem:[%s8298_s11 + $0xe] sm:$0x3] }
 0x2b3   : > { %5440 = vmatpush1.msra.mxu0 %v12260_v17  ;;  %5552 = vmatpush1.msra.mxu1 %v8773_v27  ;;  %v2723_v50 = vadd.f32 %v10248_v28, %v2617_v2  ;;  %v12268_v51 = vld [vmem:[#allocation250_spill] sm:$0xff] }
 0x2b4   : > { %5444 = vmatprep.subr.mxu0 %v12261_v19  ;;  %5554 = vmatprep.subr.mxu1 %v8796_v31  ;;  %v5674_v19 = vmul.f32 %v7654_v44, %v5673_v55  ;;  %v2893_v17 = vadd.f32 %v10271_v30, %v2725_v18  ;;  %v3747_v9 = vpop.f32.mrf.mxu0  ;;  %v3578_v18 = vadd.f32 %v3577_v36, %v3472_v16  ;;  %v12266_v30 = vld [vmem:[#allocation245_spill] sm:$0xff]  ;;  %v5681_v16 = vstv %s10341_s5 }
 0x2b5   : > { %5448 = vmatpush1.msra.mxu0 %v12262_v39  ;;  %5556 = vmatpush1.msra.mxu1 %v11932_v43  ;;  %v2891_v28 = vadd.f32 %v10254_v38, %v2723_v50  ;;  %v3580_v7 = vadd.f32 %v3579_v34, %v3474_v23  ;;  %v5678_v55 = vmul.f32 %v7655_v57, %v5677_v56  ;;  %v12271_v23 = vld [vmem:[#allocation8_spill] sm:$0xff] }
 0x2b6   : > { %5452 = vmatprep.subr.mxu0 %v12263_v53  ;;  %5558 = vmatprep.subr.mxu1 %v11934_v1  ;;  %v2997_v11 = vadd.f32 %v10287_v15, %v2893_v17  ;;  %v5675_v2 = vadd.f32 %v5674_v19, %v5671_v52  ;;  %v3746_v15 = vadd.f32 %v3745_v33, %v3578_v18  ;;  %v12269_v17 = vld [vmem:[#allocation252_spill] sm:$0xff]  ;;  %v12270_v19 = vld [vmem:[#allocation254_spill] sm:$0xff]  ;;  %v12316_v53 = vld [vmem:[#allocation117_spill] sm:$0xff] }
 0x2b7   : > { %5456 = vmatpush1.msra.mxu0 %v12264_v29  ;;  %5560 = vmatpush1.msra.mxu1 %v11936_v59  ;;  %v2995_v35 = vadd.f32 %v10273_v48, %v2891_v28  ;;  %v3748_v36 = vadd.f32 %v3747_v9, %v3580_v7  ;;  %v12272_v18 = vld [vmem:[#allocation34_spill] sm:$0xff]  ;;  %v12275_v57 = vld [vmem:[#allocation20_spill] sm:$0xff] }
 0x2b8   : > { %5460 = vmatprep.subr.mxu0 %v12265_v12  ;;  %5562 = vmatprep.subr.mxu1 %v11938_v25  ;;  %v5679_v33 = vadd.f32 %v5678_v55, %v5675_v2  ;;  %v12274_v2 = vld [vmem:[#allocation37_spill] sm:$0xff]  ;;  %v12276_v55 = vld [vmem:[#allocation38_spill] sm:$0xff]  ;;  %v12312_v12 = vld [vmem:[#allocation112_spill] sm:$0xff] }
 0x2b9   : > { %5464 = vmatpush1.msra.mxu0 %v12266_v30  ;;  %5564 = vmatpush1.msra.mxu1 %v11940_v4  ;;  %v3849_v38 = vpop.f32.mrf.mxu1  ;;  %v3858_v34 = vcombine.low %v2995_v35, %v2997_v11  ;;  %v12277_v35 = vld [vmem:[#allocation24_spill] sm:$0xff] }
 0x2ba   : > { %5468 = vmatprep.subr.mxu0 %v12267_v40  ;;  %5566 = vmatprep.subr.mxu1 %v11942_v46  ;;  %v3850_v52 = vadd.f32 %v3849_v38, %v3746_v15  ;;  %v5682_v11 = vadd.f32 %v5681_v16, %v5679_v33  ;;  %v12273_v38 = vld [vmem:[#allocation35_spill] sm:$0xff]  ;;  %v12279_v15 = vld [vmem:[#allocation28_spill] sm:$0xff]  ;;  %v12285_v33 = vld [vmem:[#allocation42_spill] sm:$0xff] }
 0x2bb   : > { %5472 = vmatpush1.msra.mxu0 %v12268_v51  ;;  %5568 = vmatpush1.msra.mxu1 %v11944_v45  ;;  %v3851_v50 = vpop.f32.mrf.mxu1  ;;  %v3866_v56 = vrot.slane %v3858_v34, %v12271_v23  ;;  %v12281_v34 = vld [vmem:[#allocation31_spill] sm:$0xff]  ;;  %v12308_v51 = vld [vmem:[#allocation102_spill] sm:$0xff]  ;;  %v12310_v30 = vld [vmem:[#allocation108_spill] sm:$0xff] }
 0x2bc   : > { %5476 = vmatprep.subr.mxu0 %v12269_v17  ;;  %5570 = vmatprep.subr.mxu1 %v11946_v5  ;;  %v3852_v44 = vadd.f32 %v3851_v50, %v3748_v36  ;;  %v5684_v7 = vmul.f32 0.1, %v5682_v11  ;;  %vm5683_vm3 = vcmp.gt.f32.partialorder %v5682_v11, 0.0  ;;  %v12280_v50 = vld [vmem:[#allocation44_spill] sm:$0xff]  ;;  %v12306_v17 = vld [vmem:[#allocation98_spill] sm:$0xff] }
 0x2bd   : > { %5480 = vmatpush1.msra.mxu0 %v12270_v19  ;;  %5513 = vmatprep.mubr.f32.mxu0 %v11561_v32  ;;  %v12304_v19 = vld [vmem:[#allocation95_spill] sm:$0xff]  ;;  %v12314_v29 = vld [vmem:[#allocation116_spill] sm:$0xff] }
 0x2be   : > { %5572 = vmatpush1.msra.mxu1 %v11948_v10  ;;  %5515 = vmatmul.mubr.f32.vlgmr.msra.gmra.mxu0 %v9900_v42  ;;  %v3859_v48 = vcombine.low %v3850_v52, %v3852_v44  ;;  %v5685_v36 = vsel %vm5683_vm3, %v5682_v11, %v5684_v7  ;;  %v12282_v52 = vld [vmem:[#allocation51_spill] sm:$0xff]  ;;  %v12283_v44 = vld [vmem:[#allocation36_spill] sm:$0xff]  ;;  %v12289_v11 = vld [vmem:[#allocation49_spill] sm:$0xff] }
 0x2bf   : > { %5574 = vmatprep.subr.mxu1 %v11950_v37  ;;  %5687 = vmatprep.subr.mxu0 %v11793_v61  ;;  %v10394_v16 = vand.u32 4294901760, %v5685_v36  ;;  %v12291_v7 = vld [vmem:[#allocation53_spill] sm:$0xff] }
 0x2c0   : > { %5576 = vmatpush1.msra.mxu1 %v11952_v13  ;;  %5689 = vmatpush1.msra.mxu0 %v11794_v14  ;;  %v3873_v28 = vrot.slane %v3859_v48, %v12271_v23  ;;  %v12284_v48 = vld [vmem:[#allocation60_spill] sm:$0xff]  ;;  %v12328_v13 = vld [vmem:[#allocation21_spill] sm:$0xff] }
 0x2c1   : > { %5578 = vmatprep.subr.mxu1 %v12193_v3  ;;  %5691 = vmatprep.subr.mxu0 %v11795_v49  ;;  %v12326_v3 = vld [vmem:[#allocation19_spill] sm:$0xff]  ;;  %v12330_v37 = vld [vmem:[#allocation25_spill] sm:$0xff] }
 0x2c2   : > { %5580 = vmatpush1.msra.mxu1 %v12195_v58  ;;  %5693 = vmatpush1.msra.mxu0 %v11796_v20  ;;  %v3874_v9 = vcombine.low %v3866_v56, %v3873_v28  ;;  %v12286_v56 = vld [vmem:[#allocation61_spill] sm:$0xff]  ;;  %v12322_v58 = vld [vmem:[#allocation15_spill] sm:$0xff] }
 0x2c3   : > { %5582 = vmatprep.subr.mxu1 %v12197_v63  ;;  %5695 = vmatprep.subr.mxu0 %v11797_v62  ;;  %v12287_v28 = vld [vmem:[#allocation45_spill] sm:$0xff]  ;;  %v12319_v63 = vld [vmem:[#allocation107_spill] sm:$0xff] }
 0x2c4   : > { %5584 = vmatpush1.msra.mxu1 %v12199_v26  ;;  %5617 = vmatprep.mubr.f32.mxu1 %v11561_v32  ;;  %7568 = vst [vmem:[%s9873_s22 + $0x8] sm:$0xff] %v3874_v9  ;;  %v12288_v9 = vld [vmem:[#allocation63_spill] sm:$0xff]  ;;  %v12318_v26 = vld [vmem:[#allocation118_spill] sm:$0xff] }
 0x2c5   : > { %5697 = vmatpush1.msra.mxu0 %v11798_v22  ;;  %5619 = vmatmul.mubr.f32.vlgmr.msra.gmra.mxu1 %v9900_v42  ;;  %v12278_v42 = vld [vmem:[#allocation40_spill] sm:$0xff] }
 0x2c6   : > { %5699 = vmatprep.subr.mxu0 %v11799_v41  ;;  %5799 = vmatprep.subr.mxu1 %v12272_v18  ;;  %v12290_v18 = vld [vmem:[#allocation66_spill] sm:$0xff] }
 0x2c7   : > { %5701 = vmatpush1.msra.mxu0 %v11801_v0  ;;  %5805 = vmatpush1.msra.mxu1 %v12273_v38  ;;  %v12292_v38 = vld [vmem:[#allocation70_spill] sm:$0xff] }
 0x2c8   : > { %5703 = vmatprep.subr.mxu0 %v11803_v54  ;;  %5811 = vmatprep.subr.mxu1 %v12274_v2  ;;  %v12293_v2 = vld [vmem:[#allocation56_spill] sm:$0xff] }
 0x2c9   : > { %5705 = vmatpush1.msra.mxu0 %v12275_v57  ;;  %5817 = vmatpush1.msra.mxu1 %v12276_v55  ;;  %v10405_v55 = vsub.f32 %v5685_v36, %v10394_v16  ;;  %v12302_v36 = vld [vmem:[#allocation92_spill] sm:$0xff] }
 0x2ca   : > { %5707 = vmatprep.subr.mxu0 %v12277_v35  ;;  %5823 = vmatprep.subr.mxu1 %v12278_v42  ;;  %v12294_v42 = vld [vmem:[#allocation76_spill] sm:$0xff] }
 0x2cb   : > { %5709 = vmatpush1.msra.mxu0 %v12279_v15  ;;  %5829 = vmatpush1.msra.mxu1 %v12280_v50  ;;  %v12295_v50 = vld [vmem:[#allocation59_spill] sm:$0xff]  ;;  %v10416_v23 = vand.u32 4294901760, %v10405_v55 }
 0x2cc   : > { %5711 = vmatprep.subr.mxu0 %v12281_v34  ;;  %5835 = vmatprep.subr.mxu1 %v12282_v52  ;;  %v12296_v52 = vld [vmem:[#allocation80_spill] sm:$0xff] }
 0x2cd   : > { %5713 = vmatpush1.msra.mxu0 %v12283_v44  ;;  %5841 = vmatpush1.msra.mxu1 %v12284_v48  ;;  %v12297_v48 = vld [vmem:[#allocation65_spill] sm:$0xff]  ;;  %v5786_v40 = vsub.f32 %v10405_v55, %v10416_v23 }
 0x2ce   : > { %5715 = vmatprep.subr.mxu0 %v12285_v33  ;;  %5847 = vmatprep.subr.mxu1 %v12286_v56  ;;  %v12298_v56 = vld [vmem:[#allocation86_spill] sm:$0xff] }
 0x2cf   : > { %5717 = vmatpush1.msra.mxu0 %v12287_v28  ;;  %5853 = vmatpush1.msra.mxu1 %v12288_v9  ;;  %v12299_v9 = vld [vmem:[#allocation69_spill] sm:$0xff]  ;;  %v10436_v39 = vand.u32 4294901760, %v5786_v40  ;;  %v12325_v40 = vld [vmem:[#allocation132_spill] sm:$0xff] }
 0x2d0   : > { %5719 = vmatprep.subr.mxu0 %v12289_v11  ;;  %5859 = vmatprep.subr.mxu1 %v12290_v18  ;;  %v12300_v18 = vld [vmem:[#allocation89_spill] sm:$0xff] }
 0x2d1   : > { %5721 = vmatpush1.msra.mxu0 %v12291_v7  ;;  %5865 = vmatpush1.msra.mxu1 %v12292_v38  ;;  %v12301_v38 = vld [vmem:[#allocation72_spill] sm:$0xff] }
 0x2d2   : > { %5723 = vmatprep.subr.mxu0 %v12293_v2  ;;  %5871 = vmatprep.subr.mxu1 %v12294_v42  ;;  %v12303_v42 = vld [vmem:[#allocation75_spill] sm:$0xff] }
 0x2d3   : > { %5725 = vmatpush1.msra.mxu0 %v12295_v50  ;;  %5877 = vmatpush1.msra.mxu1 %v12296_v52  ;;  %v12305_v52 = vld [vmem:[#allocation79_spill] sm:$0xff] }
 0x2d4   : > { %5727 = vmatprep.subr.mxu0 %v12297_v48  ;;  %5883 = vmatprep.subr.mxu1 %v12298_v56  ;;  %v12307_v56 = vld [vmem:[#allocation84_spill] sm:$0xff] }
 0x2d5   : > { %5729 = vmatpush1.msra.mxu0 %v12299_v9  ;;  %5889 = vmatpush1.msra.mxu1 %v12300_v18  ;;  %v12309_v18 = vld [vmem:[#allocation88_spill] sm:$0xff] }
 0x2d6   : > { %5731 = vmatprep.subr.mxu0 %v12301_v38  ;;  %5895 = vmatprep.subr.mxu1 %v12302_v36  ;;  %v12311_v36 = vld [vmem:[#allocation93_spill] sm:$0xff] }
 0x2d7   : > { %5733 = vmatpush1.msra.mxu0 %v12303_v42  ;;  %5901 = vmatpush1.msra.mxu1 %v12304_v19  ;;  %v12313_v19 = vld [vmem:[#allocation97_spill] sm:$0xff] }
 0x2d8   : > { %5735 = vmatprep.subr.mxu0 %v12305_v52  ;;  %5907 = vmatprep.subr.mxu1 %v12306_v17  ;;  %v12315_v17 = vld [vmem:[#allocation101_spill] sm:$0xff] }
 0x2d9   : > { %5737 = vmatpush1.msra.mxu0 %v12307_v56  ;;  %5913 = vmatpush1.msra.mxu1 %v12308_v51  ;;  %v12317_v51 = vld [vmem:[#allocation104_spill] sm:$0xff] }
 0x2da   : > { %5739 = vmatprep.subr.mxu0 %v12309_v18  ;;  %5919 = vmatprep.subr.mxu1 %v12310_v30  ;;  %v12320_v30 = vld [vmem:[#allocation119_spill] sm:$0xff] }
 0x2db   : > { %5741 = vmatpush1.msra.mxu0 %v12311_v36  ;;  %5925 = vmatpush1.msra.mxu1 %v12312_v12  ;;  %v12321_v12 = vld [vmem:[#allocation120_spill] sm:$0xff] }
 0x2dc   : > { %5743 = vmatprep.subr.mxu0 %v12313_v19  ;;  %5931 = vmatprep.subr.mxu1 %v12314_v29  ;;  %v12323_v29 = vld [vmem:[#allocation131_spill] sm:$0xff] }
 0x2dd   : > { %5745 = vmatpush1.msra.mxu0 %v12315_v17  ;;  %5937 = vmatpush1.msra.mxu1 %v12316_v53  ;;  %v12324_v53 = vld [vmem:[#allocation17_spill] sm:$0xff] }
 0x2de   : > { %5747 = vmatprep.subr.mxu0 %v12317_v51  ;;  %5943 = vmatprep.subr.mxu1 %v12318_v26  ;;  %v12327_v26 = vld [vmem:[#allocation133_spill] sm:$0xff] }
 0x2df   : > { %5749 = vmatpush1.msra.mxu0 %v12319_v63  ;;  %5949 = vmatpush1.msra.mxu1 %v12320_v30  ;;  %v12329_v30 = vld [vmem:[#allocation134_spill] sm:$0xff] }
 0x2e0   : > { %5782 = vmatprep.mubr.f32.mxu0 %v11561_v32  ;;  %5955 = vmatprep.subr.mxu1 %v12321_v12  ;;  %v12331_v12 = vld [vmem:[#allocation135_spill] sm:$0xff] }
 0x2e1   : > { %6028 = vmatprep.subr.mxu0 %v12322_v58  ;;  %5788 = vmatmul.mubr.f32.vlgmr.msra.gmra.mxu0 %v10436_v39  ;;  %v12332_v58 = vld [vmem:[#allocation29_spill] sm:$0xff] }
 0x2e2   : > { %5961 = vmatpush1.msra.mxu1 %v12323_v29  ;;  %6031 = vmatpush1.msra.mxu0 %v12324_v53  ;;  %v12333_v29 = vld [vmem:[#allocation33_spill] sm:$0xff]  ;;  %v12337_v53 = vld [vmem:[#allocation50_spill] sm:$0xff] }
 0x2e3   : > { %5967 = vmatprep.subr.mxu1 %v12325_v40  ;;  %6034 = vmatprep.subr.mxu0 %v12326_v3  ;;  %v12334_v3 = vld [vmem:[#allocation41_spill] sm:$0xff]  ;;  %v12338_v40 = vld [vmem:[#allocation54_spill] sm:$0xff] }
 0x2e4   : > { %5973 = vmatpush1.msra.mxu1 %v12327_v26  ;;  %6037 = vmatpush1.msra.mxu0 %v12328_v13  ;;  %v12335_v13 = vld [vmem:[#allocation43_spill] sm:$0xff]  ;;  %v12339_v26 = vld [vmem:[#allocation58_spill] sm:$0xff] }
 0x2e5   : > { %5979 = vmatprep.subr.mxu1 %v12329_v30  ;;  %6040 = vmatprep.subr.mxu0 %v12330_v37  ;;  %v12336_v37 = vld [vmem:[#allocation46_spill] sm:$0xff] }
 0x2e6   : > { %5985 = vmatpush1.msra.mxu1 %v12331_v12  ;;  %6018 = vmatprep.mubr.f32.mxu1 %v11561_v32  ;;  %v12340_v30 = vld [vmem:[#allocation62_spill] sm:$0xff]  ;;  %v12341_v12 = vld [vmem:[#allocation68_spill] sm:$0xff] }
 0x2e7   : > { %6043 = vmatpush1.msra.mxu0 %v12332_v58  ;;  %6020 = vmatmul.mubr.f32.vlgmr.msra.gmra.mxu1 %v10394_v16  ;;  %v12342_v58 = vld [vmem:[#allocation71_spill] sm:$0xff] }
 0x2e8   : > { %6046 = vmatprep.subr.mxu0 %v12333_v29  ;;  %6164 = vmatprep.subr.mxu1 %v11793_v61  ;;  %v12343_v29 = vld [vmem:[#allocation74_spill] sm:$0xff] }
 0x2e9   : > { %6049 = vmatpush1.msra.mxu0 %v12334_v3  ;;  %6166 = vmatpush1.msra.mxu1 %v11794_v14  ;;  %v12344_v3 = vld [vmem:[#allocation78_spill] sm:$0xff] }
 0x2ea   : > { %6052 = vmatprep.subr.mxu0 %v12335_v13  ;;  %6168 = vmatprep.subr.mxu1 %v11795_v49  ;;  %v12345_v13 = vld [vmem:[#allocation82_spill] sm:$0xff] }
 0x2eb   : > { %6055 = vmatpush1.msra.mxu0 %v12336_v37  ;;  %6170 = vmatpush1.msra.mxu1 %v11796_v20  ;;  %v12346_v37 = vld [vmem:[#allocation85_spill] sm:$0xff] }
 0x2ec   : > { %6058 = vmatprep.subr.mxu0 %v12337_v53  ;;  %6172 = vmatprep.subr.mxu1 %v11797_v62  ;;  %v12347_v53 = vld [vmem:[#allocation91_spill] sm:$0xff] }
 0x2ed   : > { %6061 = vmatpush1.msra.mxu0 %v12338_v40  ;;  %6174 = vmatpush1.msra.mxu1 %v11798_v22  ;;  %v12348_v40 = vld [vmem:[#allocation94_spill] sm:$0xff] }
 0x2ee   : > { %6064 = vmatprep.subr.mxu0 %v12339_v26  ;;  %6176 = vmatprep.subr.mxu1 %v11799_v41  ;;  %v12349_v26 = vld [vmem:[#allocation100_spill] sm:$0xff] }
 0x2ef   : > { %6067 = vmatpush1.msra.mxu0 %v12340_v30  ;;  %6178 = vmatpush1.msra.mxu1 %v11801_v0  ;;  %v12350_v30 = vld [vmem:[#allocation103_spill] sm:$0xff] }
 0x2f0   : > { %6070 = vmatprep.subr.mxu0 %v12341_v12  ;;  %6180 = vmatprep.subr.mxu1 %v11803_v54  ;;  %v12351_v12 = vld [vmem:[#allocation106_spill] sm:$0xff] }
 0x2f1   : > { %6073 = vmatpush1.msra.mxu0 %v12342_v58  ;;  %6182 = vmatpush1.msra.mxu1 %v12275_v57  ;;  %v12352_v58 = vld [vmem:[#allocation110_spill] sm:$0xff] }
 0x2f2   : > { %6076 = vmatprep.subr.mxu0 %v12343_v29  ;;  %6184 = vmatprep.subr.mxu1 %v12277_v35  ;;  %v12353_v29 = vld [vmem:[#allocation111_spill] sm:$0xff] }
 0x2f3   : > { %6079 = vmatpush1.msra.mxu0 %v12344_v3  ;;  %6186 = vmatpush1.msra.mxu1 %v12279_v15  ;;  %v12354_v3 = vld [vmem:[#allocation121_spill] sm:$0xff] }
 0x2f4   : > { %6082 = vmatprep.subr.mxu0 %v12345_v13  ;;  %6188 = vmatprep.subr.mxu1 %v12281_v34  ;;  %v12355_v13 = vld [vmem:[#allocation122_spill] sm:$0xff] }
 0x2f5   : > { %6085 = vmatpush1.msra.mxu0 %v12346_v37  ;;  %6190 = vmatpush1.msra.mxu1 %v12283_v44  ;;  %v12356_v37 = vld [vmem:[#allocation123_spill] sm:$0xff] }
 0x2f6   : > { %6088 = vmatprep.subr.mxu0 %v12347_v53  ;;  %6192 = vmatprep.subr.mxu1 %v12285_v33  ;;  %v12357_v53 = vld [vmem:[#allocation124_spill] sm:$0xff] }
 0x2f7   : > { %6091 = vmatpush1.msra.mxu0 %v12348_v40  ;;  %6194 = vmatpush1.msra.mxu1 %v12287_v28  ;;  %v12358_v40 = vld [vmem:[#allocation125_spill] sm:$0xff] }
 0x2f8   : > { %6094 = vmatprep.subr.mxu0 %v12349_v26  ;;  %6196 = vmatprep.subr.mxu1 %v12289_v11  ;;  %v12359_v26 = vld [vmem:[#allocation22_spill] sm:$0xff] }
 0x2f9   : > { %6097 = vmatpush1.msra.mxu0 %v12350_v30  ;;  %6198 = vmatpush1.msra.mxu1 %v12291_v7  ;;  %v12360_v30 = vld [vmem:[#allocation23_spill] sm:$0xff] }
 0x2fa   : > { %6100 = vmatprep.subr.mxu0 %v12351_v12  ;;  %6200 = vmatprep.subr.mxu1 %v12293_v2  ;;  %v12361_v12 = vld [vmem:[#allocation26_spill] sm:$0xff] }
 0x2fb   : > { %6103 = vmatpush1.msra.mxu0 %v12352_v58  ;;  %6202 = vmatpush1.msra.mxu1 %v12295_v50  ;;  %v12362_v58 = vld [vmem:[#allocation27_spill] sm:$0xff] }
 0x2fc   : > { %6106 = vmatprep.subr.mxu0 %v12353_v29  ;;  %6204 = vmatprep.subr.mxu1 %v12297_v48  ;;  %v12363_v29 = vld [vmem:[#allocation30_spill] sm:$0xff] }
 0x2fd   : > { %6109 = vmatpush1.msra.mxu0 %v12354_v3  ;;  %6206 = vmatpush1.msra.mxu1 %v12299_v9  ;;  %v12364_v3 = vld [vmem:[#allocation32_spill] sm:$0xff] }
 0x2fe   : > { %6112 = vmatprep.subr.mxu0 %v12355_v13  ;;  %6208 = vmatprep.subr.mxu1 %v12301_v38  ;;  %v12365_v13 = vld [vmem:[#allocation39_spill] sm:$0xff] }
 0x2ff   : > { %6115 = vmatpush1.msra.mxu0 %v12356_v37  ;;  %6210 = vmatpush1.msra.mxu1 %v12303_v42  ;;  %v12366_v37 = vld [vmem:[#allocation47_spill] sm:$0xff] }
 0x300   : > { %6118 = vmatprep.subr.mxu0 %v12357_v53  ;;  %6212 = vmatprep.subr.mxu1 %v12305_v52  ;;  %v12367_v53 = vld [vmem:[#allocation48_spill] sm:$0xff] }
 0x301   : > { %6121 = vmatpush1.msra.mxu0 %v12358_v40  ;;  %6154 = vmatprep.mubr.f32.mxu0 %v11561_v32  ;;  %v12368_v40 = vld [vmem:[#allocation52_spill] sm:$0xff] }
 0x302   : > { %6214 = vmatpush1.msra.mxu1 %v12307_v56  ;;  %6157 = vmatmul.mubr.f32.vlgmr.msra.gmra.mxu0 %v10405_v55 }
 0x303   : > { %6216 = vmatprep.subr.mxu1 %v12309_v18  ;;  %6272 = vmatprep.subr.mxu0 %v12359_v26  ;;  %v12369_v26 = vld [vmem:[#allocation55_spill] sm:$0xff] }
 0x304   : > { %6218 = vmatpush1.msra.mxu1 %v12311_v36  ;;  %6276 = vmatpush1.msra.mxu0 %v12360_v30  ;;  %v12370_v30 = vld [vmem:[#allocation57_spill] sm:$0xff] }
 0x305   : > { %6220 = vmatprep.subr.mxu1 %v12313_v19  ;;  %6280 = vmatprep.subr.mxu0 %v12361_v12  ;;  %v12403_v12 = vld [vmem:[#allocation181_spill] sm:$0xff] }
 0x306   : > { %6222 = vmatpush1.msra.mxu1 %v12315_v17  ;;  %6284 = vmatpush1.msra.mxu0 %v12362_v58  ;;  %v12404_v58 = vld [vmem:[#allocation161_spill] sm:$0xff] }
 0x307   : > { %6224 = vmatprep.subr.mxu1 %v12317_v51  ;;  %6288 = vmatprep.subr.mxu0 %v12363_v29  ;;  %v12405_v29 = vld [vmem:[#allocation184_spill] sm:$0xff] }
 0x308   : > { %6226 = vmatpush1.msra.mxu1 %v12319_v63  ;;  %6259 = vmatprep.mubr.f32.mxu1 %v11561_v32 }
 0x309   : > { %6292 = vmatpush1.msra.mxu0 %v12364_v3  ;;  %6263 = vmatmul.mubr.f32.vlgmr.msra.gmra.mxu1 %v10416_v23  ;;  %v12406_v3 = vld [vmem:[#allocation187_spill] sm:$0xff] }
 0x30a   : > { %6296 = vmatprep.subr.mxu0 %v12365_v13  ;;  %6438 = vmatprep.subr.mxu1 %v11793_v61  ;;  %v12371_v61 = vld [vmem:[#allocation64_spill] sm:$0xff]  ;;  %v12407_v13 = vld [vmem:[#allocation191_spill] sm:$0xff] }
 0x30b   : > { %6300 = vmatpush1.msra.mxu0 %v12366_v37  ;;  %6440 = vmatpush1.msra.mxu1 %v11794_v14  ;;  %v12372_v14 = vld [vmem:[#allocation67_spill] sm:$0xff]  ;;  %v12408_v37 = vld [vmem:[#allocation194_spill] sm:$0xff] }
 0x30c   : > { %6304 = vmatprep.subr.mxu0 %v12367_v53  ;;  %6442 = vmatprep.subr.mxu1 %v11795_v49  ;;  %v12373_v49 = vld [vmem:[#allocation73_spill] sm:$0xff] }
 0x30d   : > { %6308 = vmatpush1.msra.mxu0 %v12368_v40  ;;  %6444 = vmatpush1.msra.mxu1 %v11796_v20  ;;  %v12374_v20 = vld [vmem:[#allocation77_spill] sm:$0xff]  ;;  %v12410_v40 = vld [vmem:[#allocation203_spill] sm:$0xff] }
 0x30e   : > { %6312 = vmatprep.subr.mxu0 %v12369_v26  ;;  %6446 = vmatprep.subr.mxu1 %v11797_v62  ;;  %v12375_v62 = vld [vmem:[#allocation81_spill] sm:$0xff]  ;;  %v12411_v26 = vld [vmem:[#allocation206_spill] sm:$0xff] }
 0x30f   : > { %6316 = vmatpush1.msra.mxu0 %v12370_v30  ;;  %6448 = vmatpush1.msra.mxu1 %v11798_v22  ;;  %v12376_v22 = vld [vmem:[#allocation83_spill] sm:$0xff]  ;;  %v12409_v53 = vld [vmem:[#allocation197_spill] sm:$0xff] }
 0x310   : > { %6320 = vmatprep.subr.mxu0 %v12371_v61  ;;  %6450 = vmatprep.subr.mxu1 %v11799_v41  ;;  %v12377_v41 = vld [vmem:[#allocation87_spill] sm:$0xff]  ;;  %v12412_v30 = vld [vmem:[#allocation209_spill] sm:$0xff] }
 0x311   : > { %6324 = vmatpush1.msra.mxu0 %v12372_v14  ;;  %6452 = vmatpush1.msra.mxu1 %v11801_v0  ;;  %v12378_v0 = vld [vmem:[#allocation90_spill] sm:$0xff]  ;;  %v12413_v61 = vld [vmem:[#allocation213_spill] sm:$0xff]  ;;  %v12414_v14 = vld [vmem:[#allocation216_spill] sm:$0xff] }
 0x312   : > { %6328 = vmatprep.subr.mxu0 %v12373_v49  ;;  %6454 = vmatprep.subr.mxu1 %v11803_v54  ;;  %v12379_v54 = vld [vmem:[#allocation96_spill] sm:$0xff] }
 0x313   : > { %6332 = vmatpush1.msra.mxu0 %v12374_v20  ;;  %6456 = vmatpush1.msra.mxu1 %v12275_v57  ;;  %v12380_v57 = vld [vmem:[#allocation99_spill] sm:$0xff]  ;;  %v12415_v49 = vld [vmem:[#allocation220_spill] sm:$0xff] }
 0x314   : > { %6336 = vmatprep.subr.mxu0 %v12375_v62  ;;  %6458 = vmatprep.subr.mxu1 %v12277_v35  ;;  %v12381_v35 = vld [vmem:[#allocation105_spill] sm:$0xff]  ;;  %v12416_v20 = vld [vmem:[#allocation227_spill] sm:$0xff]  ;;  %v12417_v62 = vld [vmem:[#allocation236_spill] sm:$0xff] }
 0x315   : > { %6340 = vmatpush1.msra.mxu0 %v12376_v22  ;;  %6460 = vmatpush1.msra.mxu1 %v12279_v15  ;;  %v12382_v15 = vld [vmem:[#allocation109_spill] sm:$0xff]  ;;  %v12418_v22 = vld [vmem:[#allocation239_spill] sm:$0xff] }
 0x316   : > { %6344 = vmatprep.subr.mxu0 %v12377_v41  ;;  %6462 = vmatprep.subr.mxu1 %v12281_v34  ;;  %v12383_v34 = vld [vmem:[#allocation113_spill] sm:$0xff] }
 0x317   : > { %6348 = vmatpush1.msra.mxu0 %v12378_v0  ;;  %6464 = vmatpush1.msra.mxu1 %v12283_v44  ;;  %v12384_v44 = vld [vmem:[#allocation114_spill] sm:$0xff]  ;;  %v12419_v41 = vld [vmem:[#allocation241_spill] sm:$0xff] }
 0x318   : > { %6352 = vmatprep.subr.mxu0 %v12379_v54  ;;  %6466 = vmatprep.subr.mxu1 %v12285_v33  ;;  %v12385_v33 = vld [vmem:[#allocation115_spill] sm:$0xff]  ;;  %v12420_v0 = vld [vmem:[#allocation218_spill] sm:$0xff]  ;;  %v12421_v54 = vld [vmem:[#allocation244_spill] sm:$0xff] }
 0x319   : > { %6356 = vmatpush1.msra.mxu0 %v12380_v57  ;;  %6468 = vmatpush1.msra.mxu1 %v12287_v28  ;;  %v12386_v28 = vld [vmem:[#allocation126_spill] sm:$0xff] }
 0x31a   : > { %6360 = vmatprep.subr.mxu0 %v12381_v35  ;;  %6470 = vmatprep.subr.mxu1 %v12289_v11  ;;  %v12387_v11 = vld [vmem:[#allocation127_spill] sm:$0xff]  ;;  %v12422_v57 = vld [vmem:[#allocation222_spill] sm:$0xff] }
 0x31b   : > { %6364 = vmatpush1.msra.mxu0 %v12382_v15  ;;  %6472 = vmatpush1.msra.mxu1 %v12291_v7  ;;  %v12388_v7 = vld [vmem:[#allocation128_spill] sm:$0xff]  ;;  %v12423_v35 = vld [vmem:[#allocation247_spill] sm:$0xff]  ;;  %v12424_v15 = vld [vmem:[#allocation225_spill] sm:$0xff] }
 0x31c   : > { %6368 = vmatprep.subr.mxu0 %v12383_v34  ;;  %6474 = vmatprep.subr.mxu1 %v12293_v2  ;;  %v12389_v2 = vld [vmem:[#allocation129_spill] sm:$0xff] }
 0x31d   : > { %6372 = vmatpush1.msra.mxu0 %v12384_v44  ;;  %6476 = vmatpush1.msra.mxu1 %v12295_v50  ;;  %v12390_v50 = vld [vmem:[#allocation130_spill] sm:$0xff]  ;;  %v12425_v34 = vld [vmem:[#allocation249_spill] sm:$0xff] }
 0x31e   : > { %6376 = vmatprep.subr.mxu0 %v12385_v33  ;;  %6478 = vmatprep.subr.mxu1 %v12297_v48  ;;  %v12391_v48 = vld [vmem:[#allocation138_spill] sm:$0xff]  ;;  %v12426_v44 = vld [vmem:[#allocation229_spill] sm:$0xff]  ;;  %v12427_v33 = vld [vmem:[#allocation251_spill] sm:$0xff] }
 0x31f   : > { %6380 = vmatpush1.msra.mxu0 %v12386_v28  ;;  %6480 = vmatpush1.msra.mxu1 %v12299_v9  ;;  %v12392_v9 = vld [vmem:[#allocation140_spill] sm:$0xff]  ;;  %v12428_v28 = vld [vmem:[#allocation231_spill] sm:$0xff] }
 0x320   : > { %6384 = vmatprep.subr.mxu0 %v12387_v11  ;;  %6482 = vmatprep.subr.mxu1 %v12301_v38  ;;  %v12393_v38 = vld [vmem:[#allocation141_spill] sm:$0xff] }
 0x321   : > { %6388 = vmatpush1.msra.mxu0 %v12388_v7  ;;  %6484 = vmatpush1.msra.mxu1 %v12303_v42  ;;  %v12394_v42 = vld [vmem:[#allocation143_spill] sm:$0xff]  ;;  %v12429_v11 = vld [vmem:[#allocation253_spill] sm:$0xff]  ;;  %v12430_v7 = vld [vmem:[#allocation234_spill] sm:$0xff] }
 0x322   : > { %6392 = vmatprep.subr.mxu0 %v12389_v2  ;;  %6486 = vmatprep.subr.mxu1 %v12305_v52  ;;  %v12395_v52 = vld [vmem:[#allocation146_spill] sm:$0xff]  ;;  %v12431_v2 = vld [vmem:[#allocation255_spill] sm:$0xff] }
 0x323   : > { %6396 = vmatpush1.msra.mxu0 %v12390_v50  ;;  %6429 = vmatprep.mubr.f32.mxu0 %v11561_v32  ;;  %v12432_v50 = vld [vmem:[#allocation256_spill] sm:$0xff] }
 0x324   : > { %6488 = vmatpush1.msra.mxu1 %v12307_v56  ;;  %6431 = vmatmul.mubr.f32.vlgmr.msra.gmra.mxu0 %v10394_v16  ;;  %v12396_v56 = vld [vmem:[#allocation168_spill] sm:$0xff] }
 0x325   : > { %6490 = vmatprep.subr.mxu1 %v12309_v18  ;;  %6542 = vmatprep.subr.mxu0 %v12391_v48  ;;  %v12397_v18 = vld [vmem:[#allocation150_spill] sm:$0xff] }
 0x326   : > { %6492 = vmatpush1.msra.mxu1 %v12311_v36  ;;  %6544 = vmatpush1.msra.mxu0 %v12161_v24  ;;  %v12398_v36 = vld [vmem:[#allocation173_spill] sm:$0xff] }
 0x327   : > { %6494 = vmatprep.subr.mxu1 %v12313_v19  ;;  %6546 = vmatprep.subr.mxu0 %v12392_v9  ;;  %v12399_v19 = vld [vmem:[#allocation176_spill] sm:$0xff] }
 0x328   : > { %6496 = vmatpush1.msra.mxu1 %v12315_v17  ;;  %6548 = vmatpush1.msra.mxu0 %v12393_v38  ;;  %v12400_v17 = vld [vmem:[#allocation153_spill] sm:$0xff] }
 0x329   : > { %6498 = vmatprep.subr.mxu1 %v12317_v51  ;;  %6550 = vmatprep.subr.mxu0 %v12394_v42  ;;  %v12402_v51 = vld [vmem:[#allocation158_spill] sm:$0xff] }
 0x32a   : > { %6500 = vmatpush1.msra.mxu1 %v12319_v63  ;;  %6533 = vmatprep.mubr.f32.mxu1 %v11561_v32  ;;  %v12401_v63 = vld [vmem:[#allocation178_spill] sm:$0xff] }
 0x32b   : > { %6552 = vmatpush1.msra.mxu0 %v12164_v47  ;;  %6535 = vmatmul.mubr.f32.vlgmr.msra.gmra.mxu1 %v10394_v16 }
 0x32c   : > { %6554 = vmatprep.subr.mxu0 %v12395_v52  ;;  %6654 = vmatprep.subr.mxu1 %v12396_v56  ;;  %v12433_v56 = vld [vmem:[#allocation142_spill] sm:$0xff] }
 0x32d   : > { %6556 = vmatpush1.msra.mxu0 %v12397_v18  ;;  %6660 = vmatpush1.msra.mxu1 %v12398_v36  ;;  %v12434_v36 = vld [vmem:[#allocation257_spill] sm:$0xff] }
 0x32e   : > { %6558 = vmatprep.subr.mxu0 %v8665_v6  ;;  %6666 = vmatprep.subr.mxu1 %v12399_v19  ;;  %v12435_v19 = vld [vmem:[#allocation145_spill] sm:$0xff] }
 0x32f   : > { %6560 = vmatpush1.msra.mxu0 %v12400_v17  ;;  %6672 = vmatpush1.msra.mxu1 %v12401_v63  ;;  %v12436_v63 = vld [vmem:[#allocation258_spill] sm:$0xff] }
 0x330   : > { %6562 = vmatprep.subr.mxu0 %v12402_v51  ;;  %6678 = vmatprep.subr.mxu1 %v12403_v12  ;;  %v12437_v12 = vld [vmem:[#allocation147_spill] sm:$0xff] }
 0x331   : > { %6564 = vmatpush1.msra.mxu0 %v12404_v58  ;;  %6684 = vmatpush1.msra.mxu1 %v12405_v29  ;;  %v12438_v29 = vld [vmem:[#allocation259_spill] sm:$0xff] }
 0x332   : > { %6566 = vmatprep.subr.mxu0 %v12175_v8  ;;  %6690 = vmatprep.subr.mxu1 %v12406_v3  ;;  %v12439_v3 = vld [vmem:[#allocation148_spill] sm:$0xff] }
 0x333   : > { %6568 = vmatpush1.msra.mxu0 %v12177_v21  ;;  %6696 = vmatpush1.msra.mxu1 %v12407_v13  ;;  %v12440_v13 = vld [vmem:[#allocation260_spill] sm:$0xff] }
 0x334   : > { %6570 = vmatprep.subr.mxu0 %v8758_v60  ;;  %6702 = vmatprep.subr.mxu1 %v12408_v37  ;;  %v12441_v37 = vld [vmem:[#allocation151_spill] sm:$0xff] }
 0x335   : > { %6572 = vmatpush1.msra.mxu0 %v8773_v27  ;;  %6708 = vmatpush1.msra.mxu1 %v12409_v53  ;;  %v12442_v53 = vld [vmem:[#allocation261_spill] sm:$0xff] }
 0x336   : > { %6574 = vmatprep.subr.mxu0 %v8796_v31  ;;  %6714 = vmatprep.subr.mxu1 %v12410_v40  ;;  %v12444_v40 = vld [vmem:[#allocation157_spill] sm:$0xff] }
 0x337   : > { %6576 = vmatpush1.msra.mxu0 %v11932_v43  ;;  %6720 = vmatpush1.msra.mxu1 %v12411_v26  ;;  %v12445_v26 = vld [vmem:[#allocation159_spill] sm:$0xff] }
 0x338   : > { %6578 = vmatprep.subr.mxu0 %v11934_v1  ;;  %6726 = vmatprep.subr.mxu1 %v12412_v30  ;;  %v12446_v30 = vld [vmem:[#allocation162_spill] sm:$0xff] }
 0x339   : > { %6580 = vmatpush1.msra.mxu0 %v11936_v59  ;;  %6732 = vmatpush1.msra.mxu1 %v12413_v61  ;;  %v12447_v61 = vld [vmem:[#allocation165_spill] sm:$0xff] }
 0x33a   : > { %6582 = vmatprep.subr.mxu0 %v11938_v25  ;;  %6738 = vmatprep.subr.mxu1 %v12414_v14  ;;  %v12448_v14 = vld [vmem:[#allocation170_spill] sm:$0xff] }
 0x33b   : > { %6584 = vmatpush1.msra.mxu0 %v11940_v4  ;;  %6744 = vmatpush1.msra.mxu1 %v12415_v49  ;;  %v12449_v49 = vld [vmem:[#allocation172_spill] sm:$0xff] }
 0x33c   : > { %6586 = vmatprep.subr.mxu0 %v11942_v46  ;;  %6750 = vmatprep.subr.mxu1 %v12416_v20  ;;  %v12450_v20 = vld [vmem:[#allocation175_spill] sm:$0xff] }
 0x33d   : > { %6588 = vmatpush1.msra.mxu0 %v11944_v45  ;;  %6756 = vmatpush1.msra.mxu1 %v12417_v62  ;;  %v12451_v62 = vld [vmem:[#allocation177_spill] sm:$0xff] }
 0x33e   : > { %6590 = vmatprep.subr.mxu0 %v11946_v5  ;;  %6762 = vmatprep.subr.mxu1 %v12418_v22  ;;  %v12452_v22 = vld [vmem:[#allocation180_spill] sm:$0xff] }
 0x33f   : > { %6592 = vmatpush1.msra.mxu0 %v11948_v10  ;;  %6768 = vmatpush1.msra.mxu1 %v12419_v41  ;;  %v12453_v41 = vld [vmem:[#allocation183_spill] sm:$0xff] }
 0x340   : > { %6594 = vmatprep.subr.mxu0 %v12420_v0  ;;  %6774 = vmatprep.subr.mxu1 %v12421_v54  ;;  %v12454_v54 = vld [vmem:[#allocation190_spill] sm:$0xff] }
 0x341   : > { %6596 = vmatpush1.msra.mxu0 %v12422_v57  ;;  %6780 = vmatpush1.msra.mxu1 %v12423_v35  ;;  %v12455_v35 = vld [vmem:[#allocation199_spill] sm:$0xff] }
 0x342   : > { %6598 = vmatprep.subr.mxu0 %v12424_v15  ;;  %6786 = vmatprep.subr.mxu1 %v12425_v34  ;;  %v12456_v34 = vld [vmem:[#allocation202_spill] sm:$0xff] }
 0x343   : > { %6600 = vmatpush1.msra.mxu0 %v12426_v44  ;;  %6792 = vmatpush1.msra.mxu1 %v12427_v33  ;;  %v12457_v33 = vld [vmem:[#allocation205_spill] sm:$0xff] }
 0x344   : > { %6602 = vmatprep.subr.mxu0 %v12428_v28  ;;  %6798 = vmatprep.subr.mxu1 %v12429_v11  ;;  %v12458_v11 = vld [vmem:[#allocation208_spill] sm:$0xff] }
 0x345   : > { %6604 = vmatpush1.msra.mxu0 %v12430_v7  ;;  %6804 = vmatpush1.msra.mxu1 %v12431_v2  ;;  %v12459_v2 = vld [vmem:[#allocation212_spill] sm:$0xff] }
 0x346   : > { %6637 = vmatprep.mubr.f32.mxu0 %v11561_v32  ;;  %6810 = vmatprep.subr.mxu1 %v12432_v50  ;;  %v12460_v50 = vld [vmem:[#allocation215_spill] sm:$0xff] }
 0x347   : > { %6883 = vmatprep.subr.mxu0 %v12433_v56  ;;  %6643 = vmatmul.mubr.f32.vlgmr.msra.gmra.mxu0 %v10436_v39  ;;  %v12443_v39 = vld [vmem:[#allocation154_spill] sm:$0xff]  ;;  %v12461_v56 = vld [vmem:[#allocation219_spill] sm:$0xff] }
 0x348   : > { %6816 = vmatpush1.msra.mxu1 %v12434_v36  ;;  %6886 = vmatpush1.msra.mxu0 %v12435_v19  ;;  %v12462_v36 = vld [vmem:[#allocation223_spill] sm:$0xff]  ;;  %v12463_v19 = vld [vmem:[#allocation226_spill] sm:$0xff] }
 0x349   : > { %6822 = vmatprep.subr.mxu1 %v12436_v63  ;;  %6889 = vmatprep.subr.mxu0 %v12437_v12  ;;  %v10700_v63 = vpop.f32.mrf.mxu0  ;;  %v12464_v12 = vld [vmem:[#allocation232_spill] sm:$0xff] }
 0x34a   : > { %6828 = vmatpush1.msra.mxu1 %v12438_v29  ;;  %6892 = vmatpush1.msra.mxu0 %v12439_v3  ;;  %v12465_v29 = vld [vmem:[#allocation235_spill] sm:$0xff]  ;;  %v12466_v3 = vld [vmem:[#allocation238_spill] sm:$0xff] }
 0x34b   : > { %6834 = vmatprep.subr.mxu1 %v12440_v13  ;;  %6895 = vmatprep.subr.mxu0 %v12441_v37  ;;  %v12467_v13 = vld [vmem:[#allocation240_spill] sm:$0xff]  ;;  %v4020_v37 = vpop.f32.mrf.mxu0 }
 0x34c   : > { %6840 = vmatpush1.msra.mxu1 %v12442_v53  ;;  %6873 = vmatprep.mubr.f32.mxu1 %v11561_v32  ;;  %v10710_v53 = vpop.f32.mrf.mxu1 }
 0x34d   : > { %6898 = vmatpush1.msra.mxu0 %v12443_v39  ;;  %6875 = vmatmul.mubr.f32.vlgmr.msra.gmra.mxu1 %v10394_v16  ;;  %v12468_v39 = vld [vmem:[#allocation243_spill] sm:$0xff] }
 0x34e   : > { %6901 = vmatprep.subr.mxu0 %v12444_v40  ;;  %7019 = vmatprep.subr.mxu1 %v12391_v48  ;;  %v12469_v40 = vld [vmem:[#allocation246_spill] sm:$0xff] }
 0x34f   : > { %6904 = vmatpush1.msra.mxu0 %v12445_v26  ;;  %7021 = vmatpush1.msra.mxu1 %v12161_v24  ;;  %v10716_v26 = vpop.f32.mrf.mxu0 }
 0x350   : > { %6907 = vmatprep.subr.mxu0 %v12446_v30  ;;  %7023 = vmatprep.subr.mxu1 %v12392_v9  ;;  %v4252_v30 = vpop.f32.mrf.mxu1 }
 0x351   : > { %6910 = vmatpush1.msra.mxu0 %v12447_v61  ;;  %7025 = vmatpush1.msra.mxu1 %v12393_v38  ;;  %v12470_v61 = vld [vmem:[#allocation149_spill] sm:$0xff] }
 0x352   : > { %6913 = vmatprep.subr.mxu0 %v12448_v14  ;;  %7027 = vmatprep.subr.mxu1 %v12394_v42  ;;  %v12471_v14 = vld [vmem:[#allocation152_spill] sm:$0xff] }
 0x353   : > { %6916 = vmatpush1.msra.mxu0 %v12449_v49  ;;  %7029 = vmatpush1.msra.mxu1 %v12164_v47  ;;  %v4389_v49 = vpop.f32.mrf.mxu0 }
 0x354   : > { %6919 = vmatprep.subr.mxu0 %v12450_v20  ;;  %7031 = vmatprep.subr.mxu1 %v12395_v52  ;;  %v10726_v20 = vpop.f32.mrf.mxu1 }
 0x355   : > { %6922 = vmatpush1.msra.mxu0 %v12451_v62  ;;  %7033 = vmatpush1.msra.mxu1 %v12397_v18  ;;  %v12472_v62 = vld [vmem:[#allocation155_spill] sm:$0xff] }
 0x356   : > { %6925 = vmatprep.subr.mxu0 %v12452_v22  ;;  %7035 = vmatprep.subr.mxu1 %v8665_v6  ;;  %v12473_v22 = vld [vmem:[#allocation156_spill] sm:$0xff] }
 0x357   : > { %6928 = vmatpush1.msra.mxu0 %v12453_v41  ;;  %7037 = vmatpush1.msra.mxu1 %v12400_v17  ;;  %v12474_v41 = vld [vmem:[#allocation160_spill] sm:$0xff] }
 0x358   : > { %6931 = vmatprep.subr.mxu0 %v12454_v54  ;;  %7039 = vmatprep.subr.mxu1 %v12402_v51  ;;  %v12475_v54 = vld [vmem:[#allocation163_spill] sm:$0xff] }
 0x359   : > { %6934 = vmatpush1.msra.mxu0 %v12455_v35  ;;  %7041 = vmatpush1.msra.mxu1 %v12404_v58  ;;  %v4495_v35 = vpop.f32.mrf.mxu1 }
 0x35a   : > { %6937 = vmatprep.subr.mxu0 %v12456_v34  ;;  %7043 = vmatprep.subr.mxu1 %v12175_v8  ;;  %v12476_v34 = vld [vmem:[#allocation166_spill] sm:$0xff] }
 0x35b   : > { %6940 = vmatpush1.msra.mxu0 %v12457_v33  ;;  %7045 = vmatpush1.msra.mxu1 %v12177_v21  ;;  %v12477_v33 = vld [vmem:[#allocation169_spill] sm:$0xff] }
 0x35c   : > { %6943 = vmatprep.subr.mxu0 %v12458_v11  ;;  %7047 = vmatprep.subr.mxu1 %v8758_v60 }
 0x35d   : > { %6946 = vmatpush1.msra.mxu0 %v12459_v2  ;;  %7049 = vmatpush1.msra.mxu1 %v8773_v27  ;;  %v10742_v2 = vpop.f32.mrf.mxu1 }
 0x35e   : > { %6949 = vmatprep.subr.mxu0 %v12460_v50  ;;  %7051 = vmatprep.subr.mxu1 %v8796_v31  ;;  %v12478_v50 = vld [vmem:[#allocation171_spill] sm:$0xff] }
 0x35f   : > { %6952 = vmatpush1.msra.mxu0 %v12461_v56  ;;  %7053 = vmatpush1.msra.mxu1 %v11932_v43  ;;  %v12479_v56 = vld [vmem:[#allocation174_spill] sm:$0xff] }
 0x360   : > { %6955 = vmatprep.subr.mxu0 %v12462_v36  ;;  %7055 = vmatprep.subr.mxu1 %v11934_v1 }
 0x361   : > { %6958 = vmatpush1.msra.mxu0 %v12463_v19  ;;  %7057 = vmatpush1.msra.mxu1 %v11936_v59  ;;  %v4767_v19 = vpop.f32.mrf.mxu1 }
 0x362   : > { %6961 = vmatprep.subr.mxu0 %v12464_v12  ;;  %7059 = vmatprep.subr.mxu1 %v11938_v25  ;;  %v12482_v12 = vld [vmem:[#allocation186_spill] sm:$0xff] }
 0x363   : > { %6964 = vmatpush1.msra.mxu0 %v12465_v29  ;;  %7061 = vmatpush1.msra.mxu1 %v11940_v4  ;;  %v5105_v29 = vpop.f32.mrf.mxu1 }
 0x364   : > { %6967 = vmatprep.subr.mxu0 %v12466_v3  ;;  %7063 = vmatprep.subr.mxu1 %v11942_v46 }
 0x365   : > { %6970 = vmatpush1.msra.mxu0 %v12467_v13  ;;  %7065 = vmatpush1.msra.mxu1 %v11944_v45  ;;  %v5107_v13 = vpop.f32.mrf.mxu1 }
 0x366   : > { %6973 = vmatprep.subr.mxu0 %v12468_v39  ;;  %7067 = vmatprep.subr.mxu1 %v11946_v5  ;;  %v12488_v39 = vld [vmem:[#allocation214_spill] sm:$0xff] }
 0x367   : > { %6976 = vmatpush1.msra.mxu0 %v12469_v40  ;;  %7009 = vmatprep.mubr.f32.mxu0 %v11561_v32  ;;  %v4251_v40 = vadd.f32 %v10710_v53, %v10700_v63 }
 0x368   : > { %7069 = vmatpush1.msra.mxu1 %v11948_v10  ;;  %7012 = vmatmul.mubr.f32.vlgmr.msra.gmra.mxu0 %v10405_v55  ;;  %v10732_v55 = vpop.f32.mrf.mxu0 }
 0x369   : > { %7071 = vmatprep.subr.mxu1 %v12420_v0  ;;  %7127 = vmatprep.subr.mxu0 %v12470_v61  ;;  %v5348_v61 = vpop.f32.mrf.mxu1 }
 0x36a   : > { %7073 = vmatpush1.msra.mxu1 %v12422_v57  ;;  %7131 = vmatpush1.msra.mxu0 %v12471_v14  ;;  %v4663_v11 = vpop.f32.mrf.mxu0 }
 0x36b   : > { %7075 = vmatprep.subr.mxu1 %v12424_v15  ;;  %7135 = vmatprep.subr.mxu0 %v12472_v62 }
 0x36c   : > { %7077 = vmatpush1.msra.mxu1 %v12426_v44  ;;  %7139 = vmatpush1.msra.mxu0 %v12473_v22  ;;  %v4873_v36 = vpop.f32.mrf.mxu0  ;;  %v5350_v22 = vpop.f32.mrf.mxu1 }
 0x36d   : > { %7079 = vmatprep.subr.mxu1 %v12428_v28  ;;  %7143 = vmatprep.subr.mxu0 %v12474_v41  ;;  %v5106_v63 = vadd.f32 %v5105_v29, %v4873_v36 }
 0x36e   : > { %7081 = vmatpush1.msra.mxu1 %v12430_v7  ;;  %7114 = vmatprep.mubr.f32.mxu1 %v11561_v32 }
 0x36f   : > { %7147 = vmatpush1.msra.mxu0 %v12475_v54  ;;  %7118 = vmatmul.mubr.f32.vlgmr.msra.gmra.mxu1 %v10416_v23  ;;  %v12480_v23 = vld [vmem:[#allocation179_spill] sm:$0xff]  ;;  %v12495_v54 = vld [vmem:[#allocation237_spill] sm:$0xff] }
 0x370   : > { %7151 = vmatprep.subr.mxu0 %v12476_v34  ;;  %7293 = vmatprep.subr.mxu1 %v12391_v48  ;;  %v12481_v48 = vld [vmem:[#allocation182_spill] sm:$0xff] }
 0x371   : > { %7155 = vmatpush1.msra.mxu0 %v12477_v33  ;;  %7295 = vmatpush1.msra.mxu1 %v12161_v24  ;;  %v12483_v24 = vld [vmem:[#allocation189_spill] sm:$0xff] }
 0x372   : > { %7159 = vmatprep.subr.mxu0 %v12478_v50  ;;  %7297 = vmatprep.subr.mxu1 %v12392_v9  ;;  %v4875_v9 = vpop.f32.mrf.mxu0 }
 0x373   : > { %7163 = vmatpush1.msra.mxu0 %v12479_v56  ;;  %7299 = vmatpush1.msra.mxu1 %v12393_v38  ;;  %v12484_v38 = vld [vmem:[#allocation193_spill] sm:$0xff]  ;;  %v5108_v53 = vadd.f32 %v5107_v13, %v4875_v9 }
 0x374   : > { %7167 = vmatprep.subr.mxu0 %v12480_v23  ;;  %7301 = vmatprep.subr.mxu1 %v12394_v42  ;;  %v12485_v42 = vld [vmem:[#allocation196_spill] sm:$0xff]  ;;  %v5242_v3 = vpop.f32.mrf.mxu0 }
 0x375   : > { %7171 = vmatpush1.msra.mxu0 %v12481_v48  ;;  %7303 = vmatpush1.msra.mxu1 %v12164_v47  ;;  %v12486_v47 = vld [vmem:[#allocation201_spill] sm:$0xff]  ;;  %v5243_v41 = vadd.f32 %v5242_v3, %v5106_v63  ;;  %v12500_v23 = vld [vmem:[#allocation252_spill] sm:$0xff] }
 0x376   : > { %7175 = vmatprep.subr.mxu0 %v12482_v12  ;;  %7305 = vmatprep.subr.mxu1 %v12395_v52  ;;  %v12487_v52 = vld [vmem:[#allocation210_spill] sm:$0xff] }
 0x377   : > { %7179 = vmatpush1.msra.mxu0 %v12483_v24  ;;  %7307 = vmatpush1.msra.mxu1 %v12397_v18  ;;  %v4253_v18 = vadd.f32 %v4252_v30, %v4020_v37  ;;  %v4388_v37 = vadd.f32 %v10716_v26, %v4251_v40  ;;  %v5349_v33 = vadd.f32 %v5348_v61, %v5243_v41 }
 0x378   : > { %7183 = vmatprep.subr.mxu0 %v12484_v38  ;;  %7309 = vmatprep.subr.mxu1 %v8665_v6  ;;  %v12489_v6 = vld [vmem:[#allocation217_spill] sm:$0xff] }
 0x379   : > { %7187 = vmatpush1.msra.mxu0 %v12485_v42  ;;  %7311 = vmatpush1.msra.mxu1 %v12400_v17  ;;  %v5244_v17 = vpop.f32.mrf.mxu0  ;;  %v4390_v14 = vadd.f32 %v4389_v49, %v4253_v18  ;;  %v4494_v49 = vadd.f32 %v10726_v20, %v4388_v37 }
 0x37a   : > { %7191 = vmatprep.subr.mxu0 %v12486_v47  ;;  %7313 = vmatprep.subr.mxu1 %v12402_v51  ;;  %v12490_v51 = vld [vmem:[#allocation221_spill] sm:$0xff] }
 0x37b   : > { %7195 = vmatpush1.msra.mxu0 %v12487_v52  ;;  %7315 = vmatpush1.msra.mxu1 %v12404_v58  ;;  %v12491_v58 = vld [vmem:[#allocation224_spill] sm:$0xff]  ;;  %v4496_v62 = vadd.f32 %v4495_v35, %v4390_v14  ;;  %v4662_v35 = vadd.f32 %v10732_v55, %v4494_v49 }
 0x37c   : > { %7199 = vmatprep.subr.mxu0 %v12488_v39  ;;  %7317 = vmatprep.subr.mxu1 %v12175_v8  ;;  %v12492_v8 = vld [vmem:[#allocation228_spill] sm:$0xff] }
 0x37d   : > { %7203 = vmatpush1.msra.mxu0 %v12489_v6  ;;  %7319 = vmatpush1.msra.mxu1 %v12177_v21  ;;  %v12493_v21 = vld [vmem:[#allocation230_spill] sm:$0xff]  ;;  %v4664_v26 = vadd.f32 %v4663_v11, %v4496_v62  ;;  %v12498_v11 = vld [vmem:[#allocation248_spill] sm:$0xff]  ;;  %v4766_v56 = vadd.f32 %v10742_v2, %v4662_v35 }
 0x37e   : > { %7207 = vmatprep.subr.mxu0 %v12490_v51  ;;  %7321 = vmatprep.subr.mxu1 %v8758_v60  ;;  %v5516_v30 = vpop.f32.mrf.mxu0  ;;  %v12494_v60 = vld [vmem:[#allocation233_spill] sm:$0xff] }
 0x37f   : > { %7211 = vmatpush1.msra.mxu0 %v12491_v58  ;;  %7323 = vmatpush1.msra.mxu1 %v8773_v27  ;;  %v5245_v27 = vadd.f32 %v5244_v17, %v5108_v53  ;;  %v4768_v20 = vadd.f32 %v4767_v19, %v4664_v26  ;;  %v5517_v55 = vadd.f32 %v5516_v30, %v5349_v33 }
 0x380   : > { %7215 = vmatprep.subr.mxu0 %v12492_v8  ;;  %7325 = vmatprep.subr.mxu1 %v8796_v31  ;;  %v12496_v31 = vld [vmem:[#allocation242_spill] sm:$0xff]  ;;  %v5518_v34 = vpop.f32.mrf.mxu0 }
 0x381   : > { %7219 = vmatpush1.msra.mxu0 %v12493_v21  ;;  %7327 = vmatpush1.msra.mxu1 %v11932_v43  ;;  %v5351_v50 = vadd.f32 %v5350_v22, %v5245_v27  ;;  %v12497_v43 = vld [vmem:[#allocation245_spill] sm:$0xff]  ;;  %v5629_v48 = vcombine.low %v4766_v56, %v4768_v20 }
 0x382   : > { %7223 = vmatprep.subr.mxu0 %v12494_v60  ;;  %7329 = vmatprep.subr.mxu1 %v11934_v1 }
 0x383   : > { %7227 = vmatpush1.msra.mxu0 %v12495_v54  ;;  %7331 = vmatpush1.msra.mxu1 %v11936_v59  ;;  %v12499_v59 = vld [vmem:[#allocation250_spill] sm:$0xff]  ;;  %v5519_v36 = vadd.f32 %v5518_v34, %v5351_v50 }
 0x384   : > { %7231 = vmatprep.subr.mxu0 %v12496_v31  ;;  %7333 = vmatprep.subr.mxu1 %v11938_v25 }
 0x385   : > { %7235 = vmatpush1.msra.mxu0 %v12497_v43  ;;  %7335 = vmatpush1.msra.mxu1 %v11940_v4  ;;  %v5620_v1 = vpop.f32.mrf.mxu1  ;;  %v12501_v4 = vld [vmem:[#allocation254_spill] sm:$0xff] }
 0x386   : > { %7239 = vmatprep.subr.mxu0 %v12498_v11  ;;  %7337 = vmatprep.subr.mxu1 %v11942_v46  ;;  %v5621_v19 = vadd.f32 %v5620_v1, %v5517_v55 }
 0x387   : > { %7243 = vmatpush1.msra.mxu0 %v12499_v59  ;;  %7339 = vmatpush1.msra.mxu1 %v11944_v45  ;;  %v5622_v25 = vpop.f32.mrf.mxu1  ;;  %v12502_v45 = vld [vmem:[#allocation8_spill] sm:$0xff] }
 0x388   : > { %7247 = vmatprep.subr.mxu0 %v12500_v23  ;;  %7341 = vmatprep.subr.mxu1 %v11946_v5  ;;  %v5623_v12 = vadd.f32 %v5622_v25, %v5519_v36  ;;  %v5637_v5 = vrot.slane %v5629_v48, %v12502_v45 }
 0x389   : > { %7251 = vmatpush1.msra.mxu0 %v12501_v4  ;;  %7284 = vmatprep.mubr.f32.mxu0 %v11561_v32 }
 0x38a   : > { %7343 = vmatpush1.msra.mxu1 %v11948_v10  ;;  %7286 = vmatmul.mubr.f32.vlgmr.msra.gmra.mxu0 %v10394_v16  ;;  %v5630_v46 = vcombine.low %v5621_v19, %v5623_v12 }
 0x38b   : > { %7345 = vmatprep.subr.mxu1 %v12420_v0  ;;  %7388 = vmatprep.mubr.f32.mxu1 %v11561_v32 }
 0x38c   : > { %7347 = vmatpush1.msra.mxu1 %v12422_v57  ;;  %v5644_v2 = vrot.slane %v5630_v46, %v12502_v45 }
 0x38d   : > { %7349 = vmatprep.subr.mxu1 %v12424_v15 }
 0x38e   : > { %7351 = vmatpush1.msra.mxu1 %v12426_v44  ;;  %v5645_v10 = vcombine.low %v5637_v5, %v5644_v2 }
 0x38f   : > { %7353 = vmatprep.subr.mxu1 %v12428_v28 }
 0x390   : > { %7355 = vmatpush1.msra.mxu1 %v12430_v7  ;;  %7578 = vst [vmem:[%s9873_s22 + $0x10] sm:$0xff] %v5645_v10 }
 0x391   : > { %7390 = vmatmul.mubr.f32.vlgmr.msra.gmra.mxu1 %v10394_v16 }
 0x3a1   : > { %v5789_v0 = vpop.f32.mrf.mxu0 }
 0x3a3   : > { %v5791_v57 = vpop.f32.mrf.mxu0 }
 0x3a7   : > { %v6021_v24 = vpop.f32.mrf.mxu1 }
 0x3a8   : > { %v6022_v40 = vadd.f32 %v6021_v24, %v5789_v0 }
 0x3a9   : > { %v6023_v9 = vpop.f32.mrf.mxu1 }
 0x3aa   : > { %v6024_v18 = vadd.f32 %v6023_v9, %v5791_v57 }
 0x3c2   : > { %v6158_v32 = vpop.f32.mrf.mxu0 }
 0x3c3   : > { %v6159_v51 = vadd.f32 %v6158_v32, %v6022_v40 }
 0x3c4   : > { %v6160_v29 = vpop.f32.mrf.mxu0 }
 0x3c5   : > { %v6161_v17 = vadd.f32 %v6160_v29, %v6024_v18 }
 0x3c9   : > { %v6264_v38 = vpop.f32.mrf.mxu1 }
 0x3ca   : > { %v6265_v30 = vadd.f32 %v6264_v38, %v6159_v51 }
 0x3cb   : > { %v6266_v42 = vpop.f32.mrf.mxu1 }
 0x3cc   : > { %v6267_v14 = vadd.f32 %v6266_v42, %v6161_v17 }
 0x3e4   : > { %v6432_v15 = vpop.f32.mrf.mxu0 }
 0x3e5   : > { %v6433_v49 = vadd.f32 %v6432_v15, %v6265_v30 }
 0x3e6   : > { %v6434_v3 = vpop.f32.mrf.mxu0 }
 0x3e7   : > { %v6435_v62 = vadd.f32 %v6434_v3, %v6267_v14 }
 0x3eb   : > { %v6536_v47 = vpop.f32.mrf.mxu1 }
 0x3ec   : > { %v6537_v27 = vadd.f32 %v6536_v47, %v6433_v49 }
 0x3ed   : > { %v6538_v52 = vpop.f32.mrf.mxu1 }
 0x3ee   : > { %v6539_v22 = vadd.f32 %v6538_v52, %v6435_v62 }
 0x3f0   : > { %v7400_v34 = vcombine.low %v6537_v27, %v6539_v22 }
 0x3f2   : > { %v7408_v43 = vrot.slane %v7400_v34, %v12502_v45 }
 0x407   : > { %v6644_v44 = vpop.f32.mrf.mxu0 }
 0x409   : > { %v6646_v28 = vpop.f32.mrf.mxu0 }
 0x40d   : > { %v6876_v13 = vpop.f32.mrf.mxu1 }
 0x40e   : > { %v6877_v58 = vadd.f32 %v6876_v13, %v6644_v44 }
 0x40f   : > { %v6878_v7 = vpop.f32.mrf.mxu1 }
 0x410   : > { %v6879_v37 = vadd.f32 %v6878_v7, %v6646_v28 }
 0x428   : > { %v7013_v39 = vpop.f32.mrf.mxu0 }
 0x429   : > { %v7014_v63 = vadd.f32 %v7013_v39, %v6877_v58 }
 0x42a   : > { %v7015_v16 = vpop.f32.mrf.mxu0 }
 0x42b   : > { %v7016_v53 = vadd.f32 %v7015_v16, %v6879_v37 }
 0x42f   : > { %v7119_v6 = vpop.f32.mrf.mxu1 }
 0x430   : > { %v7120_v60 = vadd.f32 %v7119_v6, %v7014_v63 }
 0x431   : > { %v7121_v8 = vpop.f32.mrf.mxu1 }
 0x432   : > { %v7122_v26 = vadd.f32 %v7121_v8, %v7016_v53 }
 0x44a   : > { %v7287_v61 = vpop.f32.mrf.mxu0 }
 0x44b   : > { %v7288_v54 = vadd.f32 %v7287_v61, %v7120_v60 }
 0x44c   : > { %v7289_v21 = vpop.f32.mrf.mxu0 }
 0x44d   : > { %v7290_v35 = vadd.f32 %v7289_v21, %v7122_v26 }
 0x451   : > { %v7391_v41 = vpop.f32.mrf.mxu1 }
 0x452   : > { %v7392_v20 = vadd.f32 %v7391_v41, %v7288_v54 }
 0x453   : > { %v7393_v31 = vpop.f32.mrf.mxu1 }
 0x454   : > { %v7394_v33 = vadd.f32 %v7393_v31, %v7290_v35 }
 0x456   : > { %v7401_v50 = vcombine.low %v7392_v20, %v7394_v33 }
 0x458   : > { %v7415_v11 = vrot.slane %v7401_v50, %v12502_v45 }
 0x45a   : > { %v7416_v1 = vcombine.low %v7408_v43, %v7415_v11 }
 0x45c   : > { %7588 = vst [vmem:[%s9873_s22 + $0x18] sm:$0xff] %v7416_v1 }
 0x45d PF: > { %s16_s17 = sadd.s32 1, %s7716_s17   ;;  %s12503_s15 = smov %s7712_s16 }
 0x45e   : > { %p13_p4 = scmp.ge.s32.totalorder %s16_s17, 4   ;;  %s12504_s16 = smov %s12506_s19 }
 0x460   :  { %15 = sbr.rel (!%p13_p4) target bundleno = 3 (0x3), region = 85 }
 0x465   :  { %7449 = vsyncpa [#allocation3], 1 }
 0x466   :  { %7451 = vsyncpa [#allocation3 + $0x1], 1 }
 0x467   :  { %7452 = vsyncpa [#allocation5], 1 }

</bundles_post_ra>
